<compile_context>
chip_gen: v5e
topology: v5e:2x2
jax: 0.10.0
libtpu: 0.0.40
codegen_flags: <defaults>
</compile_context>

<pallas_src>
import functools

import jax
import jax.numpy as jnp
from jax import lax
from jax.experimental import pallas as pl
from jax.experimental.pallas import tpu as pltpu


def _round_up(x, m):
    return (x + m - 1) // m * m


def _pick_cout_tile(cout):
    for t in (256, 128):
        if cout % t == 0:
            return t
    return _round_up(cout, 8)


# ----------------------------------------------------------------------------
# Fused kernel: conv (single im2col matmul or tap-accumulated matmuls into a
# VMEM scratch accumulator) + per-channel shift (bias / folded BN) + optional
# ReLU + optional bilinear upsample (one extra MXU matmul).
# Grid: (batch, Cout tile).
# ----------------------------------------------------------------------------
def _fused_conv_kernel(*refs, taps, stride, cin, ho, wo_p, hw, sp_out, relu,
                       has_up, im2col):
    if has_up:
        x_ref, w_ref, shift_ref, u_ref, o_ref, acc_ref = refs
    else:
        x_ref, w_ref, shift_ref, o_ref, acc_ref = refs
        u_ref = None

    # ---- per-tap patch extraction -------------------------------------------
    if stride == 1:
        # Static window slice directly off the (1, Hp, Wp, Cin) input ref: no
        # full-x load and no strided value-slice copy.  The reshape is
        # layout-free because wo_p is a multiple of 8 (sublane-aligned merge).
        def get_patch(h0, w0):
            p = x_ref[0, h0:h0 + ho, w0:w0 + wo_p, :]
            return p.reshape(hw, cin)
    else:
        x_full = x_ref[0]                                   # (Hp, Wp, Cin)

        def get_patch(h0, w0):
            p = lax.slice(
                x_full,
                (h0, w0, 0),
                (h0 + (ho - 1) * stride + 1,
                 w0 + (wo_p - 1) * stride + 1, cin),
                (stride, stride, 1))
            return p.reshape(hw, cin)

    # "NT" contraction over Cin (lane dim of both operands) -> (Cout_t, Ho*Wo_p)
    # i.e. channel-major / NCHW-native accumulation.
    nt_dims = (((1,), (1,)), ((), ()))

    if im2col:
        # One big-K matmul: K = KH*KW*Cin (Cin % 128 == 0 so the lane-axis
        # concat is tile-aligned).  One MXU push/drain, no per-tap acc RMW.
        patches = [get_patch(h0, w0) for (h0, w0) in taps]
        cat = patches[0] if len(patches) == 1 else jnp.concatenate(patches,
                                                                   axis=1)
        acc_ref[...] = lax.dot_general(
            w_ref[...], cat, nt_dims, preferred_element_type=jnp.float32)
    else:
        # Tap loop accumulating into the VMEM scratch ref (in-place MXU
        # accumulation / MRB on v7x, one well-defined accumulator home).
        for t, (h0, w0) in enumerate(taps):
            w_tap = w_ref[:, t * cin:(t + 1) * cin]          # (Cout_t, Cin)
            d = lax.dot_general(w_tap, get_patch(h0, w0), nt_dims,
                                preferred_element_type=jnp.float32)
            if t == 0:
                acc_ref[...] = d
            else:
                acc_ref[...] += d

    y = acc_ref[...] + shift_ref[...]                        # (Cout_t, 1) bcast
    if relu:
        y = jnp.maximum(y, 0.0)

    if has_up:
        # Bilinear upsample (align_corners=True) as one MXU matmul with the
        # precomputed kron(Wh, Ww)^T operator; its columns are already padded
        # to sp_out so the store is fully lane-dense.
        # TODO(synk): replace dense kron by the separable Wh/Ww form (2 matmuls)
        # once >2-D dot_general / cheap lane<->sublane reshapes are verified.
        up = jnp.dot(y.astype(jnp.bfloat16), u_ref[...],
                     preferred_element_type=jnp.float32)
        o_ref[...] = up[None].astype(o_ref.dtype)
    else:
        o_ref[0, :, :hw] = y.astype(o_ref.dtype)
        if sp_out > hw:                                      # lane-pad tail
            o_ref[0, :, hw:] = jnp.zeros((y.shape[0], sp_out - hw),
                                         o_ref.dtype)


# ----------------------------------------------------------------------------
# Wrapper
# ----------------------------------------------------------------------------
def _bilinear_matrix(out_size, in_size):
    """Interpolation matrix W (out_size, in_size), align_corners=True."""
    if out_size == 1:
        src = jnp.zeros((1,), jnp.float32)
    else:
        src = jnp.arange(out_size, dtype=jnp.float32) * (in_size - 1) / (out_size - 1)
    i0 = jnp.clip(jnp.floor(src).astype(jnp.int32), 0, max(in_size - 2, 0))
    frac = src - i0.astype(jnp.float32)
    w0 = jax.nn.one_hot(i0, in_size, dtype=jnp.float32) * (1.0 - frac)[:, None]
    w1 = jax.nn.one_hot(jnp.clip(i0 + 1, 0, in_size - 1), in_size,
                        dtype=jnp.float32) * frac[:, None]
    return w0 + w1


def basic_conv(x_nchw, params, *, stride=1, padding=0, dilation=1, groups=1,
               relu=True, bn=False, bias=True, up_size=0):
    """Forward pass of BasicConv. x_nchw: (N, Cin, H, W) float32, NCHW out."""
    assert groups == 1  # TODO(synk): grouped convolution not implemented
    weight = params["weight"]                       # (Cout, Cin, KH, KW)
    cout, cin, kh, kw = weight.shape
    n, cin_x, h, w_in = x_nchw.shape
    assert cin_x == cin

    # Fold bias + BatchNorm (inference, running stats) into scale/shift;
    # fold the scale into the weights so the kernel only adds a shift.
    b = params["bias"] if bias else jnp.zeros((cout,), jnp.float32)
    if bn:
        inv_std = 1.0 / jnp.sqrt(params["running_var"] + 1e-5)
        scale = params["gamma"] * inv_std
        shift = (b - params["running_mean"]) * scale + params["beta"]
    else:
        scale = jnp.ones((cout,), jnp.float32)
        shift = b

    # ---- static geometry ------------------------------------------------------
    ho = (h + 2 * padding - dilation * (kh - 1) - 1) // stride + 1
    wo = (w_in + 2 * padding - dilation * (kw - 1) - 1) // stride + 1
    wo_p = _round_up(wo, 8)                 # layout-free (Ho,Wo,Cin) merge
    hw = ho * wo_p                          # kernel-internal conv spatial

    # up_size == Ho == Wo with align_corners=True is exactly the identity.
    has_up = up_size > 0 and not (up_size == ho and up_size == wo)
    if has_up:
        out_h = out_w = up_size
        sp_out = _round_up(up_size * up_size, 128)
    else:
        out_h, out_w = ho, wo
        sp_out = _round_up(hw, 128)

    tco = _pick_cout_tile(cout)
    cout_p = _round_up(cout, tco)
    n_co = cout_p // tco
    kk = kh * kw * cin
    im2col = (cin % 128 == 0) and (hw * kk * 2 <= (16 << 20))

    # ---- operands (bf16 on the MXU, f32 accumulation) -------------------------
    # TODO(synk): consume NCHW / pad in-kernel to remove this extra HBM pass.
    x_nhwc = jnp.transpose(x_nchw, (0, 2, 3, 1)).astype(jnp.bfloat16)
    wp_need = (kw - 1) * dilation + (wo_p - 1) * stride + 1
    extra_w = max(0, wp_need - (w_in + 2 * padding))
    x_pad = jnp.pad(x_nhwc, ((0, 0), (padding, padding),
                             (padding, padding + extra_w), (0, 0)))
    hp, wp_al = x_pad.shape[1], x_pad.shape[2]

    # weights: (Cout,Cin,KH,KW) -> (Cout_p, KH*KW*Cin), BN/bias scale folded in.
    w_t = jnp.transpose(weight.astype(jnp.float32), (0, 2, 3, 1))
    w_t = w_t * scale.astype(jnp.float32)[:, None, None, None]
    w2 = jnp.pad(w_t.reshape(cout, kk), ((0, cout_p - cout), (0, 0)))
    w2 = w2.astype(jnp.bfloat16)

    shift_p = jnp.pad(shift.astype(jnp.float32), (0, cout_p - cout))
    shift_p = shift_p.reshape(cout_p, 1)

    inputs = [x_pad, w2, shift_p]
    in_specs = [
        pl.BlockSpec((1, hp, wp_al, cin), lambda bi, ci: (bi, 0, 0, 0)),
        pl.BlockSpec((tco, kk), lambda bi, ci: (ci, 0)),
        pl.BlockSpec((tco, 1), lambda bi, ci: (ci, 0)),
    ]
    u_bytes = 0
    if has_up:
        # Dense kron(Wh, Ww)^T with zero rows for the Wo->Wo_p pad columns and
        # zero cols for the Up*Up -> sp_out lane padding: shape (Ho*Wo_p, sp_out).
        kron = jnp.kron(_bilinear_matrix(up_size, ho),
                        _bilinear_matrix(up_size, wo))       # (Up*Up, Ho*Wo)
        kron = kron.reshape(up_size * up_size, ho, wo)
        kron = jnp.pad(kron, ((0, sp_out - up_size * up_size),
                              (0, 0), (0, wo_p - wo)))
        u_t = kron.reshape(sp_out, hw).T.astype(jnp.bfloat16)
        inputs.append(u_t)
        # TODO(synk): pipeline_mode=pl.Buffered(1) here (constant block index).
        in_specs.append(pl.BlockSpec((hw, sp_out), lambda bi, ci: (0, 0)))
        u_bytes = hw * sp_out * 2

    # ---- VMEM budget (double-buffered pipeline blocks + scratch) --------------
    est = 2 * (hp * wp_al * cin * 2 + tco * kk * 2 + tco * 4 + u_bytes
               + tco * sp_out * 4) + tco * hw * 4 + (hw * kk * 2 if im2col else 0)
    vmem_limit = int(min(max(est + est // 2, 32 << 20), 64 << 20))

    taps = tuple((i * dilation, j * dilation)
                 for i in range(kh) for j in range(kw))
    kernel = functools.partial(
        _fused_conv_kernel, taps=taps, stride=stride, cin=cin, ho=ho,
        wo_p=wo_p, hw=hw, sp_out=sp_out, relu=relu, has_up=has_up,
        im2col=im2col)

    out = pl.pallas_call(
        kernel,
        out_shape=jax.ShapeDtypeStruct((n, cout_p, sp_out), jnp.float32),
        grid_spec=pltpu.PrefetchScalarGridSpec(
            num_scalar_prefetch=0,
            grid=(n, n_co),
            in_specs=in_specs,
            out_specs=pl.BlockSpec((1, tco, sp_out), lambda bi, ci: (bi, ci, 0)),
            scratch_shapes=[pltpu.VMEM((tco, hw), jnp.float32)],
        ),
        compiler_params=pltpu.CompilerParams(
            dimension_semantics=("parallel", "parallel"),
            vmem_limit_bytes=vmem_limit),
    )(*inputs)

    # Slice off Cout / lane padding first, then the NCHW reshape is free.
    if has_up:
        return out[:, :cout, :up_size * up_size].reshape(n, cout, out_h, out_w)
    out = out[:, :cout, :hw].reshape(n, cout, ho, wo_p)
    return out[:, :, :, :wo]


# ----------------------------------------------------------------------------
# Pure-JAX reference (verification only)
# ----------------------------------------------------------------------------
def basic_conv_ref(x_nchw, params, *, stride, padding, dilation, relu, bn,
                   bias, up_size):
    weight = params["weight"]
    cout = weight.shape[0]
    y = lax.conv_general_dilated(
        x_nchw.astype(jnp.float32), weight.astype(jnp.float32),
        window_strides=(stride, stride),
        padding=[(padding, padding), (padding, padding)],
        rhs_dilation=(dilation, dilation),
        dimension_numbers=("NCHW", "OIHW", "NCHW"),
        precision=lax.Precision.HIGHEST)
    b = params["bias"] if bias else jnp.zeros((cout,), jnp.float32)
    y = y + b[None, :, None, None]
    if bn:
        inv_std = 1.0 / jnp.sqrt(params["running_var"] + 1e-5)
        y = (y - params["running_mean"][None, :, None, None]) * \
            (params["gamma"] * inv_std)[None, :, None, None] + \
            params["beta"][None, :, None, None]
    if relu:
        y = jnp.maximum(y, 0.0)
    if up_size > 0:
        wh = _bilinear_matrix(up_size, y.shape[2])
        ww = _bilinear_matrix(up_size, y.shape[3])
        y = jnp.einsum("ph,nchw,qw->ncpq", wh, y, ww,
                       precision=lax.Precision.HIGHEST)
    return y


if __name__ == "__main__":
    key = jax.random.PRNGKey(0)
    ks = jax.random.split(key, 12)

    def rel_err(a, b):
        return float(jnp.max(jnp.abs(a - b)) / (jnp.max(jnp.abs(b)) + 1e-6))

    # ---- small-channel tests (exercise the tap-loop path) -------------------
    N, CIN, H, W = 2, 4, 16, 16
    COUT, K = 8, 3
    params = {
        "weight": jax.random.normal(ks[0], (COUT, CIN, K, K), jnp.float32) * 0.1,
        "bias": jax.random.normal(ks[1], (COUT,), jnp.float32) * 0.1,
        "gamma": 1.0 + 0.1 * jax.random.normal(ks[2], (COUT,), jnp.float32),
        "beta": 0.1 * jax.random.normal(ks[3], (COUT,), jnp.float32),
        "running_mean": 0.1 * jax.random.normal(ks[4], (COUT,), jnp.float32),
        "running_var": 1.0 + 0.1 * jnp.abs(
            jax.random.normal(ks[5], (COUT,), jnp.float32)),
    }
    x = jax.random.normal(ks[6], (N, CIN, H, W), jnp.float32)

    # Config 1: Conv3x3 + BN + ReLU + bilinear upsample to 32x32 (fully fused).
    cfg1 = dict(stride=1, padding=1, dilation=1, relu=True, bn=True, bias=True,
                up_size=32)
    out1 = jax.block_until_ready(basic_conv(x, params, **cfg1))
    ref1 = basic_conv_ref(x, params, **cfg1)
    assert out1.shape == (N, COUT, 32, 32), out1.shape
    assert rel_err(out1, ref1) < 2e-2, rel_err(out1, ref1)

    # Config 2: plain Conv3x3 + bias (no BN / ReLU / upsample).
    cfg2 = dict(stride=1, padding=1, dilation=1, relu=False, bn=False,
                bias=True, up_size=0)
    out2 = jax.block_until_ready(basic_conv(x, params, **cfg2))
    ref2 = basic_conv_ref(x, params, **cfg2)
    assert out2.shape == (N, COUT, H, W), out2.shape
    assert rel_err(out2, ref2) < 2e-2, rel_err(out2, ref2)

    # Config 3: identity upsample (up_size == Ho == Wo) is skipped in-kernel.
    cfg3 = dict(stride=1, padding=1, dilation=1, relu=True, bn=True, bias=True,
                up_size=16)
    out3 = jax.block_until_ready(basic_conv(x, params, **cfg3))
    ref3 = basic_conv_ref(x, params, **cfg3)
    assert out3.shape == (N, COUT, 16, 16), out3.shape
    assert rel_err(out3, ref3) < 2e-2, rel_err(out3, ref3)

    # ---- 128-channel test: exercises the single im2col matmul path and the
    #      lane-padded output tail (Ho*Wo = 64 -> padded to 128). -------------
    CIN2, COUT2, H2 = 128, 16, 8
    params2 = {
        "weight": jax.random.normal(ks[7], (COUT2, CIN2, K, K), jnp.float32) * 0.05,
        "bias": jax.random.normal(ks[8], (COUT2,), jnp.float32) * 0.1,
        "gamma": 1.0 + 0.1 * jax.random.normal(ks[9], (COUT2,), jnp.float32),
        "beta": 0.1 * jax.random.normal(ks[10], (COUT2,), jnp.float32),
        "running_mean": jnp.zeros((COUT2,), jnp.float32),
        "running_var": jnp.ones((COUT2,), jnp.float32),
    }
    x2 = jax.random.normal(ks[11], (N, CIN2, H2, H2), jnp.float32)
    cfg4 = dict(stride=1, padding=1, dilation=1, relu=True, bn=True, bias=True,
                up_size=0)
    out4 = jax.block_until_ready(basic_conv(x2, params2, **cfg4))
    ref4 = basic_conv_ref(x2, params2, **cfg4)
    assert out4.shape == (N, COUT2, H2, H2), out4.shape
    assert rel_err(out4, ref4) < 2e-2, rel_err(out4, ref4)

    print("KERNEL_OK")
</pallas_src>

<mosaic_0001>
module attributes {stable_mosaic.version = 11 : i64} {
  func.func @_fused_conv_kernel(%arg0: i32, %arg1: i32, %arg2: memref<1x18x18x4xbf16, #tpu.memory_space<vmem>>, %arg3: memref<8x36xbf16, #tpu.memory_space<vmem>>, %arg4: memref<8x1xf32, #tpu.memory_space<vmem>>, %arg5: memref<256x1024xbf16, #tpu.memory_space<vmem>>, %arg6: memref<1x8x1024xf32, #tpu.memory_space<vmem>>, %arg7: memref<8x256xf32, #tpu.memory_space<vmem>>) attributes {dimension_semantics = [#tpu.dimension_semantics<parallel>, #tpu.dimension_semantics<parallel>], iteration_bounds = array<i64: 2, 1>, scalar_prefetch = 0 : i64, scratch_operands = 1 : i64, tpu.core_type = #tpu.core_type<tc>, window_params = [{transform_indices = @transform_0, window_bounds = array<i64: 1, 18, 18, 4>}, {transform_indices = @transform_1, window_bounds = array<i64: 8, 36>}, {transform_indices = @transform_2, window_bounds = array<i64: 8, 1>}, {pipeline_mode = #tpu.pipeline_mode<synchronous>, transform_indices = @transform_3, window_bounds = array<i64: 256, 1024>}, {transform_indices = @transform_4, window_bounds = array<i64: 1, 8, 1024>}]} {
    %c0 = arith.constant 0 : index
    %c0_0 = arith.constant 0 : index
    %0 = vector.load %arg3[%c0, %c0_0] : memref<8x36xbf16, #tpu.memory_space<vmem>>, vector<8x4xbf16>
    %c0_1 = arith.constant 0 : index
    %c0_2 = arith.constant 0 : index
    %c0_3 = arith.constant 0 : index
    %c0_4 = arith.constant 0 : index
    %1 = vector.load %arg2[%c0_1, %c0_2, %c0_3, %c0_4] : memref<1x18x18x4xbf16, #tpu.memory_space<vmem>>, vector<1x16x16x4xbf16>
    %2 = vector.shape_cast %1 : vector<1x16x16x4xbf16> to vector<16x16x4xbf16>
    %3 = vector.shape_cast %2 : vector<16x16x4xbf16> to vector<256x4xbf16>
    %cst = arith.constant dense<0.000000e+00> : vector<8x256xf32>
    %4 = tpu.matmul %0, %3, %cst {dimension_numbers = #tpu.dot_dimension_numbers<[1], [1], [0], [0], [0, 0, 1, 0], [], []>} : vector<8x4xbf16>, vector<256x4xbf16>, vector<8x256xf32> -> vector<8x256xf32>
    %c0_5 = arith.constant 0 : index
    %c0_6 = arith.constant 0 : index
    %5 = vector.load %arg7[%c0_5, %c0_6] : memref<8x256xf32, #tpu.memory_space<vmem>>, vector<8x256xf32>
    tpu.vector_store %arg7[%c0_5, %c0_6], %4 {strides = array<i32>} : memref<8x256xf32, #tpu.memory_space<vmem>>, vector<8x256xf32>,
    %c0_7 = arith.constant 0 : index
    %c4 = arith.constant 4 : index
    %6 = vector.load %arg3[%c0_7, %c4] : memref<8x36xbf16, #tpu.memory_space<vmem>>, vector<8x4xbf16>
    %c0_8 = arith.constant 0 : index
    %c0_9 = arith.constant 0 : index
    %c1 = arith.constant 1 : index
    %c0_10 = arith.constant 0 : index
    %7 = vector.load %arg2[%c0_8, %c0_9, %c1, %c0_10] : memref<1x18x18x4xbf16, #tpu.memory_space<vmem>>, vector<1x16x16x4xbf16>
    %8 = vector.shape_cast %7 : vector<1x16x16x4xbf16> to vector<16x16x4xbf16>
    %9 = vector.shape_cast %8 : vector<16x16x4xbf16> to vector<256x4xbf16>
    %cst_11 = arith.constant dense<0.000000e+00> : vector<8x256xf32>
    %10 = tpu.matmul %6, %9, %cst_11 {dimension_numbers = #tpu.dot_dimension_numbers<[1], [1], [0], [0], [0, 0, 1, 0], [], []>} : vector<8x4xbf16>, vector<256x4xbf16>, vector<8x256xf32> -> vector<8x256xf32>
    %c0_12 = arith.constant 0 : index
    %c0_13 = arith.constant 0 : index
    %11 = vector.load %arg7[%c0_12, %c0_13] : memref<8x256xf32, #tpu.memory_space<vmem>>, vector<8x256xf32>
    %12 = arith.addf %11, %10 : vector<8x256xf32>
    %c0_14 = arith.constant 0 : index
    %c0_15 = arith.constant 0 : index
    %13 = vector.load %arg7[%c0_14, %c0_15] : memref<8x256xf32, #tpu.memory_space<vmem>>, vector<8x256xf32>
    tpu.vector_store %arg7[%c0_14, %c0_15], %12 {strides = array<i32>} : memref<8x256xf32, #tpu.memory_space<vmem>>, vector<8x256xf32>,
    %c0_16 = arith.constant 0 : index
    %c8 = arith.constant 8 : index
    %14 = vector.load %arg3[%c0_16, %c8] : memref<8x36xbf16, #tpu.memory_space<vmem>>, vector<8x4xbf16>
    %c0_17 = arith.constant 0 : index
    %c0_18 = arith.constant 0 : index
    %c2 = arith.constant 2 : index
    %c0_19 = arith.constant 0 : index
    %15 = vector.load %arg2[%c0_17, %c0_18, %c2, %c0_19] : memref<1x18x18x4xbf16, #tpu.memory_space<vmem>>, vector<1x16x16x4xbf16>
    %16 = vector.shape_cast %15 : vector<1x16x16x4xbf16> to vector<16x16x4xbf16>
    %17 = vector.shape_cast %16 : vector<16x16x4xbf16> to vector<256x4xbf16>
    %cst_20 = arith.constant dense<0.000000e+00> : vector<8x256xf32>
    %18 = tpu.matmul %14, %17, %cst_20 {dimension_numbers = #tpu.dot_dimension_numbers<[1], [1], [0], [0], [0, 0, 1, 0], [], []>} : vector<8x4xbf16>, vector<256x4xbf16>, vector<8x256xf32> -> vector<8x256xf32>
    %c0_21 = arith.constant 0 : index
    %c0_22 = arith.constant 0 : index
    %19 = vector.load %arg7[%c0_21, %c0_22] : memref<8x256xf32, #tpu.memory_space<vmem>>, vector<8x256xf32>
    %20 = arith.addf %19, %18 : vector<8x256xf32>
    %c0_23 = arith.constant 0 : index
    %c0_24 = arith.constant 0 : index
    %21 = vector.load %arg7[%c0_23, %c0_24] : memref<8x256xf32, #tpu.memory_space<vmem>>, vector<8x256xf32>
    tpu.vector_store %arg7[%c0_23, %c0_24], %20 {strides = array<i32>} : memref<8x256xf32, #tpu.memory_space<vmem>>, vector<8x256xf32>,
    %c0_25 = arith.constant 0 : index
    %c12 = arith.constant 12 : index
    %22 = vector.load %arg3[%c0_25, %c12] : memref<8x36xbf16, #tpu.memory_space<vmem>>, vector<8x4xbf16>
    %c0_26 = arith.constant 0 : index
    %c1_27 = arith.constant 1 : index
    %c0_28 = arith.constant 0 : index
    %c0_29 = arith.constant 0 : index
    %23 = vector.load %arg2[%c0_26, %c1_27, %c0_28, %c0_29] : memref<1x18x18x4xbf16, #tpu.memory_space<vmem>>, vector<1x16x16x4xbf16>
    %24 = vector.shape_cast %23 : vector<1x16x16x4xbf16> to vector<16x16x4xbf16>
    %25 = vector.shape_cast %24 : vector<16x16x4xbf16> to vector<256x4xbf16>
    %cst_30 = arith.constant dense<0.000000e+00> : vector<8x256xf32>
    %26 = tpu.matmul %22, %25, %cst_30 {dimension_numbers = #tpu.dot_dimension_numbers<[1], [1], [0], [0], [0, 0, 1, 0], [], []>} : vector<8x4xbf16>, vector<256x4xbf16>, vector<8x256xf32> -> vector<8x256xf32>
    %c0_31 = arith.constant 0 : index
    %c0_32 = arith.constant 0 : index
    %27 = vector.load %arg7[%c0_31, %c0_32] : memref<8x256xf32, #tpu.memory_space<vmem>>, vector<8x256xf32>
    %28 = arith.addf %27, %26 : vector<8x256xf32>
    %c0_33 = arith.constant 0 : index
    %c0_34 = arith.constant 0 : index
    %29 = vector.load %arg7[%c0_33, %c0_34] : memref<8x256xf32, #tpu.memory_space<vmem>>, vector<8x256xf32>
    tpu.vector_store %arg7[%c0_33, %c0_34], %28 {strides = array<i32>} : memref<8x256xf32, #tpu.memory_space<vmem>>, vector<8x256xf32>,
    %c0_35 = arith.constant 0 : index
    %c16 = arith.constant 16 : index
    %30 = vector.load %arg3[%c0_35, %c16] : memref<8x36xbf16, #tpu.memory_space<vmem>>, vector<8x4xbf16>
    %c0_36 = arith.constant 0 : index
    %c1_37 = arith.constant 1 : index
    %c1_38 = arith.constant 1 : index
    %c0_39 = arith.constant 0 : index
    %31 = vector.load %arg2[%c0_36, %c1_37, %c1_38, %c0_39] : memref<1x18x18x4xbf16, #tpu.memory_space<vmem>>, vector<1x16x16x4xbf16>
    %32 = vector.shape_cast %31 : vector<1x16x16x4xbf16> to vector<16x16x4xbf16>
    %33 = vector.shape_cast %32 : vector<16x16x4xbf16> to vector<256x4xbf16>
    %cst_40 = arith.constant dense<0.000000e+00> : vector<8x256xf32>
    %34 = tpu.matmul %30, %33, %cst_40 {dimension_numbers = #tpu.dot_dimension_numbers<[1], [1], [0], [0], [0, 0, 1, 0], [], []>} : vector<8x4xbf16>, vector<256x4xbf16>, vector<8x256xf32> -> vector<8x256xf32>
    %c0_41 = arith.constant 0 : index
    %c0_42 = arith.constant 0 : index
    %35 = vector.load %arg7[%c0_41, %c0_42] : memref<8x256xf32, #tpu.memory_space<vmem>>, vector<8x256xf32>
    %36 = arith.addf %35, %34 : vector<8x256xf32>
    %c0_43 = arith.constant 0 : index
    %c0_44 = arith.constant 0 : index
    %37 = vector.load %arg7[%c0_43, %c0_44] : memref<8x256xf32, #tpu.memory_space<vmem>>, vector<8x256xf32>
    tpu.vector_store %arg7[%c0_43, %c0_44], %36 {strides = array<i32>} : memref<8x256xf32, #tpu.memory_space<vmem>>, vector<8x256xf32>,
    %c0_45 = arith.constant 0 : index
    %c20 = arith.constant 20 : index
    %38 = vector.load %arg3[%c0_45, %c20] : memref<8x36xbf16, #tpu.memory_space<vmem>>, vector<8x4xbf16>
    %c0_46 = arith.constant 0 : index
    %c1_47 = arith.constant 1 : index
    %c2_48 = arith.constant 2 : index
    %c0_49 = arith.constant 0 : index
    %39 = vector.load %arg2[%c0_46, %c1_47, %c2_48, %c0_49] : memref<1x18x18x4xbf16, #tpu.memory_space<vmem>>, vector<1x16x16x4xbf16>
    %40 = vector.shape_cast %39 : vector<1x16x16x4xbf16> to vector<16x16x4xbf16>
    %41 = vector.shape_cast %40 : vector<16x16x4xbf16> to vector<256x4xbf16>
    %cst_50 = arith.constant dense<0.000000e+00> : vector<8x256xf32>
    %42 = tpu.matmul %38, %41, %cst_50 {dimension_numbers = #tpu.dot_dimension_numbers<[1], [1], [0], [0], [0, 0, 1, 0], [], []>} : vector<8x4xbf16>, vector<256x4xbf16>, vector<8x256xf32> -> vector<8x256xf32>
    %c0_51 = arith.constant 0 : index
    %c0_52 = arith.constant 0 : index
    %43 = vector.load %arg7[%c0_51, %c0_52] : memref<8x256xf32, #tpu.memory_space<vmem>>, vector<8x256xf32>
    %44 = arith.addf %43, %42 : vector<8x256xf32>
    %c0_53 = arith.constant 0 : index
    %c0_54 = arith.constant 0 : index
    %45 = vector.load %arg7[%c0_53, %c0_54] : memref<8x256xf32, #tpu.memory_space<vmem>>, vector<8x256xf32>
    tpu.vector_store %arg7[%c0_53, %c0_54], %44 {strides = array<i32>} : memref<8x256xf32, #tpu.memory_space<vmem>>, vector<8x256xf32>,
    %c0_55 = arith.constant 0 : index
    %c24 = arith.constant 24 : index
    %46 = vector.load %arg3[%c0_55, %c24] : memref<8x36xbf16, #tpu.memory_space<vmem>>, vector<8x4xbf16>
    %c0_56 = arith.constant 0 : index
    %c2_57 = arith.constant 2 : index
    %c0_58 = arith.constant 0 : index
    %c0_59 = arith.constant 0 : index
    %47 = vector.load %arg2[%c0_56, %c2_57, %c0_58, %c0_59] : memref<1x18x18x4xbf16, #tpu.memory_space<vmem>>, vector<1x16x16x4xbf16>
    %48 = vector.shape_cast %47 : vector<1x16x16x4xbf16> to vector<16x16x4xbf16>
    %49 = vector.shape_cast %48 : vector<16x16x4xbf16> to vector<256x4xbf16>
    %cst_60 = arith.constant dense<0.000000e+00> : vector<8x256xf32>
    %50 = tpu.matmul %46, %49, %cst_60 {dimension_numbers = #tpu.dot_dimension_numbers<[1], [1], [0], [0], [0, 0, 1, 0], [], []>} : vector<8x4xbf16>, vector<256x4xbf16>, vector<8x256xf32> -> vector<8x256xf32>
    %c0_61 = arith.constant 0 : index
    %c0_62 = arith.constant 0 : index
    %51 = vector.load %arg7[%c0_61, %c0_62] : memref<8x256xf32, #tpu.memory_space<vmem>>, vector<8x256xf32>
    %52 = arith.addf %51, %50 : vector<8x256xf32>
    %c0_63 = arith.constant 0 : index
    %c0_64 = arith.constant 0 : index
    %53 = vector.load %arg7[%c0_63, %c0_64] : memref<8x256xf32, #tpu.memory_space<vmem>>, vector<8x256xf32>
    tpu.vector_store %arg7[%c0_63, %c0_64], %52 {strides = array<i32>} : memref<8x256xf32, #tpu.memory_space<vmem>>, vector<8x256xf32>,
    %c0_65 = arith.constant 0 : index
    %c28 = arith.constant 28 : index
    %54 = vector.load %arg3[%c0_65, %c28] : memref<8x36xbf16, #tpu.memory_space<vmem>>, vector<8x4xbf16>
    %c0_66 = arith.constant 0 : index
    %c2_67 = arith.constant 2 : index
    %c1_68 = arith.constant 1 : index
    %c0_69 = arith.constant 0 : index
    %55 = vector.load %arg2[%c0_66, %c2_67, %c1_68, %c0_69] : memref<1x18x18x4xbf16, #tpu.memory_space<vmem>>, vector<1x16x16x4xbf16>
    %56 = vector.shape_cast %55 : vector<1x16x16x4xbf16> to vector<16x16x4xbf16>
    %57 = vector.shape_cast %56 : vector<16x16x4xbf16> to vector<256x4xbf16>
    %cst_70 = arith.constant dense<0.000000e+00> : vector<8x256xf32>
    %58 = tpu.matmul %54, %57, %cst_70 {dimension_numbers = #tpu.dot_dimension_numbers<[1], [1], [0], [0], [0, 0, 1, 0], [], []>} : vector<8x4xbf16>, vector<256x4xbf16>, vector<8x256xf32> -> vector<8x256xf32>
    %c0_71 = arith.constant 0 : index
    %c0_72 = arith.constant 0 : index
    %59 = vector.load %arg7[%c0_71, %c0_72] : memref<8x256xf32, #tpu.memory_space<vmem>>, vector<8x256xf32>
    %60 = arith.addf %59, %58 : vector<8x256xf32>
    %c0_73 = arith.constant 0 : index
    %c0_74 = arith.constant 0 : index
    %61 = vector.load %arg7[%c0_73, %c0_74] : memref<8x256xf32, #tpu.memory_space<vmem>>, vector<8x256xf32>
    tpu.vector_store %arg7[%c0_73, %c0_74], %60 {strides = array<i32>} : memref<8x256xf32, #tpu.memory_space<vmem>>, vector<8x256xf32>,
    %c0_75 = arith.constant 0 : index
    %c32 = arith.constant 32 : index
    %62 = vector.load %arg3[%c0_75, %c32] : memref<8x36xbf16, #tpu.memory_space<vmem>>, vector<8x4xbf16>
    %c0_76 = arith.constant 0 : index
    %c2_77 = arith.constant 2 : index
    %c2_78 = arith.constant 2 : index
    %c0_79 = arith.constant 0 : index
    %63 = vector.load %arg2[%c0_76, %c2_77, %c2_78, %c0_79] : memref<1x18x18x4xbf16, #tpu.memory_space<vmem>>, vector<1x16x16x4xbf16>
    %64 = vector.shape_cast %63 : vector<1x16x16x4xbf16> to vector<16x16x4xbf16>
    %65 = vector.shape_cast %64 : vector<16x16x4xbf16> to vector<256x4xbf16>
    %cst_80 = arith.constant dense<0.000000e+00> : vector<8x256xf32>
    %66 = tpu.matmul %62, %65, %cst_80 {dimension_numbers = #tpu.dot_dimension_numbers<[1], [1], [0], [0], [0, 0, 1, 0], [], []>} : vector<8x4xbf16>, vector<256x4xbf16>, vector<8x256xf32> -> vector<8x256xf32>
    %c0_81 = arith.constant 0 : index
    %c0_82 = arith.constant 0 : index
    %67 = vector.load %arg7[%c0_81, %c0_82] : memref<8x256xf32, #tpu.memory_space<vmem>>, vector<8x256xf32>
    %68 = arith.addf %67, %66 : vector<8x256xf32>
    %c0_83 = arith.constant 0 : index
    %c0_84 = arith.constant 0 : index
    %69 = vector.load %arg7[%c0_83, %c0_84] : memref<8x256xf32, #tpu.memory_space<vmem>>, vector<8x256xf32>
    tpu.vector_store %arg7[%c0_83, %c0_84], %68 {strides = array<i32>} : memref<8x256xf32, #tpu.memory_space<vmem>>, vector<8x256xf32>,
    %c0_85 = arith.constant 0 : index
    %c0_86 = arith.constant 0 : index
    %70 = vector.load %arg7[%c0_85, %c0_86] : memref<8x256xf32, #tpu.memory_space<vmem>>, vector<8x256xf32>
    %c0_87 = arith.constant 0 : index
    %c0_88 = arith.constant 0 : index
    %71 = vector.load %arg4[%c0_87, %c0_88] : memref<8x1xf32, #tpu.memory_space<vmem>>, vector<8x1xf32>
    %72 = vector.broadcast %71 : vector<8x1xf32> to vector<8x256xf32>
    %73 = arith.addf %70, %72 : vector<8x256xf32>
    %cst_89 = arith.constant 0.000000e+00 : f32
    %74 = vector.broadcast %cst_89 : f32 to vector<8x256xf32>
    %75 = arith.maximumf %73, %74 : vector<8x256xf32>
    %76 = arith.truncf %75 : vector<8x256xf32> to vector<8x256xbf16>
    %c0_90 = arith.constant 0 : index
    %c0_91 = arith.constant 0 : index
    %77 = vector.load %arg5[%c0_90, %c0_91] : memref<256x1024xbf16, #tpu.memory_space<vmem>>, vector<256x1024xbf16>
    %cst_92 = arith.constant dense<0.000000e+00> : vector<8x1024xf32>
    %78 = tpu.matmul %76, %77, %cst_92 {dimension_numbers = #tpu.dot_dimension_numbers<[1], [0], [0], [1], [0, 0, 1, 1], [], []>} : vector<8x256xbf16>, vector<256x1024xbf16>, vector<8x1024xf32> -> vector<8x1024xf32>
    %79 = vector.shape_cast %78 : vector<8x1024xf32> to vector<1x8x1024xf32>
    %c0_93 = arith.constant 0 : index
    %c0_94 = arith.constant 0 : index
    %c0_95 = arith.constant 0 : index
    %80 = vector.load %arg6[%c0_93, %c0_94, %c0_95] : memref<1x8x1024xf32, #tpu.memory_space<vmem>>, vector<1x8x1024xf32>
    tpu.vector_store %arg6[%c0_93, %c0_94, %c0_95], %79 {strides = array<i32>} : memref<1x8x1024xf32, #tpu.memory_space<vmem>>, vector<1x8x1024xf32>,
    return
  }
  func.func @transform_0(%arg0: i32, %arg1: i32) -> (i32, i32, i32, i32) {
    %c0_i32 = arith.constant 0 : i32
    %c0_i32_0 = arith.constant 0 : i32
    %c0_i32_1 = arith.constant 0 : i32
    %c0_i32_2 = arith.constant 0 : i32
    return %arg0, %c0_i32, %c0_i32_0, %c0_i32_1 : i32, i32, i32, i32
  }
  func.func @transform_1(%arg0: i32, %arg1: i32) -> (i32, i32) {
    %c0_i32 = arith.constant 0 : i32
    %c0_i32_0 = arith.constant 0 : i32
    return %arg1, %c0_i32 : i32, i32
  }
  func.func @transform_2(%arg0: i32, %arg1: i32) -> (i32, i32) {
    %c0_i32 = arith.constant 0 : i32
    %c0_i32_0 = arith.constant 0 : i32
    return %arg1, %c0_i32 : i32, i32
  }
  func.func @transform_3(%arg0: i32, %arg1: i32) -> (i32, i32) {
    %c0_i32 = arith.constant 0 : i32
    %c0_i32_0 = arith.constant 0 : i32
    %c0_i32_1 = arith.constant 0 : i32
    return %c0_i32, %c0_i32_0 : i32, i32
  }
  func.func @transform_4(%arg0: i32, %arg1: i32) -> (i32, i32, i32) {
    %c0_i32 = arith.constant 0 : i32
    %c0_i32_0 = arith.constant 0 : i32
    return %arg0, %arg1, %c0_i32 : i32, i32, i32
  }
}

</mosaic_0001>

<bundles_post_ra>
// kernel: tpu_custom_call.1
= control target key start
LH: loop header
LB: loop body
LE: loop exit
PB: predicated region body
PF: predicated region fallthrough
CT: control target
= control target key end

     0   :  { %9 = vsyncpa [#allocation4], 0  ;;  %s7331_s0 = inlined_call_operand.vmem [shape: bf16[2,18,18,4], index: 0, kind: input, shape index: {}]   ;;  %s7332_s1 = inlined_call_operand.vmem [shape: bf16[8,36], index: 1, kind: input, shape index: {}]   ;;  %s7333_s2 = inlined_call_operand.vmem [shape: f32[8,1], index: 2, kind: input, shape index: {}]   ;;  %s7334_s3 = inlined_call_operand.hbm [shape: bf16[256,1024], index: 3, kind: input, shape index: {}]   ;;  %s7335_s4 = inlined_call_operand.hbm [shape: f32[2,8,1024], index: 4, kind: output, shape index: {}]  }
   0x1   :  { %10 = vsyncpa [#allocation5], 0 }
   0x2   :  { %12 = vsyncpa [#allocation5 + $0x1], 0  ;;  %s6185_s15 = smov 0   ;;  %s6187_s16 = smov 0  }
   0x3   :  { %s6189_s17 = smov 0   ;;  %s6191_s18 = smov 0  }
   0x4   :  { %s6193_s19 = smov 0   ;;  %s6195_s20 = smov 0  }
   0x5 LB: > { %s4735_s21 = sadd.s32 4294967295, %s6146_s20   ;;  %s4736_s22 = sadd.s32 4294967294, %s6146_s20   ;;  %s6146_s20 = sphi %s6195_s20, %s18_s20   ;;  %s6142_s19 = sphi %s6193_s19, %s7346_s19   ;;  %s6138_s18 = sphi %s6191_s18, %s7345_s18   ;;  %s6134_s17 = sphi %s6189_s17, %s7344_s17   ;;  %s6130_s16 = sphi %s6187_s16, %s7343_s16   ;;  %s6126_s15 = sphi %s6185_s15, %s7342_s15  }
   0x6   : > { %s30_s23 = sadd.s32 1, %s6142_s19  ;;  %s138_s24 = sadd.s32 1, %s6134_s17 }
   0x7   : > { %p32_p0 = scmp.ge.s32.totalorder %s30_s23, 2  ;;  %p148_p1 = scmp.ne.s32.totalorder %s6134_s17, %s6130_s16 }
   0x8   : > { %p149_p2 = scmp.eq.s32.totalorder %s4735_s21, 1  ;;  %p154_p3 = scmp.ne.s32.totalorder %s6130_s16, %s6126_s15 }
   0x9   : > { %s7348_s23 = smov (%p32_p0, %s30_s23), 0  ;;  %p155_p5 = scmp.eq.s32.totalorder %s4736_s22, 1 }
   0xa   : > { %p6225_p4 = por %p149_p2, %p148_p1  ;;  %s133_s26 = ssub.s32 %s6142_s19, %s7348_s23 }
   0xb   : > { %p4737_p6 = scmp.ge.s32.totalorder %s6146_s20, 1  ;;  %p136_p7 = scmp.eq.s32.totalorder %s133_s26, 0 }
   0xc   : > { %p6232_p8 = por %p155_p5, %p154_p3  ;;  %p162_p9 = scmp.lt.s32.totalorder %s6146_s20, 3 }
   0xd   : > { %s6238_s28 = scalar_select %p136_p7, %s6134_s17, %s138_s24  }
   0xe   : > { %p163_p10 = pnand %p4737_p6, %p162_p9  ;;  %p5969_p11 = scmp.eq.s32.totalorder %s4735_s21, 0 }
   0xf   : > { %s187_s5 = sshll.u32 %s7334_s3, 4  ;;  %s6148_s6 = smov [#allocation3]   ;;  %s188_s5 = int_to_ptr.hbm [resolvable:$true] %s187_s5 }
  0x10   : > { %p5961_p12 = pneg %p163_p10  ;;  %s189_s7 = sshll.u32 %s6148_s6, 4  ;;  %s190_s7 = int_to_ptr.vmem [resolvable:$true] %s189_s7 }
  0x11   : > { %s6149_s8 = smov 512   ;;  %s6150_s9 = smov 32  }
  0x12   : > { %p5962_p13 = pnand %p5969_p11, %p5961_p12  ;;  %213 = sbr.rel (%p163_p10) target bundleno = 805 (0x325), region = 36 }
  0x14   : > { %5964 = dma.hbm_to_vmem [thread:$0]  (!%p5962_p13), %s188_s5, 16384, %s190_s7, [#allocation4], %s6149_s8, %s6149_s8, %s6150_s9  }
  0x17   : > { %6117 = dma.done.wait (%p5969_p11), [#allocation4], 16384  }
  0x18   : > { %6119 = vsyncadd (%p5969_p11), [#allocation4], 4294950912  ;;  %p248_p0 = scmp.lt.s32.totalorder %s6138_s18, 1  ;;  %vm374_vm0 = vcmask 31744   ;;  %v454_v2 = vld [vmem:[%s7332_s1] sm:$0xf] }
  0x19   : > { %vm503_vm1 = vsmask.f32 3328  ;;  %v891_v3 = vunpack.c.l.b16 %v454_v2  ;;  %v1026_v6 = vld [vmem:[%s7332_s1] sm:$0xf]  ;;  %vm504_vm2 = vsmask.f32 7440 }
  0x1a   : > { %s249_s10 = scalar_select %p248_p0, %s6138_s18, 1  ;;  %v1239_v9 = vunpack.c.l.b16 %v1026_v6  ;;  %v1374_v40 = vld [vmem:[%s7332_s1] sm:$0xf]  ;;  %vm6278_vm3 = vmor %vm503_vm1, %vm504_vm2  ;;  %vm1123_vm4 = vcmask 1042432   ;;  %vm1124_vm5 = vcmask 1046532  }
  0x1b   : > { %v892_v12 = vpack.c.b16 %v891_v3, %v891_v3  ;;  %s6151_s29 = smov 124   ;;  %v1409_v54 = vunpack.c.l.b16 %v1374_v40  ;;  %s6152_s6 = smov 120   ;;  %vm6392_vm6 = vmor %vm1123_vm4, %vm1124_vm5 }
  0x1c   : > { %s5954_s11 = smul.u32 216, %s249_s10  ;;  %v1240_v22 = vpack.c.b16 %v1239_v9, %v1239_v9  ;;  %s6153_s7 = smov 116  }
  0x1d   : > { %893 = vrot.lane.b32.xlu0 %v892_v12, %s6151_s29  ;;  %s6154_s10 = smov 112   ;;  %s6155_s22 = smov 108  }
  0x1e   : > { %s6248_s14 = scalar_lea.vmem %s7331_s0, %s5954_s11  ;;  %s6156_s29 = smov 100  }
  0x1f   : > { %v5784_v0 = vld [vmem:[%s6248_s14 + $0x54] sm:$0xff]  ;;  %v5783_v4 = vld [vmem:[%s6248_s14 + $0x48] sm:$0xff]  ;;  %v478_v15 = vld [vmem:[%s6248_s14 + $0x5c] sm:$0x1]  ;;  %s6158_s9 = smov 96   ;;  %s5953_s21 = sshll.u32 %s6138_s18, 6 }
  0x20   : > { %v5792_v1 = vld [vmem:[%s6248_s14 + $0xb4] sm:$0xff]  ;;  %v5791_v5 = vld [vmem:[%s6248_s14 + $0xa8] sm:$0xff]  ;;  %v400_v7 = vsel %vm374_vm0, %v5784_v0, 0  ;;  %v397_v13 = vsel %vm374_vm0, %v5783_v4, 0  ;;  %v5782_v21 = vld [vmem:[%s6248_s14 + $0x3c] sm:$0xff]  ;;  %v694_v24 = vshll.u32 %v478_v15, 16  ;;  %s4618_s26 = scalar_lea.hbm %s7335_s4, %s5953_s21 }
  0x21   : > { %v424_v8 = vsel %vm374_vm0, %v5792_v1, 0  ;;  %v476_v10 = vld [vmem:[%s6248_s14 + $0x54] sm:$0xf]  ;;  %v477_v11 = vld [vmem:[%s6248_s14 + $0x58] sm:$0xf]  ;;  %426 = vmatpush.bf16.xpose.msra.mxu0 %v400_v7  ;;  %v421_v14 = vsel %vm374_vm0, %v5791_v5, 0  ;;  %v1410_v1 = vpack.c.b16 %v1409_v54, %v1409_v54 }
  0x22   : > { %439 = vmatpush.bf16.xpose.msra.mxu1 %v424_v8  ;;  %v675_v16 = vshrl.u32 %v476_v10, 16  ;;  %v678_v17 = vshll.u32 %v476_v10, 16  ;;  %v684_v18 = vshll.u32 %v477_v11, 16  ;;  %v688_v19 = vshrl.u32 %v477_v11, 16  ;;  %v500_v20 = vld [vmem:[%s6248_s14 + $0xb4] sm:$0xf] }
  0x23   : > { %v501_v25 = vld [vmem:[%s6248_s14 + $0xb8] sm:$0xf]  ;;  %v502_v26 = vld [vmem:[%s6248_s14 + $0xbc] sm:$0x1]  ;;  %v867_v30 = vshrl.u32 %v500_v20, 16  ;;  %v696_v32 = vrot.slane %v694_v24, 5  ;;  %1411 = vrot.lane.b32.xlu1 %v1410_v1, %s6153_s7 }
  0x24   : > { %v677_v23 = vrot.slane %v675_v16, 4  ;;  %v680_v27 = vrot.slane %v678_v17, 5  ;;  %v686_v28 = vrot.slane %v684_v18, 5  ;;  %v690_v29 = vrot.slane %v688_v19, 4  ;;  %v5790_v31 = vld [vmem:[%s6248_s14 + $0x9c] sm:$0xff]  ;;  %v5781_v24 = vld [vmem:[%s6248_s14 + $0x30] sm:$0xff] }
  0x25   : > { %v870_v33 = vshll.u32 %v500_v20, 16  ;;  %v876_v34 = vshll.u32 %v501_v25, 16  ;;  %v880_v35 = vshrl.u32 %v501_v25, 16  ;;  %v869_v38 = vrot.slane %v867_v30, 4  ;;  %v473_v41 = vld [vmem:[%s6248_s14 + $0x48] sm:$0xf]  ;;  %1241 = vrot.lane.b32.xlu0 %v1240_v22, %s6152_s6 }
  0x26   : > { %v681_v36 = vor.u32 %v680_v27, %v677_v23  ;;  %v691_v37 = vor.u32 %v690_v29, %v686_v28  ;;  %v886_v39 = vshll.u32 %v502_v26, 16  ;;  %v394_v46 = vsel %vm374_vm0, %v5782_v21, 0  ;;  %v474_v47 = vld [vmem:[%s6248_s14 + $0x4c] sm:$0xf]  ;;  %v475_v0 = vld [vmem:[%s6248_s14 + $0x50] sm:$0x1] }
  0x27   : > { %v872_v43 = vrot.slane %v870_v33, 5  ;;  %v878_v44 = vrot.slane %v876_v34, 5  ;;  %v882_v45 = vrot.slane %v880_v35, 4  ;;  %v418_v51 = vsel %vm374_vm0, %v5790_v31, 0  ;;  %v497_v5 = vld [vmem:[%s6248_s14 + $0xa8] sm:$0xf] }
  0x28   : > { %v682_v48 = vrot.slane %v681_v36, 4  ;;  %v692_v49 = vrot.slane %v691_v37, 4  ;;  %v888_v50 = vrot.slane %v886_v39, 5  ;;  %v651_v55 = vshrl.u32 %v473_v41, 16  ;;  %v498_v10 = vld [vmem:[%s6248_s14 + $0xac] sm:$0xf] }
  0x29   : > { %427 = vmatpush.bf16.xpose.msra.mxu0 %v397_v13  ;;  %v873_v52 = vor.u32 %v872_v43, %v869_v38  ;;  %v883_v53 = vor.u32 %v882_v45, %v878_v44  ;;  %v654_v58 = vshll.u32 %v473_v41, 16  ;;  %v660_v59 = vshll.u32 %v474_v47, 16  ;;  %v499_v17 = vld [vmem:[%s6248_s14 + $0xb0] sm:$0x1]  ;;  %v470_v30 = vld [vmem:[%s6248_s14 + $0x3c] sm:$0xf] }
  0x2a   : > { %440 = vmatpush.bf16.xpose.msra.mxu1 %v421_v14  ;;  %v687_v56 = vsel %vm6278_vm3, %v682_v48, %v686_v28  ;;  %v697_v57 = vsel %vm6278_vm3, %v692_v49, %v696_v32  ;;  %v653_v2 = vrot.slane %v651_v55, 4  ;;  %v664_v9 = vshrl.u32 %v474_v47, 16  ;;  %v5789_v25 = vld [vmem:[%s6248_s14 + $0x90] sm:$0xff]  ;;  %v471_v39 = vld [vmem:[%s6248_s14 + $0x40] sm:$0xf]  ;;  %s6157_s6 = smov 104  }
  0x2b   : > { %v909_v60 = vunpack.c.l.b16 %v687_v56  ;;  %v910_v61 = vunpack.c.l.b16 %v697_v57  ;;  %v874_v62 = vrot.slane %v873_v52, 4  ;;  %v884_v63 = vrot.slane %v883_v53, 4  ;;  %v494_v54 = vld [vmem:[%s6248_s14 + $0x9c] sm:$0xf]  ;;  %s4622_s30 = sshll.u32 %s4618_s26, 4  ;;  %s4623_s30 = int_to_ptr.hbm [resolvable:$true] %s4622_s30 }
  0x2c   : > { %v656_v3 = vrot.slane %v654_v58, 5  ;;  %v662_v4 = vrot.slane %v660_v59, 5  ;;  %v670_v14 = vshll.u32 %v475_v0, 16  ;;  %v666_v16 = vrot.slane %v664_v9, 4 }
  0x2d   : > { %v934_v6 = vpack.c.b16 %v910_v61, %v909_v60  ;;  %v879_v7 = vsel %vm6278_vm3, %v874_v62, %v878_v44  ;;  %v889_v8 = vsel %vm6278_vm3, %v884_v63, %v888_v50  ;;  %v843_v18 = vshrl.u32 %v497_v5, 16  ;;  %v472_v44 = vld [vmem:[%s6248_s14 + $0x44] sm:$0x1]  ;;  %v495_v63 = vld [vmem:[%s6248_s14 + $0xa0] sm:$0xf] }
  0x2e   : > { %v925_v11 = vunpack.c.l.b16 %v879_v7  ;;  %v926_v12 = vunpack.c.l.b16 %v889_v8  ;;  %v657_v13 = vor.u32 %v656_v3, %v653_v2  ;;  %v846_v19 = vshll.u32 %v497_v5, 16  ;;  %v496_v3 = vld [vmem:[%s6248_s14 + $0xa4] sm:$0x1] }
  0x2f   : > { %v968_v15 = vsel %vm374_vm0, %v934_v6, 0  ;;  %v672_v22 = vrot.slane %v670_v14, 5  ;;  %v852_v23 = vshll.u32 %v498_v10, 16  ;;  %v667_v26 = vor.u32 %v666_v16, %v662_v4  ;;  %v5780_v5 = vld [vmem:[%s6248_s14 + $0x24] sm:$0xff] }
  0x30   : > { %994 = vmatpush.bf16.xpose.msra.mxu2 %v968_v15  ;;  %v942_v20 = vpack.c.b16 %v926_v12, %v925_v11  ;;  %v658_v21 = vrot.slane %v657_v13, 4  ;;  %v845_v27 = vrot.slane %v843_v18, 4  ;;  %v848_v28 = vrot.slane %v846_v19, 5  ;;  %v5788_v14 = vld [vmem:[%s6248_s14 + $0x84] sm:$0xff]  ;;  %v467_v19 = vld [vmem:[%s6248_s14 + $0x30] sm:$0xf] }
  0x31   : > { %428 = vmatpush.bf16.xpose.msra.mxu0 %v394_v46  ;;  %v856_v29 = vshrl.u32 %v498_v10, 16  ;;  %v854_v33 = vrot.slane %v852_v23, 5  ;;  %v862_v34 = vshll.u32 %v499_v17, 16  ;;  %v668_v35 = vrot.slane %v667_v26, 4 }
  0x32   : > { %441 = vmatpush.bf16.xpose.msra.mxu1 %v418_v51  ;;  %v992_v31 = vsel %vm374_vm0, %v942_v20, 0  ;;  %v663_v32 = vsel %vm6278_vm3, %v658_v21, %v662_v4  ;;  %v849_v37 = vor.u32 %v848_v28, %v845_v27  ;;  %v391_v41 = vsel %vm374_vm0, %v5781_v24, 0  ;;  %v468_v24 = vld [vmem:[%s6248_s14 + $0x34] sm:$0xf] }
  0x33   : > { %1007 = vmatpush.bf16.xpose.msra.mxu3 %v992_v31  ;;  %v907_v36 = vunpack.c.l.b16 %v663_v32  ;;  %v858_v38 = vrot.slane %v856_v29, 4  ;;  %v864_v40 = vrot.slane %v862_v34, 5  ;;  %v415_v43 = vsel %vm374_vm0, %v5789_v25, 0  ;;  %v469_v29 = vld [vmem:[%s6248_s14 + $0x38] sm:$0x1] }
  0x34   : > { %v627_v45 = vshrl.u32 %v470_v30, 16  ;;  %v673_v46 = vsel %vm6278_vm3, %v668_v35, %v672_v22  ;;  %v850_v47 = vrot.slane %v849_v37, 4  ;;  %v630_v49 = vshll.u32 %v470_v30, 16 }
  0x35   : > { %v859_v48 = vor.u32 %v858_v38, %v854_v33  ;;  %v908_v50 = vunpack.c.l.b16 %v673_v46  ;;  %v636_v52 = vshll.u32 %v471_v39, 16  ;;  %v640_v53 = vshrl.u32 %v471_v39, 16 }
  0x36   : > { %v629_v51 = vrot.slane %v627_v45, 4  ;;  %v855_v55 = vsel %vm6278_vm3, %v850_v47, %v854_v33  ;;  %v632_v57 = vrot.slane %v630_v49, 5  ;;  %v646_v58 = vshll.u32 %v472_v44, 16 }
  0x37   : > { %v860_v56 = vrot.slane %v859_v48, 4  ;;  %v933_v59 = vpack.c.b16 %v908_v50, %v907_v36  ;;  %v923_v60 = vunpack.c.l.b16 %v855_v55  ;;  %v638_v61 = vrot.slane %v636_v52, 5  ;;  %v492_v48 = vld [vmem:[%s6248_s14 + $0x94] sm:$0xf] }
  0x38   : > { %v642_v62 = vrot.slane %v640_v53, 4  ;;  %v633_v1 = vor.u32 %v632_v57, %v629_v51  ;;  %v648_v2 = vrot.slane %v646_v58, 5  ;;  %v819_v4 = vshrl.u32 %v494_v54, 16  ;;  %v493_v53 = vld [vmem:[%s6248_s14 + $0x98] sm:$0x1] }
  0x39   : > { %v865_v0 = vsel %vm6278_vm3, %v860_v56, %v864_v40  ;;  %429 = vmatpush.bf16.xpose.msra.mxu0 %v391_v41  ;;  %v965_v6 = vsel %vm374_vm0, %v933_v59, 0  ;;  %v822_v9 = vshll.u32 %v494_v54, 16  ;;  %v828_v12 = vshll.u32 %v495_v63, 16  ;;  %v5779_v58 = vld [vmem:[%s6248_s14 + $0x18] sm:$0xff] }
  0x3a   : > { %442 = vmatpush.bf16.xpose.msra.mxu1 %v415_v43  ;;  %v924_v7 = vunpack.c.l.b16 %v865_v0  ;;  %v643_v8 = vor.u32 %v642_v62, %v638_v61  ;;  %995 = vmatpush.bf16.xpose.msra.mxu2 %v965_v6  ;;  %v634_v10 = vrot.slane %v633_v1, 4  ;;  %v821_v11 = vrot.slane %v819_v4, 4  ;;  %v491_v43 = vld [vmem:[%s6248_s14 + $0x90] sm:$0xf] }
  0x3b   : > { %v832_v13 = vshrl.u32 %v495_v63, 16  ;;  %v824_v17 = vrot.slane %v822_v9, 5  ;;  %v838_v18 = vshll.u32 %v496_v3, 16  ;;  %v830_v21 = vrot.slane %v828_v12, 5  ;;  %v5787_v3 = vld [vmem:[%s6248_s14 + $0x78] sm:$0xff] }
  0x3c   : > { %v941_v15 = vpack.c.b16 %v924_v7, %v923_v60  ;;  %v644_v16 = vrot.slane %v643_v8, 4  ;;  %v639_v20 = vsel %vm6278_vm3, %v634_v10, %v638_v61  ;;  %v388_v23 = vsel %vm374_vm0, %v5780_v5, 0  ;;  %v464_v8 = vld [vmem:[%s6248_s14 + $0x24] sm:$0xf] }
  0x3d   : > { %v834_v22 = vrot.slane %v832_v13, 4  ;;  %v905_v27 = vunpack.c.l.b16 %v639_v20  ;;  %v825_v28 = vor.u32 %v824_v17, %v821_v11  ;;  %v840_v32 = vrot.slane %v838_v18, 5  ;;  %v465_v13 = vld [vmem:[%s6248_s14 + $0x28] sm:$0xf]  ;;  %v466_v18 = vld [vmem:[%s6248_s14 + $0x2c] sm:$0x1] }
  0x3e   : > { %v989_v25 = vsel %vm374_vm0, %v941_v15, 0  ;;  %v649_v26 = vsel %vm6278_vm3, %v644_v16, %v648_v2  ;;  %v412_v33 = vsel %vm374_vm0, %v5788_v14, 0  ;;  %v603_v35 = vshrl.u32 %v467_v19, 16 }
  0x3f   : > { %1008 = vmatpush.bf16.xpose.msra.mxu3 %v989_v25  ;;  %v906_v30 = vunpack.c.l.b16 %v649_v26  ;;  %v835_v31 = vor.u32 %v834_v22, %v830_v21  ;;  %v826_v34 = vrot.slane %v825_v28, 4  ;;  %v606_v36 = vshll.u32 %v467_v19, 16 }
  0x40   : > { %v612_v37 = vshll.u32 %v468_v24, 16  ;;  %v616_v40 = vshrl.u32 %v468_v24, 16  ;;  %v622_v41 = vshll.u32 %v469_v29, 16  ;;  %v605_v45 = vrot.slane %v603_v35, 4 }
  0x41   : > { %v932_v38 = vpack.c.b16 %v906_v30, %v905_v27  ;;  %v836_v39 = vrot.slane %v835_v31, 4  ;;  %430 = vmatpush.bf16.xpose.msra.mxu0 %v388_v23  ;;  %v831_v44 = vsel %vm6278_vm3, %v826_v34, %v830_v21  ;;  %v608_v46 = vrot.slane %v606_v36, 5  ;;  %v488_v31 = vld [vmem:[%s6248_s14 + $0x84] sm:$0xf]  ;;  %v489_v36 = vld [vmem:[%s6248_s14 + $0x88] sm:$0xf] }
  0x42   : > { %443 = vmatpush.bf16.xpose.msra.mxu1 %v412_v33  ;;  %v614_v47 = vrot.slane %v612_v37, 5  ;;  %v921_v51 = vunpack.c.l.b16 %v831_v44  ;;  %v618_v52 = vrot.slane %v616_v40, 4  ;;  %v624_v56 = vrot.slane %v622_v41, 5  ;;  %v490_v41 = vld [vmem:[%s6248_s14 + $0x8c] sm:$0x1] }
  0x43   : > { %v962_v49 = vsel %vm374_vm0, %v932_v38, 0  ;;  %v841_v50 = vsel %vm6278_vm3, %v836_v39, %v840_v32  ;;  %v609_v55 = vor.u32 %v608_v46, %v605_v45  ;;  %v795_v57 = vshrl.u32 %v491_v43, 16 }
  0x44   : > { %996 = vmatpush.bf16.xpose.msra.mxu2 %v962_v49  ;;  %v922_v54 = vunpack.c.l.b16 %v841_v50  ;;  %v619_v59 = vor.u32 %v618_v52, %v614_v47  ;;  %v798_v60 = vshll.u32 %v491_v43, 16  ;;  %v804_v61 = vshll.u32 %v492_v48, 16  ;;  %v5786_v52 = vld [vmem:[%s6248_s14 + $0x6c] sm:$0xff] }
  0x45   : > { %v808_v62 = vshrl.u32 %v492_v48, 16  ;;  %v610_v0 = vrot.slane %v609_v55, 4  ;;  %v797_v1 = vrot.slane %v795_v57, 4  ;;  %v814_v2 = vshll.u32 %v493_v53, 16  ;;  %v461_v57 = vld [vmem:[%s6248_s14 + $0x18] sm:$0xf] }
  0x46   : > { %v940_v63 = vpack.c.b16 %v922_v54, %v921_v51  ;;  %v620_v4 = vrot.slane %v619_v59, 4  ;;  %v800_v5 = vrot.slane %v798_v60, 5  ;;  %v806_v6 = vrot.slane %v804_v61, 5  ;;  %v5778_v51 = vld [vmem:[%s6248_s14 + $0xc] sm:$0xff] }
  0x47   : > { %v810_v7 = vrot.slane %v808_v62, 4  ;;  %v615_v10 = vsel %vm6278_vm3, %v610_v0, %v614_v47  ;;  %v816_v11 = vrot.slane %v814_v2, 5  ;;  %v385_v12 = vsel %vm374_vm0, %v5779_v58, 0  ;;  %v462_v62 = vld [vmem:[%s6248_s14 + $0x1c] sm:$0xf] }
  0x48   : > { %v986_v9 = vsel %vm374_vm0, %v940_v63, 0  ;;  %v625_v14 = vsel %vm6278_vm3, %v620_v4, %v624_v56  ;;  %v903_v15 = vunpack.c.l.b16 %v615_v10  ;;  %v801_v16 = vor.u32 %v800_v5, %v797_v1 }
  0x49   : > { %1009 = vmatpush.bf16.xpose.msra.mxu3 %v986_v9  ;;  %v811_v17 = vor.u32 %v810_v7, %v806_v6  ;;  %431 = vmatpush.bf16.xpose.msra.mxu0 %v385_v12  ;;  %v904_v19 = vunpack.c.l.b16 %v625_v14  ;;  %v409_v20 = vsel %vm374_vm0, %v5787_v3, 0  ;;  %v579_v21 = vshrl.u32 %v464_v8, 16  ;;  %v463_v3 = vld [vmem:[%s6248_s14 + $0x20] sm:$0x1] }
  0x4a   : > { %v582_v22 = vshll.u32 %v464_v8, 16  ;;  %v802_v23 = vrot.slane %v801_v16, 4  ;;  %444 = vmatpush.bf16.xpose.msra.mxu1 %v409_v20  ;;  %v588_v25 = vshll.u32 %v465_v13, 16  ;;  %v592_v26 = vshrl.u32 %v465_v13, 16  ;;  %v485_v16 = vld [vmem:[%s6248_s14 + $0x78] sm:$0xf] }
  0x4b   : > { %v812_v24 = vrot.slane %v811_v17, 4  ;;  %v931_v27 = vpack.c.b16 %v904_v19, %v903_v15  ;;  %v581_v28 = vrot.slane %v579_v21, 4  ;;  %v598_v30 = vshll.u32 %v466_v18, 16  ;;  %v486_v21 = vld [vmem:[%s6248_s14 + $0x7c] sm:$0xf] }
  0x4c   : > { %v584_v29 = vrot.slane %v582_v22, 5  ;;  %v807_v32 = vsel %vm6278_vm3, %v802_v23, %v806_v6  ;;  %v590_v34 = vrot.slane %v588_v25, 5  ;;  %v594_v35 = vrot.slane %v592_v26, 4  ;;  %v487_v26 = vld [vmem:[%s6248_s14 + $0x80] sm:$0x1] }
  0x4d   : > { %v817_v33 = vsel %vm6278_vm3, %v812_v24, %v816_v11  ;;  %v959_v37 = vsel %vm374_vm0, %v931_v27, 0  ;;  %v919_v38 = vunpack.c.l.b16 %v807_v32  ;;  %v600_v44 = vrot.slane %v598_v30, 5 }
  0x4e   : > { %v920_v39 = vunpack.c.l.b16 %v817_v33  ;;  %v585_v40 = vor.u32 %v584_v29, %v581_v28  ;;  %997 = vmatpush.bf16.xpose.msra.mxu2 %v959_v37  ;;  %v595_v43 = vor.u32 %v594_v35, %v590_v34  ;;  %v771_v45 = vshrl.u32 %v488_v31, 16 }
  0x4f   : > { %v774_v46 = vshll.u32 %v488_v31, 16  ;;  %v780_v49 = vshll.u32 %v489_v36, 16  ;;  %v784_v50 = vshrl.u32 %v489_v36, 16  ;;  %v790_v56 = vshll.u32 %v490_v41, 16  ;;  %v5777_v31 = vld [vmem:[%s6248_s14] sm:$0xff] }
  0x50   : > { %v939_v47 = vpack.c.b16 %v920_v39, %v919_v38  ;;  %v586_v48 = vrot.slane %v585_v40, 4  ;;  %v596_v53 = vrot.slane %v595_v43, 4  ;;  %v773_v54 = vrot.slane %v771_v45, 4  ;;  %v5785_v40 = vld [vmem:[%s6248_s14 + $0x60] sm:$0xff] }
  0x51   : > { %v776_v55 = vrot.slane %v774_v46, 5  ;;  %v782_v60 = vrot.slane %v780_v49, 5  ;;  %v786_v61 = vrot.slane %v784_v50, 4  ;;  %v792_v2 = vrot.slane %v790_v56, 5  ;;  %v1049_v46 = vld [vmem:[%s6248_s14 + $0x58] sm:$0xf] }
  0x52   : > { %v983_v58 = vsel %vm374_vm0, %v939_v47, 0  ;;  %v591_v59 = vsel %vm6278_vm3, %v586_v48, %v590_v34  ;;  %v601_v63 = vsel %vm6278_vm3, %v596_v53, %v600_v44  ;;  %v382_v6 = vsel %vm374_vm0, %v5778_v51, 0  ;;  %v1048_v51 = vld [vmem:[%s6248_s14 + $0x54] sm:$0xe]  ;;  %v1050_v56 = vld [vmem:[%s6248_s14 + $0x5c] sm:$0x1] }
  0x53   : > { %1010 = vmatpush.bf16.xpose.msra.mxu3 %v983_v58  ;;  %v901_v0 = vunpack.c.l.b16 %v591_v59  ;;  %v777_v1 = vor.u32 %v776_v55, %v773_v54  ;;  %v902_v4 = vunpack.c.l.b16 %v601_v63  ;;  %v787_v5 = vor.u32 %v786_v61, %v782_v60  ;;  %432 = vmatpush.bf16.xpose.msra.mxu0 %v382_v6  ;;  %v1073_v58 = vld [vmem:[%s6248_s14 + $0xb8] sm:$0xf] }
  0x54   : > { %v406_v7 = vsel %vm374_vm0, %v5786_v52, 0  ;;  %v555_v9 = vshrl.u32 %v461_v57, 16  ;;  %v558_v10 = vshll.u32 %v461_v57, 16  ;;  %v564_v11 = vshll.u32 %v462_v62, 16  ;;  %v1072_v57 = vld [vmem:[%s6248_s14 + $0xb4] sm:$0xe] }
  0x55   : > { %v778_v8 = vrot.slane %v777_v1, 4  ;;  %445 = vmatpush.bf16.xpose.msra.mxu1 %v406_v7  ;;  %v930_v12 = vpack.c.b16 %v902_v4, %v901_v0  ;;  %v788_v13 = vrot.slane %v787_v5, 4  ;;  %v568_v14 = vshrl.u32 %v462_v62, 16  ;;  %v1074_v4 = vld [vmem:[%s6248_s14 + $0xbc] sm:$0x1] }
  0x56   : > { %v574_v15 = vshll.u32 %v463_v3, 16  ;;  %v557_v18 = vrot.slane %v555_v9, 4  ;;  %v560_v19 = vrot.slane %v558_v10, 5  ;;  %v566_v20 = vrot.slane %v564_v11, 5  ;;  %v458_v11 = vld [vmem:[%s6248_s14 + $0xc] sm:$0xf] }
  0x57   : > { %v783_v17 = vsel %vm6278_vm3, %v778_v8, %v782_v60  ;;  %v956_v22 = vsel %vm374_vm0, %v930_v12, 0  ;;  %v793_v23 = vsel %vm6278_vm3, %v788_v13, %v792_v2  ;;  %v570_v25 = vrot.slane %v568_v14, 4 }
  0x58   : > { %v917_v24 = vunpack.c.l.b16 %v783_v17  ;;  %998 = vmatpush.bf16.xpose.msra.mxu2 %v956_v22  ;;  %v918_v27 = vunpack.c.l.b16 %v793_v23  ;;  %v561_v28 = vor.u32 %v560_v19, %v557_v18  ;;  %v576_v29 = vrot.slane %v574_v15, 5 }
  0x59   : > { %v747_v30 = vshrl.u32 %v485_v16, 16  ;;  %v571_v32 = vor.u32 %v570_v25, %v566_v20  ;;  %v750_v33 = vshll.u32 %v485_v16, 16  ;;  %v756_v34 = vshll.u32 %v486_v21, 16  ;;  %v459_v16 = vld [vmem:[%s6248_s14 + $0x10] sm:$0xf] }
  0x5a   : > { %v760_v35 = vshrl.u32 %v486_v21, 16  ;;  %v938_v36 = vpack.c.b16 %v918_v27, %v917_v24  ;;  %v562_v37 = vrot.slane %v561_v28, 4  ;;  %v766_v39 = vshll.u32 %v487_v26, 16  ;;  %v460_v24 = vld [vmem:[%s6248_s14 + $0x14] sm:$0x1] }
  0x5b   : > { %v749_v38 = vrot.slane %v747_v30, 4  ;;  %v572_v41 = vrot.slane %v571_v32, 4  ;;  %v752_v43 = vrot.slane %v750_v33, 5  ;;  %v758_v44 = vrot.slane %v756_v34, 5  ;;  %v482_v30 = vld [vmem:[%s6248_s14 + $0x6c] sm:$0xf] }
  0x5c   : > { %v762_v45 = vrot.slane %v760_v35, 4  ;;  %v980_v47 = vsel %vm374_vm0, %v938_v36, 0  ;;  %v567_v48 = vsel %vm6278_vm3, %v562_v37, %v566_v20  ;;  %v768_v49 = vrot.slane %v766_v39, 5  ;;  %v483_v35 = vld [vmem:[%s6248_s14 + $0x70] sm:$0xf] }
  0x5d   : > { %v379_v50 = vsel %vm374_vm0, %v5777_v31, 0  ;;  %1011 = vmatpush.bf16.xpose.msra.mxu3 %v980_v47  ;;  %v577_v52 = vsel %vm6278_vm3, %v572_v41, %v576_v29  ;;  %v899_v53 = vunpack.c.l.b16 %v567_v48  ;;  %v753_v54 = vor.u32 %v752_v43, %v749_v38  ;;  %v484_v43 = vld [vmem:[%s6248_s14 + $0x74] sm:$0x1] }
  0x5e   : > { %v763_v55 = vor.u32 %v762_v45, %v758_v44  ;;  %433 = vmatpush.bf16.xpose.msra.mxu0 %v379_v50  ;;  %v900_v59 = vunpack.c.l.b16 %v577_v52  ;;  %v403_v60 = vsel %vm374_vm0, %v5785_v40, 0  ;;  %v4821_v0 = vrot.slane %v1048_v51, 9  ;;  %v1576_v50 = vld [vmem:[%s7332_s1] sm:$0xf]  ;;  %v1045_v51 = vld [vmem:[%s6248_s14 + $0x48] sm:$0xe] }
  0x5f   : > { %v754_v61 = vrot.slane %v753_v54, 4  ;;  %446 = vmatpush.bf16.xpose.msra.mxu1 %v403_v60  ;;  %v1177_v1 = vrot.slane %v1049_v46, 5  ;;  %v1180_v3 = vrot.slane %v1050_v56, 5  ;;  %v4829_v5 = vrot.slane %v1072_v57, 9  ;;  %v1046_v56 = vld [vmem:[%s6248_s14 + $0x4c] sm:$0xf] }
  0x60   : > { %v764_v62 = vrot.slane %v763_v55, 4  ;;  %v929_v2 = vpack.c.b16 %v900_v59, %v899_v53  ;;  %v1233_v6 = vrot.slane %v1073_v58, 5  ;;  %v1236_v20 = vrot.slane %v1074_v4, 5 }
  0x61   : > { %v759_v7 = vsel %vm6278_vm3, %v754_v61, %v758_v44  ;;  %v1178_v9 = vsel %vm6392_vm6, %v4821_v0, %v1177_v1  ;;  %v1179_v10 = vrot.slane %v1177_v1, 4  ;;  %v531_v25 = vshrl.u32 %v458_v11, 16  ;;  %v1047_v1 = vld [vmem:[%s6248_s14 + $0x50] sm:$0x1] }
  0x62   : > { %v769_v8 = vsel %vm6278_vm3, %v764_v62, %v768_v49  ;;  %v953_v12 = vsel %vm374_vm0, %v929_v2, 0  ;;  %v915_v13 = vunpack.c.l.b16 %v759_v7  ;;  %v1257_v15 = vunpack.c.l.b16 %v1178_v9 }
  0x63   : > { %v916_v14 = vunpack.c.l.b16 %v769_v8  ;;  %999 = vmatpush.bf16.xpose.msra.mxu2 %v953_v12  ;;  %v1181_v17 = vsel %vm6392_vm6, %v1179_v10, %v1180_v3  ;;  %v1234_v18 = vsel %vm6392_vm6, %v4829_v5, %v1233_v6  ;;  %v1235_v19 = vrot.slane %v1233_v6, 4  ;;  %v1070_v12 = vld [vmem:[%s6248_s14 + $0xac] sm:$0xf] }
  0x64   : > { %v1258_v22 = vunpack.c.l.b16 %v1181_v17  ;;  %v1273_v23 = vunpack.c.l.b16 %v1234_v18  ;;  %v534_v27 = vshll.u32 %v458_v11, 16  ;;  %v540_v28 = vshll.u32 %v459_v16, 16  ;;  %v1069_v11 = vld [vmem:[%s6248_s14 + $0xa8] sm:$0xe]  ;;  %v1071_v17 = vld [vmem:[%s6248_s14 + $0xb0] sm:$0x1] }
  0x65   : > { %v937_v21 = vpack.c.b16 %v916_v14, %v915_v13  ;;  %v1237_v26 = vsel %vm6392_vm6, %v1235_v19, %v1236_v20  ;;  %v544_v29 = vshrl.u32 %v459_v16, 16  ;;  %v533_v34 = vrot.slane %v531_v25, 4 }
  0x66   : > { %v1282_v32 = vpack.c.b16 %v1258_v22, %v1257_v15  ;;  %v1274_v33 = vunpack.c.l.b16 %v1237_v26  ;;  %v536_v36 = vrot.slane %v534_v27, 5  ;;  %v542_v37 = vrot.slane %v540_v28, 5  ;;  %v455_v22 = vld [vmem:[%s6248_s14] sm:$0xf]  ;;  %v456_v27 = vld [vmem:[%s6248_s14 + $0x4] sm:$0xf] }
  0x67   : > { %v977_v31 = vsel %vm374_vm0, %v937_v21, 0  ;;  %v546_v38 = vrot.slane %v544_v29, 4  ;;  %v550_v39 = vshll.u32 %v460_v24, 16  ;;  %v723_v44 = vshrl.u32 %v482_v30, 16 }
  0x68   : > { %1012 = vmatpush.bf16.xpose.msra.mxu3 %v977_v31  ;;  %v1316_v40 = vsel %vm374_vm0, %v1282_v32, 0  ;;  %v1290_v41 = vpack.c.b16 %v1274_v33, %v1273_v23  ;;  %v726_v45 = vshll.u32 %v482_v30, 16  ;;  %v537_v46 = vor.u32 %v536_v36, %v533_v34 }
  0x69   : > { %1342 = vmatpush.bf16.xpose.msrb.mxu0 %v1316_v40  ;;  %v547_v47 = vor.u32 %v546_v38, %v542_v37  ;;  %v552_v48 = vrot.slane %v550_v39, 5  ;;  %v732_v49 = vshll.u32 %v483_v35, 16  ;;  %v725_v53 = vrot.slane %v723_v44, 4  ;;  %v457_v38 = vld [vmem:[%s6248_s14 + $0x8] sm:$0x1] }
  0x6a   : > { %v1340_v52 = vsel %vm374_vm0, %v1290_v41, 0  ;;  %v728_v54 = vrot.slane %v726_v45, 5  ;;  %v736_v55 = vshrl.u32 %v483_v35, 16  ;;  %v538_v57 = vrot.slane %v537_v46, 4  ;;  %v479_v41 = vld [vmem:[%s6248_s14 + $0x60] sm:$0xf] }
  0x6b   : > { %1355 = vmatpush.bf16.xpose.msrb.mxu1 %v1340_v52  ;;  %v548_v58 = vrot.slane %v547_v47, 4  ;;  %v734_v59 = vrot.slane %v732_v49, 5  ;;  %v742_v60 = vshll.u32 %v484_v43, 16  ;;  %v2010_v0 = vunpack.c.l.b16 %v1576_v50  ;;  %v480_v47 = vld [vmem:[%s6248_s14 + $0x64] sm:$0xf] }
  0x6c   : > { %v729_v61 = vor.u32 %v728_v54, %v725_v53  ;;  %v738_v62 = vrot.slane %v736_v55, 4  ;;  %v4820_v2 = vrot.slane %v1045_v51, 9  ;;  %v543_v3 = vsel %vm6278_vm3, %v538_v57, %v542_v37 }
  0x6d   : > { %v553_v4 = vsel %vm6278_vm3, %v548_v58, %v552_v48  ;;  %v744_v5 = vrot.slane %v742_v60, 5  ;;  %v1170_v6 = vrot.slane %v1046_v56, 5  ;;  %v897_v7 = vunpack.c.l.b16 %v543_v3  ;;  %v5800_v56 = vld [vmem:[%s6248_s14 + $0x60] sm:$0xff] }
  0x6e   : > { %v898_v8 = vunpack.c.l.b16 %v553_v4  ;;  %v730_v9 = vrot.slane %v729_v61, 4  ;;  %v739_v10 = vor.u32 %v738_v62, %v734_v59  ;;  %v2011_v13 = vpack.c.b16 %v2010_v0, %v2010_v0  ;;  %v5808_v62 = vld [vmem:[%s6248_s14 + $0xc0] sm:$0xff]  ;;  %v1042_v4 = vld [vmem:[%s6248_s14 + $0x3c] sm:$0xe] }
  0x6f   : > { %v1171_v14 = vsel %vm6392_vm6, %v4820_v2, %v1170_v6  ;;  %v1172_v15 = vrot.slane %v1170_v6, 4  ;;  %v1173_v16 = vrot.slane %v1047_v1, 5  ;;  %v4828_v25 = vrot.slane %v1069_v11, 9 }
  0x70   : > { %v928_v18 = vpack.c.b16 %v898_v8, %v897_v7  ;;  %v735_v19 = vsel %vm6278_vm3, %v730_v9, %v734_v59  ;;  %v740_v20 = vrot.slane %v739_v10, 4  ;;  %v1255_v21 = vunpack.c.l.b16 %v1171_v14  ;;  %2012 = vrot.lane.b32.xlu1 %v2011_v13, %s6154_s10  ;;  %v481_v59 = vld [vmem:[%s6248_s14 + $0x68] sm:$0x1]  ;;  %v1067_v10 = vld [vmem:[%s6248_s14 + $0xa0] sm:$0xf] }
  0x71   : > { %v913_v23 = vunpack.c.l.b16 %v735_v19  ;;  %v1174_v24 = vsel %vm6392_vm6, %v1172_v15, %v1173_v16  ;;  %v1226_v26 = vrot.slane %v1070_v12, 5  ;;  %v1229_v31 = vrot.slane %v1071_v17, 5  ;;  %v1044_v15 = vld [vmem:[%s6248_s14 + $0x44] sm:$0x1] }
  0x72   : > { %v950_v28 = vsel %vm374_vm0, %v928_v18, 0  ;;  %v745_v29 = vsel %vm6278_vm3, %v740_v20, %v744_v5  ;;  %v1256_v30 = vunpack.c.l.b16 %v1174_v24  ;;  %v507_v35 = vshrl.u32 %v455_v22, 16  ;;  %v1043_v5 = vld [vmem:[%s6248_s14 + $0x40] sm:$0xf]  ;;  %v1066_v20 = vld [vmem:[%s6248_s14 + $0x9c] sm:$0xe] }
  0x73   : > { %1000 = vmatpush.bf16.xpose.msra.mxu2 %v950_v28  ;;  %v914_v32 = vunpack.c.l.b16 %v745_v29  ;;  %v1227_v33 = vsel %vm6392_vm6, %v4828_v25, %v1226_v26  ;;  %v1228_v34 = vrot.slane %v1226_v26, 4  ;;  %v510_v39 = vshll.u32 %v455_v22, 16 }
  0x74   : > { %v1281_v36 = vpack.c.b16 %v1256_v30, %v1255_v21  ;;  %v1271_v37 = vunpack.c.l.b16 %v1227_v33  ;;  %v516_v40 = vshll.u32 %v456_v27, 16  ;;  %v509_v45 = vrot.slane %v507_v35, 4  ;;  %v1068_v21 = vld [vmem:[%s6248_s14 + $0xa4] sm:$0x1]  ;;  %v5807_v35 = vld [vmem:[%s6248_s14 + $0xb4] sm:$0xff] }
  0x75   : > { %v936_v43 = vpack.c.b16 %v914_v32, %v913_v23  ;;  %v1230_v44 = vsel %vm6392_vm6, %v1228_v34, %v1229_v31  ;;  %v520_v46 = vshrl.u32 %v456_v27, 16  ;;  %v512_v50 = vrot.slane %v510_v39, 5  ;;  %v5799_v34 = vld [vmem:[%s6248_s14 + $0x54] sm:$0xff] }
  0x76   : > { %v1313_v48 = vsel %vm374_vm0, %v1281_v36, 0  ;;  %v1272_v49 = vunpack.c.l.b16 %v1230_v44  ;;  %v518_v51 = vrot.slane %v516_v40, 5  ;;  %v526_v54 = vshll.u32 %v457_v38, 16 }
  0x77   : > { %v974_v52 = vsel %vm374_vm0, %v936_v43, 0  ;;  %1343 = vmatpush.bf16.xpose.msrb.mxu0 %v1313_v48  ;;  %v522_v53 = vrot.slane %v520_v46, 4  ;;  %v699_v55 = vshrl.u32 %v479_v41, 16  ;;  %v513_v58 = vor.u32 %v512_v50, %v509_v45  ;;  %v1039_v45 = vld [vmem:[%s6248_s14 + $0x30] sm:$0xe] }
  0x78   : > { %1013 = vmatpush.bf16.xpose.msra.mxu3 %v974_v52  ;;  %v1289_v57 = vpack.c.b16 %v1272_v49, %v1271_v37  ;;  %v702_v60 = vshll.u32 %v479_v41, 16  ;;  %v708_v61 = vshll.u32 %v480_v47, 16  ;;  %v528_v1 = vrot.slane %v526_v54, 5  ;;  %v1040_v46 = vld [vmem:[%s6248_s14 + $0x34] sm:$0xf] }
  0x79   : > { %v523_v0 = vor.u32 %v522_v53, %v518_v51  ;;  %v701_v2 = vrot.slane %v699_v55, 4  ;;  %v712_v3 = vshrl.u32 %v480_v47, 16  ;;  %v514_v7 = vrot.slane %v513_v58, 4  ;;  %v1063_v52 = vld [vmem:[%s6248_s14 + $0x90] sm:$0xe] }
  0x7a   : > { %v1337_v6 = vsel %vm374_vm0, %v1289_v57, 0  ;;  %v704_v8 = vrot.slane %v702_v60, 5  ;;  %v710_v9 = vrot.slane %v708_v61, 5  ;;  %v718_v13 = vshll.u32 %v481_v59, 16  ;;  %v1064_v57 = vld [vmem:[%s6248_s14 + $0x94] sm:$0xf] }
  0x7b   : > { %1356 = vmatpush.bf16.xpose.msrb.mxu1 %v1337_v6  ;;  %v524_v11 = vrot.slane %v523_v0, 4  ;;  %v714_v12 = vrot.slane %v712_v3, 4  ;;  %v1518_v14 = vsel %vm374_vm0, %v5800_v56, 0  ;;  %v519_v16 = vsel %vm6278_vm3, %v514_v7, %v518_v51  ;;  %v1041_v51 = vld [vmem:[%s6248_s14 + $0x38] sm:$0x1]  ;;  %v5798_v0 = vld [vmem:[%s6248_s14 + $0x48] sm:$0xff] }
  0x7c   : > { %v705_v17 = vor.u32 %v704_v8, %v701_v2  ;;  %v6464_v18 = vsel %vm374_vm0, %v5808_v62, 0  ;;  %v4819_v19 = vrot.slane %v1042_v4, 9  ;;  %v895_v23 = vunpack.c.l.b16 %v519_v16  ;;  %v1065_v62 = vld [vmem:[%s6248_s14 + $0x98] sm:$0x1]  ;;  %v1037_v6 = vld [vmem:[%s6248_s14 + $0x28] sm:$0xf] }
  0x7d   : > { %v529_v22 = vsel %vm6278_vm3, %v524_v11, %v528_v1  ;;  %v715_v24 = vor.u32 %v714_v12, %v710_v9  ;;  %v720_v25 = vrot.slane %v718_v13, 5  ;;  %v1163_v28 = vrot.slane %v1043_v5, 5  ;;  %v5806_v5 = vld [vmem:[%s6248_s14 + $0xa8] sm:$0xff]  ;;  %v1036_v16 = vld [vmem:[%s6248_s14 + $0x24] sm:$0xe] }
  0x7e   : > { %v896_v26 = vunpack.c.l.b16 %v529_v22  ;;  %v706_v27 = vrot.slane %v705_v17, 4  ;;  %v1166_v29 = vrot.slane %v1044_v15, 5  ;;  %v4827_v31 = vrot.slane %v1066_v20, 9  ;;  %v1061_v11 = vld [vmem:[%s6248_s14 + $0x88] sm:$0xf] }
  0x7f   : > { %v716_v30 = vrot.slane %v715_v24, 4  ;;  %v1219_v32 = vrot.slane %v1067_v10, 5  ;;  %v1222_v33 = vrot.slane %v1068_v21, 5  ;;  %v1164_v38 = vsel %vm6392_vm6, %v4819_v19, %v1163_v28  ;;  %v1038_v17 = vld [vmem:[%s6248_s14 + $0x2c] sm:$0x1]  ;;  %v5797_v24 = vld [vmem:[%s6248_s14 + $0x3c] sm:$0xff] }
  0x80   : > { %v927_v36 = vpack.c.b16 %v896_v26, %v895_v23  ;;  %v711_v37 = vsel %vm6278_vm3, %v706_v27, %v710_v9  ;;  %v1165_v39 = vrot.slane %v1163_v28, 4  ;;  %v1253_v43 = vunpack.c.l.b16 %v1164_v38  ;;  %v1060_v23 = vld [vmem:[%s6248_s14 + $0x84] sm:$0xe]  ;;  %v1062_v28 = vld [vmem:[%s6248_s14 + $0x8c] sm:$0x1] }
  0x81   : > { %v721_v40 = vsel %vm6278_vm3, %v716_v30, %v720_v25  ;;  %v911_v41 = vunpack.c.l.b16 %v711_v37  ;;  %v1220_v44 = vsel %vm6392_vm6, %v4827_v31, %v1219_v32  ;;  %v1221_v50 = vrot.slane %v1219_v32, 4 }
  0x82   : > { %v947_v47 = vsel %vm374_vm0, %v927_v36, 0  ;;  %v912_v48 = vunpack.c.l.b16 %v721_v40  ;;  %v1167_v49 = vsel %vm6392_vm6, %v1165_v39, %v1166_v29  ;;  %v1269_v54 = vunpack.c.l.b16 %v1220_v44  ;;  %v1033_v39 = vld [vmem:[%s6248_s14 + $0x18] sm:$0xe]  ;;  %v1034_v40 = vld [vmem:[%s6248_s14 + $0x1c] sm:$0xf] }
  0x83   : > { %1001 = vmatpush.bf16.xpose.msra.mxu2 %v947_v47  ;;  %v1254_v53 = vunpack.c.l.b16 %v1167_v49  ;;  %v1515_v55 = vsel %vm374_vm0, %v5799_v34, 0  ;;  %v6489_v56 = vsel %vm374_vm0, %v5807_v35, 0  ;;  %v1223_v59 = vsel %vm6392_vm6, %v1221_v50, %v1222_v33  ;;  %v5805_v33 = vld [vmem:[%s6248_s14 + $0x9c] sm:$0xff] }
  0x84   : > { %v935_v58 = vpack.c.b16 %v912_v48, %v911_v41  ;;  %v4818_v60 = vrot.slane %v1039_v45, 9  ;;  %v1156_v61 = vrot.slane %v1040_v46, 5  ;;  %v1270_v2 = vunpack.c.l.b16 %v1223_v59  ;;  %v261_v34 = vld [vmem:[%s7332_s1] sm:$0xf]  ;;  %v5796_v59 = vld [vmem:[%s6248_s14 + $0x30] sm:$0xff] }
  0x85   : > { %v1280_v1 = vpack.c.b16 %v1254_v53, %v1253_v43  ;;  %v1159_v3 = vrot.slane %v1041_v51, 5  ;;  %v4826_v4 = vrot.slane %v1063_v52, 9  ;;  %v1212_v10 = vrot.slane %v1064_v57, 5  ;;  %4810 = vmatmul.msk.bf16.vlgmr.msra.gmra.mxu0 %vm374_vm0, %v261_v34  ;;  %4811 = vmatmul.msk.bf16.vlgmr.msra.gmra.mxu1 %vm374_vm0, %v261_v34  ;;  %v2145_v46 = vld [vmem:[%s7332_s1] sm:$0xf] }
  0x86   : > { %v971_v7 = vsel %vm374_vm0, %v935_v58, 0  ;;  %v1157_v8 = vsel %vm6392_vm6, %v4818_v60, %v1156_v61  ;;  %v1158_v9 = vrot.slane %v1156_v61, 4  ;;  %v1288_v13 = vpack.c.b16 %v1270_v2, %v1269_v54  ;;  %v1035_v51 = vld [vmem:[%s6248_s14 + $0x20] sm:$0x1]  ;;  %v1057_v52 = vld [vmem:[%s6248_s14 + $0x78] sm:$0xe] }
  0x87   : > { %1014 = vmatpush.bf16.xpose.msra.mxu3 %v971_v7  ;;  %v1310_v12 = vsel %vm374_vm0, %v1280_v1, 0  ;;  %v1215_v15 = vrot.slane %v1065_v62, 5  ;;  %v1213_v20 = vsel %vm6392_vm6, %v4826_v4, %v1212_v10  ;;  %v1214_v21 = vrot.slane %v1212_v10, 4  ;;  %v1058_v58 = vld [vmem:[%s6248_s14 + $0x7c] sm:$0xf] }
  0x88   : > { %1344 = vmatpush.bf16.xpose.msrb.mxu0 %v1310_v12  ;;  %v1160_v19 = vsel %vm6392_vm6, %v1158_v9, %v1159_v3  ;;  %v6511_v22 = vsel %vm374_vm0, %v5798_v0, 0  ;;  %v1334_v25 = vsel %vm374_vm0, %v1288_v13, 0  ;;  %v6517_v27 = vsel %vm374_vm0, %v5806_v5, 0  ;;  %v1059_v1 = vld [vmem:[%s6248_s14 + $0x80] sm:$0x1] }
  0x89   : > { %v1252_v26 = vunpack.c.l.b16 %v1160_v19  ;;  %1357 = vmatpush.bf16.xpose.msrb.mxu1 %v1334_v25  ;;  %v1216_v29 = vsel %vm6392_vm6, %v1214_v21, %v1215_v15  ;;  %v4817_v30 = vrot.slane %v1036_v16, 9  ;;  %v1149_v31 = vrot.slane %v1037_v6, 5  ;;  %v5804_v6 = vld [vmem:[%s6248_s14 + $0x90] sm:$0xff]  ;;  %v1030_v16 = vld [vmem:[%s6248_s14 + $0xc] sm:$0xe] }
  0x8a   : > { %v1152_v32 = vrot.slane %v1038_v17, 5  ;;  %v1268_v36 = vunpack.c.l.b16 %v1216_v29  ;;  %v4825_v37 = vrot.slane %v1060_v23, 9  ;;  %v1205_v38 = vrot.slane %v1061_v11, 5  ;;  %v1031_v11 = vld [vmem:[%s6248_s14 + $0x10] sm:$0xf] }
  0x8b   : > { %1544 = vmatpush.bf16.xpose.msrb.mxu2 %v1518_v14  ;;  %v1251_v14 = vunpack.c.l.b16 %v1157_v8  ;;  %v1150_v41 = vsel %vm6392_vm6, %v4817_v30, %v1149_v31  ;;  %v1151_v43 = vrot.slane %v1149_v31, 4  ;;  %v1208_v44 = vrot.slane %v1062_v28, 5  ;;  %v1055_v12 = vld [vmem:[%s6248_s14 + $0x70] sm:$0xf]  ;;  %v1032_v23 = vld [vmem:[%s6248_s14 + $0x14] sm:$0x1] }
  0x8c   : > { %v6533_v45 = vsel %vm374_vm0, %v5797_v24, 0  ;;  %v1249_v49 = vunpack.c.l.b16 %v1150_v41  ;;  %v1206_v50 = vsel %vm6392_vm6, %v4825_v37, %v1205_v38  ;;  %v1207_v54 = vrot.slane %v1205_v38, 4  ;;  %v1054_v24 = vld [vmem:[%s6248_s14 + $0x6c] sm:$0xe]  ;;  %v1056_v34 = vld [vmem:[%s6248_s14 + $0x74] sm:$0x1] }
  0x8d   : > { %v1279_v35 = vpack.c.b16 %v1252_v26, %v1251_v14  ;;  %v1153_v53 = vsel %vm6392_vm6, %v1151_v43, %v1152_v32  ;;  %v6546_v57 = vsel %vm374_vm0, %v5805_v33, 0  ;;  %v2355_v62 = vunpack.c.l.b16 %v2145_v46  ;;  %v5795_v38 = vld [vmem:[%s6248_s14 + $0x24] sm:$0xff] }
  0x8e   : > { %v1250_v61 = vunpack.c.l.b16 %v1153_v53  ;;  %v4816_v0 = vrot.slane %v1033_v39, 9  ;;  %v1209_v2 = vsel %vm6392_vm6, %v1207_v54, %v1208_v44  ;;  %v1142_v3 = vrot.slane %v1034_v40, 5  ;;  %v5803_v39 = vld [vmem:[%s6248_s14 + $0x84] sm:$0xff] }
  0x8f   : > { %1557 = vmatpush.bf16.xpose.msrb.mxu3 %v6464_v18  ;;  %v1267_v18 = vunpack.c.l.b16 %v1213_v20  ;;  %v1307_v47 = vsel %vm374_vm0, %v1279_v35, 0  ;;  %v1145_v4 = vrot.slane %v1035_v51, 5  ;;  %v4824_v5 = vrot.slane %v1057_v52, 9  ;;  %v894_v29 = vpop.permute.xlu0 %893  ;;  %v1028_v46 = vld [vmem:[%s6248_s14 + $0x4] sm:$0xf] }
  0x90   : > { %1345 = vmatpush.bf16.xpose.msrb.mxu0 %v1307_v47  ;;  %v1278_v7 = vpack.c.b16 %v1250_v61, %v1249_v49  ;;  %v1266_v8 = vunpack.c.l.b16 %v1209_v2  ;;  %v2356_v9 = vpack.c.b16 %v2355_v62, %v2355_v62  ;;  %v1198_v10 = vrot.slane %v1058_v58, 5  ;;  %4812 = vmatmul.msk.bf16.vlgmr.msra.gmra.mxu2 %vm374_vm0, %v894_v29  ;;  %v1027_v51 = vld [vmem:[%s6248_s14] sm:$0xe]  ;;  %v1052_v52 = vld [vmem:[%s6248_s14 + $0x64] sm:$0xf] }
  0x91   : > { %v1287_v48 = vpack.c.b16 %v1268_v36, %v1267_v18  ;;  %v1144_v13 = vrot.slane %v1142_v3, 4  ;;  %v1201_v14 = vrot.slane %v1059_v1, 5  ;;  %v6561_v15 = vsel %vm374_vm0, %v5796_v59, 0  ;;  %4813 = vmatmul.msk.bf16.vlgmr.msra.gmra.mxu3 %vm374_vm0, %v894_v29  ;;  %v1029_v59 = vld [vmem:[%s6248_s14 + $0x8] sm:$0x1] }
  0x92   : > { %v1304_v17 = vsel %vm374_vm0, %v1278_v7, 0  ;;  %2357 = vrot.lane.b32.xlu2 %v2356_v9, %s6155_s22  ;;  %v1199_v21 = vsel %vm6392_vm6, %v4824_v5, %v1198_v10  ;;  %v1200_v26 = vrot.slane %v1198_v10, 4  ;;  %v6573_v28 = vsel %vm374_vm0, %v5804_v6, 0  ;;  %v1053_v1 = vld [vmem:[%s6248_s14 + $0x68] sm:$0x1] }
  0x93   : > { %1545 = vmatpush.bf16.xpose.msrb.mxu2 %v1515_v55  ;;  %v1265_v55 = vunpack.c.l.b16 %v1206_v50  ;;  %v1331_v60 = vsel %vm374_vm0, %v1287_v48, 0  ;;  %v1146_v25 = vsel %vm6392_vm6, %v1144_v13, %v1145_v4  ;;  %v1263_v18 = vunpack.c.l.b16 %v1199_v21  ;;  %v4951_v10 = vld [vmem:[%s6248_s14 + $0x60] sm:$0xf] }
  0x94   : > { %1358 = vmatpush.bf16.xpose.msrb.mxu1 %v1331_v60  ;;  %v1248_v31 = vunpack.c.l.b16 %v1146_v25  ;;  %v4815_v32 = vrot.slane %v1030_v16, 9  ;;  %v1135_v33 = vrot.slane %v1031_v11, 5  ;;  %v1138_v35 = vrot.slane %v1032_v23, 5  ;;  %v1051_v60 = vld [vmem:[%s6248_s14 + $0x60] sm:$0xe] }
  0x95   : > { %v1286_v19 = vpack.c.b16 %v1266_v8, %v1265_v55  ;;  %v4823_v36 = vrot.slane %v1054_v24, 9  ;;  %v1191_v37 = vrot.slane %v1055_v12, 5  ;;  %v1194_v50 = vrot.slane %v1056_v34, 5 }
  0x96   : > { %v1136_v43 = vsel %vm6392_vm6, %v4815_v32, %v1135_v33  ;;  %v1137_v44 = vrot.slane %v1135_v33, 4  ;;  %v6599_v62 = vsel %vm374_vm0, %v5795_v38, 0  ;;  %v4814_v4 = vrot.slane %v1027_v51, 9 }
  0x97   : > { %1558 = vmatpush.bf16.xpose.msrb.mxu3 %v6489_v56  ;;  %v1143_v56 = vsel %vm6392_vm6, %v4816_v0, %v1142_v3  ;;  %v1328_v30 = vsel %vm374_vm0, %v1286_v19, 0  ;;  %v1245_v47 = vunpack.c.l.b16 %v1136_v43  ;;  %v1192_v48 = vsel %vm6392_vm6, %v4823_v36, %v1191_v37 }
  0x98   : > { %v1247_v20 = vunpack.c.l.b16 %v1143_v56  ;;  %1346 = vmatpush.bf16.xpose.msrb.mxu0 %v1304_v17  ;;  %v1193_v49 = vrot.slane %v1191_v37, 4  ;;  %v1139_v55 = vsel %vm6392_vm6, %v1137_v44, %v1138_v35  ;;  %v1261_v58 = vunpack.c.l.b16 %v1192_v48  ;;  %v4976_v35 = vld [vmem:[%s6248_s14 + $0xc4] sm:$0xf]  ;;  %v4977_v44 = vld [vmem:[%s6248_s14 + $0xc8] sm:$0x1] }
  0x99   : > { %v6602_v0 = vsel %vm374_vm0, %v5803_v39, 0  ;;  %v1128_v5 = vrot.slane %v1028_v46, 5  ;;  %v1131_v7 = vrot.slane %v1029_v59, 5  ;;  %v4822_v8 = vrot.slane %v1051_v60, 9  ;;  %v5794_v39 = vld [vmem:[%s6248_s14 + $0x18] sm:$0xff] }
  0x9a   : > { %v1277_v40 = vpack.c.b16 %v1248_v31, %v1247_v20  ;;  %v1195_v61 = vsel %vm6392_vm6, %v1193_v49, %v1194_v50  ;;  %v1184_v9 = vrot.slane %v1052_v52, 5  ;;  %v1187_v13 = vrot.slane %v1053_v1, 5  ;;  %v4953_v20 = vld [vmem:[%s6248_s14 + $0x68] sm:$0x1] }
  0x9b   : > { %1546 = vmatpush.bf16.xpose.msrb.mxu2 %v6511_v22  ;;  %v1202_v22 = vsel %vm6392_vm6, %v1200_v26, %v1201_v14  ;;  %v1262_v3 = vunpack.c.l.b16 %v1195_v61  ;;  %v1129_v12 = vsel %vm6392_vm6, %v4814_v4, %v1128_v5  ;;  %v1130_v56 = vrot.slane %v1128_v5, 4  ;;  %v4952_v14 = vld [vmem:[%s6248_s14 + $0x64] sm:$0xf]  ;;  %v4975_v26 = vld [vmem:[%s6248_s14 + $0xc0] sm:$0xf] }
  0x9c   : > { %v1264_v41 = vunpack.c.l.b16 %v1202_v22  ;;  %v1301_v53 = vsel %vm374_vm0, %v1277_v40, 0  ;;  %1359 = vmatpush.bf16.xpose.msrb.mxu1 %v1328_v30  ;;  %v1243_v17 = vunpack.c.l.b16 %v1129_v12  ;;  %v1185_v19 = vsel %vm6392_vm6, %v4822_v8, %v1184_v9  ;;  %v4949_v4 = vld [vmem:[%s6248_s14 + $0x58] sm:$0xf] }
  0x9d   : > { %v1284_v11 = vpack.c.b16 %v1262_v3, %v1261_v58  ;;  %v1132_v23 = vsel %vm6392_vm6, %v1130_v56, %v1131_v7  ;;  %v1259_v24 = vunpack.c.l.b16 %v1185_v19  ;;  %v1794_v25 = vshrl.u32 %v4951_v10, 16  ;;  %v4948_v58 = vld [vmem:[%s6248_s14 + $0x54] sm:$0xf]  ;;  %v4950_v7 = vld [vmem:[%s6248_s14 + $0x5c] sm:$0x1] }
  0x9e   : > { %v1285_v54 = vpack.c.b16 %v1264_v41, %v1263_v18  ;;  %v1244_v18 = vunpack.c.l.b16 %v1132_v23  ;;  %v1797_v30 = vshll.u32 %v4951_v10, 16  ;;  %v1803_v31 = vshll.u32 %v4952_v14, 16 }
  0x9f   : > { %1559 = vmatpush.bf16.xpose.msrb.mxu3 %v6517_v27  ;;  %v1246_v27 = vunpack.c.l.b16 %v1139_v55  ;;  %v1322_v21 = vsel %vm374_vm0, %v1284_v11, 0  ;;  %v1796_v33 = vrot.slane %v1794_v25, 4  ;;  %v1807_v34 = vshrl.u32 %v4952_v14, 16 }
  0xa0   : > { %v1325_v2 = vsel %vm374_vm0, %v1285_v54, 0  ;;  %1347 = vmatpush.bf16.xpose.msrb.mxu0 %v1301_v53  ;;  %v1813_v22 = vshll.u32 %v4953_v20, 16  ;;  %v1275_v36 = vpack.c.b16 %v1244_v18, %v1243_v17  ;;  %v1799_v37 = vrot.slane %v1797_v30, 5  ;;  %v4972_v17 = vld [vmem:[%s6248_s14 + $0xb4] sm:$0xf] }
  0xa1   : > { %v1276_v6 = vpack.c.b16 %v1246_v27, %v1245_v47  ;;  %v1805_v38 = vrot.slane %v1803_v31, 5  ;;  %v1809_v41 = vrot.slane %v1807_v34, 4  ;;  %v1989_v46 = vshll.u32 %v4975_v26, 16  ;;  %v5802_v47 = vld [vmem:[%s6248_s14 + $0x78] sm:$0xff] }
  0xa2   : > { %v1815_v43 = vrot.slane %v1813_v22, 5  ;;  %v1295_v48 = vsel %vm374_vm0, %v1275_v36, 0  ;;  %v1800_v49 = vor.u32 %v1799_v37, %v1796_v33  ;;  %v1995_v51 = vshll.u32 %v4976_v35, 16  ;;  %v5793_v36 = vld [vmem:[%s6248_s14 + $0xc] sm:$0xff] }
  0xa3   : > { %1547 = vmatpush.bf16.xpose.msrb.mxu2 %v6533_v45  ;;  %v1298_v16 = vsel %vm374_vm0, %v1276_v6, 0  ;;  %v1186_v45 = vrot.slane %v1184_v9, 4  ;;  %v1810_v53 = vor.u32 %v1809_v41, %v1805_v38  ;;  %v1991_v54 = vrot.slane %v1989_v46, 5  ;;  %v5002_v41 = vld [vmem:[%s6248_s14 + $0x64] sm:$0xf] }
  0xa4   : > { %1360 = vmatpush.bf16.xpose.msrb.mxu1 %v1325_v2  ;;  %v1999_v55 = vshrl.u32 %v4976_v35, 16  ;;  %v1801_v59 = vrot.slane %v1800_v49, 4  ;;  %v1997_v60 = vrot.slane %v1995_v51, 5  ;;  %v2005_v27 = vshll.u32 %v4977_v44, 16  ;;  %v5001_v49 = vld [vmem:[%s6248_s14 + $0x60] sm:$0xe] }
  0xa5   : > { %v1188_v29 = vsel %vm6392_vm6, %v1186_v45, %v1187_v13  ;;  %v6633_v61 = vsel %vm374_vm0, %v5794_v39, 0  ;;  %v6636_v3 = vsel %vm374_vm0, %v5802_v47, 0  ;;  %v1770_v8 = vshrl.u32 %v4948_v58, 16  ;;  %v5026_v51 = vld [vmem:[%s6248_s14 + $0xc4] sm:$0xf] }
  0xa6   : > { %v1260_v32 = vunpack.c.l.b16 %v1188_v29  ;;  %v2001_v2 = vrot.slane %v1999_v55, 4  ;;  %v1806_v5 = vsel %vm6278_vm3, %v1801_v59, %v1805_v38  ;;  %v2007_v6 = vrot.slane %v2005_v27, 5  ;;  %v5025_v59 = vld [vmem:[%s6248_s14 + $0xc0] sm:$0xe] }
  0xa7   : > { %1560 = vmatpush.bf16.xpose.msrb.mxu3 %v6546_v57  ;;  %v1986_v57 = vshrl.u32 %v4975_v26, 16  ;;  %v1773_v9 = vshll.u32 %v4948_v58, 16  ;;  %v2028_v11 = vunpack.c.l.b16 %v1806_v5  ;;  %v1772_v14 = vrot.slane %v1770_v8, 4 }
  0xa8   : > { %v1283_v40 = vpack.c.b16 %v1260_v32, %v1259_v24  ;;  %1348 = vmatpush.bf16.xpose.msrb.mxu0 %v1298_v16  ;;  %v2002_v56 = vor.u32 %v2001_v2, %v1997_v60  ;;  %v1779_v16 = vshll.u32 %v4949_v4, 16  ;;  %v1783_v20 = vshrl.u32 %v4949_v4, 16  ;;  %v4974_v32 = vld [vmem:[%s6248_s14 + $0xbc] sm:$0x1] }
  0xa9   : > { %v1988_v50 = vrot.slane %v1986_v57, 4  ;;  %v1789_v23 = vshll.u32 %v4950_v7, 16  ;;  %v1962_v33 = vshrl.u32 %v4972_v17, 16  ;;  %v1981_v47 = vshll.u32 %v4974_v32, 16  ;;  %v1242_v7 = vpop.permute.xlu0 %1241 }
  0xaa   : > { %v6629_v52 = vsel %vm374_vm0, %v1283_v40, 0  ;;  %v2003_v45 = vrot.slane %v2002_v56, 4  ;;  %v1781_v18 = vrot.slane %v1779_v16, 5  ;;  %v1785_v30 = vrot.slane %v1783_v20, 4  ;;  %v5801_v40 = vld [vmem:[%s6248_s14 + $0x6c] sm:$0xff] }
  0xab   : > { %1548 = vmatpush.bf16.xpose.msrb.mxu2 %v6561_v15  ;;  %v1811_v15 = vrot.slane %v1810_v53, 4  ;;  %v1992_v1 = vor.u32 %v1991_v54, %v1988_v50  ;;  %v1791_v31 = vrot.slane %v1789_v23, 5  ;;  %v1964_v38 = vrot.slane %v1962_v33, 4  ;;  %v5003_v50 = vld [vmem:[%s6248_s14 + $0x68] sm:$0x1] }
  0xac   : > { %1361 = vmatpush.bf16.xpose.msrb.mxu1 %v1322_v21  ;;  %v4973_v21 = vld [vmem:[%s6248_s14 + $0xb8] sm:$0xf]  ;;  %v2008_v29 = vsel %vm6278_vm3, %v2003_v45, %v2007_v6  ;;  %v1786_v37 = vor.u32 %v1785_v30, %v1781_v18  ;;  %v1497_v27 = vsel %vm374_vm0, %v5793_v36, 0  ;;  %v6671_v4 = vsel %vm374_vm0, %v5801_v40, 0 }
  0xad   : > { %v1816_v10 = vsel %vm6278_vm3, %v1811_v15, %v1815_v43  ;;  %v1993_v12 = vrot.slane %v1992_v1, 4  ;;  %v2045_v22 = vunpack.c.l.b16 %v2008_v29  ;;  %v1971_v57 = vshll.u32 %v4973_v21, 16  ;;  %v5027_v15 = vld [vmem:[%s6248_s14 + $0xc8] sm:$0x1] }
  0xae   : > { %v2029_v13 = vunpack.c.l.b16 %v1816_v10  ;;  %v1975_v39 = vshrl.u32 %v4973_v21, 16  ;;  %v1787_v53 = vrot.slane %v1786_v37, 4  ;;  %v5035_v5 = vrot.slane %v5001_v49, 9 }
  0xaf   : > { %1561 = vmatpush.bf16.xpose.msrb.mxu3 %v6573_v28  ;;  %v1775_v28 = vrot.slane %v1773_v9, 5  ;;  %v1998_v19 = vsel %vm6278_vm3, %v1993_v12, %v1997_v60  ;;  %v1973_v55 = vrot.slane %v1971_v57, 5  ;;  %v1983_v60 = vrot.slane %v1981_v47, 5 }
  0xb0   : > { %v2053_v24 = vpack.c.b16 %v2029_v13, %v2028_v11  ;;  %v2044_v25 = vunpack.c.l.b16 %v1998_v19  ;;  %1349 = vmatpush.bf16.xpose.msrb.mxu0 %v1295_v48  ;;  %v1977_v58 = vrot.slane %v1975_v39, 4  ;;  %v1792_v1 = vsel %vm6278_vm3, %v1787_v53, %v1791_v31  ;;  %v4970_v39 = vld [vmem:[%s6248_s14 + $0xac] sm:$0xf]  ;;  %v4999_v53 = vld [vmem:[%s6248_s14 + $0x58] sm:$0xf] }
  0xb1   : > { %v1776_v26 = vor.u32 %v1775_v28, %v1772_v14  ;;  %v2293_v8 = vrot.slane %v5002_v41, 5  ;;  %v2296_v9 = vrot.slane %v5003_v50, 5  ;;  %v5043_v11 = vrot.slane %v5025_v59, 9 }
  0xb2   : > { %v2087_v34 = vsel %vm374_vm0, %v2053_v24, 0  ;;  %v2061_v43 = vpack.c.b16 %v2045_v22, %v2044_v25  ;;  %v1978_v2 = vor.u32 %v1977_v58, %v1973_v55  ;;  %v2349_v12 = vrot.slane %v5026_v51, 5  ;;  %v4946_v24 = vld [vmem:[%s6248_s14 + $0x4c] sm:$0xf] }
  0xb3   : > { %1549 = vmatpush.bf16.xpose.msrb.mxu2 %v6599_v62  ;;  %v1777_v35 = vrot.slane %v1776_v26, 4  ;;  %v1965_v62 = vshll.u32 %v4972_v17, 16  ;;  %v2352_v56 = vrot.slane %v5027_v15, 5  ;;  %v2294_v28 = vsel %vm6392_vm6, %v5035_v5, %v2293_v8  ;;  %v4945_v17 = vld [vmem:[%s6248_s14 + $0x48] sm:$0xf] }
  0xb4   : > { %1362 = vmatpush.bf16.xpose.msrb.mxu1 %v6629_v52  ;;  %v2027_v52 = vunpack.c.l.b16 %v1792_v1  ;;  %v1979_v10 = vrot.slane %v1978_v2, 4  ;;  %v2295_v16 = vrot.slane %v2293_v8, 4  ;;  %v2373_v20 = vunpack.c.l.b16 %v2294_v28  ;;  %v5000_v1 = vld [vmem:[%s6248_s14 + $0x5c] sm:$0x1]  ;;  %v5023_v28 = vld [vmem:[%s6248_s14 + $0xb8] sm:$0xf] }
  0xb5   : > { %v1782_v44 = vsel %vm6278_vm3, %v1777_v35, %v1781_v18  ;;  %v1967_v46 = vrot.slane %v1965_v62, 5  ;;  %v2350_v23 = vsel %vm6392_vm6, %v5043_v11, %v2349_v12  ;;  %v2351_v21 = vrot.slane %v2349_v12, 4  ;;  %v4969_v62 = vld [vmem:[%s6248_s14 + $0xa8] sm:$0xf] }
  0xb6   : > { %v2026_v54 = vunpack.c.l.b16 %v1782_v44  ;;  %v1984_v19 = vsel %vm6278_vm3, %v1979_v10, %v1983_v60  ;;  %v2297_v18 = vsel %vm6392_vm6, %v2295_v16, %v2296_v9  ;;  %v2389_v30 = vunpack.c.l.b16 %v2350_v23 }
  0xb7   : > { %1562 = vmatpush.bf16.xpose.msrb.mxu3 %v6602_v0  ;;  %v2111_v0 = vsel %vm374_vm0, %v2061_v43, 0  ;;  %v1968_v48 = vor.u32 %v1967_v46, %v1964_v38  ;;  %4830 = vmatmul.msk.bf16.vlgmr.msrb.gmra.mxu0 %vm374_vm0, %v1242_v7  ;;  %v2043_v26 = vunpack.c.l.b16 %v1984_v19  ;;  %v2374_v29 = vunpack.c.l.b16 %v2297_v18  ;;  %v4971_v46 = vld [vmem:[%s6248_s14 + $0xb0] sm:$0x1] }
  0xb8   : > { %2113 = vmatpush.bf16.xpose.msra.mxu0 %v2087_v34  ;;  %v2052_v13 = vpack.c.b16 %v2027_v52, %v2026_v54  ;;  %v1746_v32 = vshrl.u32 %v4945_v17, 16  ;;  %v4947_v34 = vld [vmem:[%s6248_s14 + $0x50] sm:$0x1]  ;;  %v1749_v22 = vshll.u32 %v4945_v17, 16  ;;  %v1755_v35 = vshll.u32 %v4946_v24, 16 }
  0xb9   : > { %v1969_v6 = vrot.slane %v1968_v48, 4  ;;  %v2398_v36 = vpack.c.b16 %v2374_v29, %v2373_v20  ;;  %v1759_v44 = vshrl.u32 %v4946_v24, 16  ;;  %v1765_v50 = vshll.u32 %v4947_v34, 16  ;;  %v4942_v20 = vld [vmem:[%s6248_s14 + $0x3c] sm:$0xf] }
  0xba   : > { %v2084_v25 = vsel %vm374_vm0, %v2052_v13, 0  ;;  %v1748_v57 = vrot.slane %v1746_v32, 4  ;;  %v1751_v41 = vrot.slane %v1749_v22, 5  ;;  %v1757_v43 = vrot.slane %v1755_v35, 5 }
  0xbb   : > { %1550 = vmatpush.bf16.xpose.msrb.mxu2 %v6633_v61  ;;  %v1974_v14 = vsel %vm6278_vm3, %v1969_v6, %v1973_v55  ;;  %v2692_v61 = vld [vmem:[%s7332_s1] sm:$0xf]  ;;  %4831 = vmatmul.msk.bf16.vlgmr.msrb.gmra.mxu1 %vm374_vm0, %v1242_v7  ;;  %v2432_v47 = vsel %vm374_vm0, %v2398_v36, 0  ;;  %v1938_v51 = vshrl.u32 %v4969_v62, 16  ;;  %v1761_v55 = vrot.slane %v1759_v44, 4  ;;  %v1412_v7 = vpop.permute.xlu1 %1411 }
  0xbc   : > { %2126 = vmatpush.bf16.xpose.msra.mxu1 %v2111_v0  ;;  %v2042_v45 = vunpack.c.l.b16 %v1974_v14  ;;  %v3126_v31 = vunpack.c.l.b16 %v2692_v61  ;;  %v1752_v54 = vor.u32 %v1751_v41, %v1748_v57  ;;  %v1941_v58 = vshll.u32 %v4969_v62, 16  ;;  %v4998_v0 = vld [vmem:[%s6248_s14 + $0x54] sm:$0xe]  ;;  %v4943_v36 = vld [vmem:[%s6248_s14 + $0x40] sm:$0xf] }
  0xbd   : > { %v1947_v59 = vshll.u32 %v4970_v39, 16  ;;  %v1767_v60 = vrot.slane %v1765_v50, 5  ;;  %v1951_v15 = vshrl.u32 %v4970_v39, 16  ;;  %v1762_v5 = vor.u32 %v1761_v55, %v1757_v43  ;;  %v4944_v39 = vld [vmem:[%s6248_s14 + $0x44] sm:$0x1] }
  0xbe   : > { %v2060_v33 = vpack.c.b16 %v2043_v26, %v2042_v45  ;;  %v3127_v38 = vpack.c.b16 %v3126_v31, %v3126_v31  ;;  %v1753_v2 = vrot.slane %v1752_v54, 4  ;;  %v1943_v52 = vrot.slane %v1941_v58, 5  ;;  %v5024_v45 = vld [vmem:[%s6248_s14 + $0xbc] sm:$0x1] }
  0xbf   : > { %1563 = vmatpush.bf16.xpose.msrb.mxu3 %v6636_v3  ;;  %v2353_v3 = vsel %vm6392_vm6, %v2351_v21, %v2352_v56  ;;  %v1949_v6 = vrot.slane %v1947_v59, 5  ;;  %v1953_v8 = vrot.slane %v1951_v15, 4  ;;  %v1957_v9 = vshll.u32 %v4971_v46, 16  ;;  %v4968_v15 = vld [vmem:[%s6248_s14 + $0xa4] sm:$0x1] }
  0xc0   : > { %2114 = vmatpush.bf16.xpose.msra.mxu0 %v2084_v25  ;;  %v2390_v37 = vunpack.c.l.b16 %v2353_v3  ;;  %v2108_v40 = vsel %vm374_vm0, %v2060_v33, 0  ;;  %3128 = vrot.lane.b32.xlu0 %v3127_v38, %s6156_s29  ;;  %v5034_v10 = vrot.slane %v4998_v0, 9  ;;  %v2286_v11 = vrot.slane %v4999_v53, 5  ;;  %v4967_v0 = vld [vmem:[%s6248_s14 + $0xa0] sm:$0xf] }
  0xc1   : > { %v1758_v12 = vsel %vm6278_vm3, %v1753_v2, %v1757_v43  ;;  %v1763_v56 = vrot.slane %v1762_v5, 4  ;;  %v2289_v14 = vrot.slane %v5000_v1, 5  ;;  %v1954_v61 = vor.u32 %v1953_v8, %v1949_v6 }
  0xc2   : > { %v2406_v49 = vpack.c.b16 %v2390_v37, %v2389_v30  ;;  %v2024_v16 = vunpack.c.l.b16 %v1758_v12  ;;  %v1959_v17 = vrot.slane %v1957_v9, 5  ;;  %v2287_v19 = vsel %vm6392_vm6, %v5034_v10, %v2286_v11  ;;  %v4996_v12 = vld [vmem:[%s6248_s14 + $0x4c] sm:$0xf] }
  0xc3   : > { %1551 = vmatpush.bf16.xpose.msrb.mxu2 %v1497_v27  ;;  %v1940_v27 = vrot.slane %v1938_v51, 4  ;;  %v1768_v23 = vsel %vm6278_vm3, %v1763_v56, %v1767_v60  ;;  %v2288_v25 = vrot.slane %v2286_v11, 4  ;;  %v2371_v26 = vunpack.c.l.b16 %v2287_v19 }
  0xc4   : > { %2127 = vmatpush.bf16.xpose.msra.mxu1 %v2108_v40  ;;  %v2456_v48 = vsel %vm374_vm0, %v2406_v49, 0  ;;  %v2025_v18 = vunpack.c.l.b16 %v1768_v23  ;;  %v1955_v21 = vrot.slane %v1954_v61, 4  ;;  %v2342_v30 = vrot.slane %v5023_v28, 5  ;;  %v4997_v28 = vld [vmem:[%s6248_s14 + $0x50] sm:$0x1] }
  0xc5   : > { %v1944_v13 = vor.u32 %v1943_v52, %v1940_v27  ;;  %v2290_v32 = vsel %vm6392_vm6, %v2288_v25, %v2289_v14  ;;  %v2345_v33 = vrot.slane %v5024_v45, 5  ;;  %v1722_v3 = vshrl.u32 %v4942_v20, 16  ;;  %v5019_v25 = vld [vmem:[%s6248_s14 + $0xa8] sm:$0xe] }
  0xc6   : > { %v2051_v34 = vpack.c.b16 %v2025_v18, %v2024_v16  ;;  %v1960_v22 = vsel %vm6278_vm3, %v1955_v21, %v1959_v17  ;;  %v2372_v62 = vunpack.c.l.b16 %v2290_v32  ;;  %v2344_v57 = vrot.slane %v2342_v30, 4 }
  0xc7   : > { %1564 = vmatpush.bf16.xpose.msrb.mxu3 %v6671_v4  ;;  %v5022_v4 = vld [vmem:[%s6248_s14 + $0xb4] sm:$0xe]  ;;  %v1945_v24 = vrot.slane %v1944_v13, 4  ;;  %v2041_v37 = vunpack.c.l.b16 %v1960_v22  ;;  %v1724_v40 = vrot.slane %v1722_v3, 4  ;;  %v1725_v46 = vshll.u32 %v4942_v20, 16 }
  0xc8   : > { %v5042_v29 = vrot.slane %v5022_v4, 9  ;;  %v2081_v41 = vsel %vm374_vm0, %v2051_v34, 0  ;;  %v2397_v43 = vpack.c.b16 %v2372_v62, %v2371_v26  ;;  %v2346_v50 = vsel %vm6392_vm6, %v2344_v57, %v2345_v33  ;;  %v5020_v26 = vld [vmem:[%s6248_s14 + $0xac] sm:$0xf] }
  0xc9   : > { %v1950_v31 = vsel %vm6278_vm3, %v1945_v24, %v1949_v6  ;;  %2115 = vmatpush.bf16.xpose.msra.mxu0 %v2081_v41  ;;  %v1731_v51 = vshll.u32 %v4943_v36, 16  ;;  %v1735_v53 = vshrl.u32 %v4943_v36, 16  ;;  %v2388_v55 = vunpack.c.l.b16 %v2346_v50  ;;  %v4939_v41 = vld [vmem:[%s6248_s14 + $0x30] sm:$0xf] }
  0xca   : > { %4928 = vmatmul.msk.bf16.vlgmr.msrb.gmra.mxu2 %vm374_vm0, %v1412_v7  ;;  %v2040_v35 = vunpack.c.l.b16 %v1950_v31  ;;  %v2343_v38 = vsel %vm6392_vm6, %v5042_v29, %v2342_v30  ;;  %v2429_v54 = vsel %vm374_vm0, %v2397_v43, 0  ;;  %v1727_v58 = vrot.slane %v1725_v46, 5  ;;  %v5021_v31 = vld [vmem:[%s6248_s14 + $0xb0] sm:$0x1] }
  0xcb   : > { %2458 = vmatpush.bf16.xpose.msra.mxu2 %v2432_v47  ;;  %v2387_v44 = vunpack.c.l.b16 %v2343_v38  ;;  %v4966_v47 = vld [vmem:[%s6248_s14 + $0x9c] sm:$0xf]  ;;  %v1741_v59 = vshll.u32 %v4944_v39, 16  ;;  %v1733_v60 = vrot.slane %v1731_v51, 5  ;;  %v1737_v27 = vrot.slane %v1735_v53, 4 }
  0xcc   : > { %v2059_v49 = vpack.c.b16 %v2041_v37, %v2040_v35  ;;  %v1914_v1 = vshrl.u32 %v4966_v47, 16  ;;  %v1728_v5 = vor.u32 %v1727_v58, %v1724_v40  ;;  %v1917_v6 = vshll.u32 %v4966_v47, 16  ;;  %v2490_v40 = vld [vmem:[%s7332_s1] sm:$0xf] }
  0xcd   : > { %v2405_v2 = vpack.c.b16 %v2388_v55, %v2387_v44  ;;  %v1743_v52 = vrot.slane %v1741_v59, 5  ;;  %v1738_v8 = vor.u32 %v1737_v27, %v1733_v60  ;;  %v1923_v10 = vshll.u32 %v4967_v0, 16  ;;  %v4941_v27 = vld [vmem:[%s6248_s14 + $0x38] sm:$0x1] }
  0xce   : > { %4929 = vmatmul.msk.bf16.vlgmr.msrb.gmra.mxu3 %vm374_vm0, %v1412_v7  ;;  %v4995_v7 = vld [vmem:[%s6248_s14 + $0x48] sm:$0xe]  ;;  %v1916_v9 = vrot.slane %v1914_v1, 4  ;;  %v1927_v11 = vshrl.u32 %v4967_v0, 16  ;;  %v1729_v13 = vrot.slane %v1728_v5, 4  ;;  %v1919_v14 = vrot.slane %v1917_v6, 5 }
  0xcf   : > { %2471 = vmatpush.bf16.xpose.msra.mxu3 %v2456_v48  ;;  %v2105_v48 = vsel %vm374_vm0, %v2059_v49, 0  ;;  %v2453_v56 = vsel %vm374_vm0, %v2405_v2, 0  ;;  %v1933_v4 = vshll.u32 %v4968_v15, 16  ;;  %v1739_v16 = vrot.slane %v1738_v8, 4  ;;  %v4940_v49 = vld [vmem:[%s6248_s14 + $0x34] sm:$0xf] }
  0xd0   : > { %2128 = vmatpush.bf16.xpose.msra.mxu1 %v2105_v48  ;;  %v1925_v61 = vrot.slane %v1923_v10, 5  ;;  %v1929_v17 = vrot.slane %v1927_v11, 4  ;;  %v5033_v19 = vrot.slane %v4995_v7, 9  ;;  %v1734_v45 = vsel %vm6278_vm3, %v1729_v13, %v1733_v60  ;;  %v4963_v2 = vld [vmem:[%s6248_s14 + $0x90] sm:$0xf] }
  0xd1   : > { %v1920_v20 = vor.u32 %v1919_v14, %v1916_v9  ;;  %v1935_v23 = vrot.slane %v1933_v4, 5  ;;  %v2279_v24 = vrot.slane %v4996_v12, 5  ;;  %v1744_v18 = vsel %vm6278_vm3, %v1739_v16, %v1743_v52  ;;  %v4964_v8 = vld [vmem:[%s6248_s14 + $0x94] sm:$0xf]  ;;  %v4965_v14 = vld [vmem:[%s6248_s14 + $0x98] sm:$0x1] }
  0xd2   : > { %v2022_v21 = vunpack.c.l.b16 %v1734_v45  ;;  %v1930_v29 = vor.u32 %v1929_v17, %v1925_v61  ;;  %v2282_v30 = vrot.slane %v4997_v28, 5  ;;  %v2023_v32 = vunpack.c.l.b16 %v1744_v18  ;;  %v4992_v45 = vld [vmem:[%s6248_s14 + $0x3c] sm:$0xe]  ;;  %v4994_v18 = vld [vmem:[%s6248_s14 + $0x44] sm:$0x1] }
  0xd3   : > { %2459 = vmatpush.bf16.xpose.msra.mxu2 %v2429_v54  ;;  %v1921_v33 = vrot.slane %v1920_v20, 4  ;;  %v2280_v3 = vsel %vm6392_vm6, %v5033_v19, %v2279_v24  ;;  %v2281_v34 = vrot.slane %v2279_v24, 4  ;;  %v5041_v62 = vrot.slane %v5019_v25, 9  ;;  %v4993_v20 = vld [vmem:[%s6248_s14 + $0x40] sm:$0xf] }
  0xd4   : > { %v1931_v22 = vrot.slane %v1930_v29, 4  ;;  %v2369_v35 = vunpack.c.l.b16 %v2280_v3  ;;  %v2335_v36 = vrot.slane %v5020_v26, 5  ;;  %v2050_v37 = vpack.c.b16 %v2023_v32, %v2022_v21 }
  0xd5   : > { %v1926_v38 = vsel %vm6278_vm3, %v1921_v33, %v1925_v61  ;;  %v2283_v57 = vsel %vm6392_vm6, %v2281_v34, %v2282_v30  ;;  %v2338_v39 = vrot.slane %v5021_v31, 5  ;;  %v2525_v58 = vunpack.c.l.b16 %v2490_v40 }
  0xd6   : > { %v1936_v43 = vsel %vm6278_vm3, %v1931_v22, %v1935_v23  ;;  %v2038_v44 = vunpack.c.l.b16 %v1926_v38  ;;  %v2370_v46 = vunpack.c.l.b16 %v2283_v57  ;;  %v2336_v47 = vsel %vm6392_vm6, %v5041_v62, %v2335_v36  ;;  %v5016_v22 = vld [vmem:[%s6248_s14 + $0x9c] sm:$0xe]  ;;  %v5017_v38 = vld [vmem:[%s6248_s14 + $0xa0] sm:$0xf] }
  0xd7   : > { %2472 = vmatpush.bf16.xpose.msra.mxu3 %v2453_v56  ;;  %v2078_v50 = vsel %vm374_vm0, %v2050_v37, 0  ;;  %v2039_v51 = vunpack.c.l.b16 %v1936_v43  ;;  %v2337_v53 = vrot.slane %v2335_v36, 4  ;;  %v2385_v54 = vunpack.c.l.b16 %v2336_v47  ;;  %v5018_v43 = vld [vmem:[%s6248_s14 + $0xa4] sm:$0x1] }
  0xd8   : > { %2116 = vmatpush.bf16.xpose.msra.mxu0 %v2078_v50  ;;  %v2396_v55 = vpack.c.b16 %v2370_v46, %v2369_v35  ;;  %v1698_v59 = vshrl.u32 %v4939_v41, 16  ;;  %v1701_v0 = vshll.u32 %v4939_v41, 16  ;;  %v1707_v15 = vshll.u32 %v4940_v49, 16 }
  0xd9   : > { %v2058_v48 = vpack.c.b16 %v2039_v51, %v2038_v44  ;;  %v2339_v60 = vsel %vm6392_vm6, %v2337_v53, %v2338_v39  ;;  %v1711_v1 = vshrl.u32 %v4940_v49, 16  ;;  %v2526_v6 = vpack.c.b16 %v2525_v58, %v2525_v58 }
  0xda   : > { %v2426_v5 = vsel %vm374_vm0, %v2396_v55, 0  ;;  %v2386_v52 = vunpack.c.l.b16 %v2339_v60  ;;  %v1700_v7 = vrot.slane %v1698_v59, 4  ;;  %v1703_v10 = vrot.slane %v1701_v0, 5  ;;  %v4936_v55 = vld [vmem:[%s6248_s14 + $0x24] sm:$0xf] }
  0xdb   : > { %v2102_v9 = vsel %vm374_vm0, %v2058_v48, 0  ;;  %2460 = vmatpush.bf16.xpose.msra.mxu2 %v2426_v5  ;;  %v1709_v11 = vrot.slane %v1707_v15, 5  ;;  %v1713_v12 = vrot.slane %v1711_v1, 4  ;;  %2527 = vrot.lane.b32.xlu2 %v2526_v6, %s6157_s6  ;;  %v1717_v13 = vshll.u32 %v4941_v27, 16  ;;  %v4937_v60 = vld [vmem:[%s6248_s14 + $0x28] sm:$0xf] }
  0xdc   : > { %2129 = vmatpush.bf16.xpose.msra.mxu1 %v2102_v9  ;;  %v2404_v56 = vpack.c.b16 %v2386_v52, %v2385_v54  ;;  %v1890_v4 = vshrl.u32 %v4963_v2, 16  ;;  %v1893_v28 = vshll.u32 %v4963_v2, 16  ;;  %v1704_v16 = vor.u32 %v1703_v10, %v1700_v7  ;;  %v4938_v5 = vld [vmem:[%s6248_s14 + $0x2c] sm:$0x1]  ;;  %s6078_s6 = sshra.s32 %s4623_s30, 4  ;;  %s6079_s6 = int_to_ptr.hbm [resolvable:$true] %s6078_s6 }
  0xdd   : > { %v1714_v61 = vor.u32 %v1713_v12, %v1709_v11  ;;  %v1899_v17 = vshll.u32 %v4964_v8, 16  ;;  %v1903_v19 = vshrl.u32 %v4964_v8, 16  ;;  %v1719_v24 = vrot.slane %v1717_v13, 5  ;;  %s6080_s7 = scalar_lea.hbm %s6079_s6, 64  ;;  %p6085_p5 = scmp.lt.s32.totalorder %s6079_s6, %s7335_s4 }
  0xde   : > { %v2450_v23 = vsel %vm374_vm0, %v2404_v56, 0  ;;  %v1892_v25 = vrot.slane %v1890_v4, 4  ;;  %v1895_v26 = vrot.slane %v1893_v28, 5  ;;  %v1705_v21 = vrot.slane %v1704_v16, 4  ;;  %v4960_v56 = vld [vmem:[%s6248_s14 + $0x84] sm:$0xf]  ;;  %p6081_p1 = scmp.ne.s32.totalorder %s6079_s6, %s6080_s7 }
  0xdf   : > { %2473 = vmatpush.bf16.xpose.msra.mxu3 %v2450_v23  ;;  %v1715_v29 = vrot.slane %v1714_v61, 4  ;;  %v1901_v30 = vrot.slane %v1899_v17, 5  ;;  %v1905_v31 = vrot.slane %v1903_v19, 4  ;;  %v1909_v33 = vshll.u32 %v4965_v14, 16  ;;  %v4961_v16 = vld [vmem:[%s6248_s14 + $0x88] sm:$0xf] }
  0xe0   : > { %v1896_v32 = vor.u32 %v1895_v26, %v1892_v25  ;;  %v5032_v3 = vrot.slane %v4992_v45, 9  ;;  %v2272_v34 = vrot.slane %v4993_v20, 5  ;;  %v1710_v35 = vsel %vm6278_vm3, %v1705_v21, %v1709_v11  ;;  %v4962_v20 = vld [vmem:[%s6248_s14 + $0x8c] sm:$0x1]  ;;  %p6082_p2 = pnand %p6081_p1, %p6225_p4 }
  0xe1   : > { %v1720_v62 = vsel %vm6278_vm3, %v1715_v29, %v1719_v24  ;;  %v1906_v36 = vor.u32 %v1905_v31, %v1901_v30  ;;  %v2275_v37 = vrot.slane %v4994_v18, 5  ;;  %v2020_v57 = vunpack.c.l.b16 %v1710_v35  ;;  %v4990_v18 = vld [vmem:[%s6248_s14 + $0x34] sm:$0xf] }
  0xe2   : > { %v2021_v39 = vunpack.c.l.b16 %v1720_v62  ;;  %v1897_v40 = vrot.slane %v1896_v32, 4  ;;  %v1911_v41 = vrot.slane %v1909_v33, 5  ;;  %v2273_v46 = vsel %vm6392_vm6, %v5032_v3, %v2272_v34  ;;  %v4989_v32 = vld [vmem:[%s6248_s14 + $0x30] sm:$0xe]  ;;  %v5014_v33 = vld [vmem:[%s6248_s14 + $0x94] sm:$0xf]  ;;  %p6083_p3 = pneg %p6082_p2 }
  0xe3   : > { %v1907_v44 = vrot.slane %v1906_v36, 4  ;;  %v2274_v47 = vrot.slane %v2272_v34, 4  ;;  %v5040_v49 = vrot.slane %v5016_v22, 9  ;;  %v2367_v53 = vunpack.c.l.b16 %v2273_v46  ;;  %v4991_v62 = vld [vmem:[%s6248_s14 + $0x38] sm:$0x1] }
  0xe4   : > { %v2049_v50 = vpack.c.b16 %v2021_v39, %v2020_v57  ;;  %v1902_v51 = vsel %vm6278_vm3, %v1897_v40, %v1901_v30  ;;  %v2328_v54 = vrot.slane %v5017_v38, 5  ;;  %v2331_v48 = vrot.slane %v5018_v43, 5  ;;  %v5013_v39 = vld [vmem:[%s6248_s14 + $0x90] sm:$0xe] }
  0xe5   : > { %v1912_v58 = vsel %vm6278_vm3, %v1907_v44, %v1911_v41  ;;  %v2036_v59 = vunpack.c.l.b16 %v1902_v51  ;;  %v2276_v0 = vsel %vm6392_vm6, %v2274_v47, %v2275_v37  ;;  %v1674_v7 = vshrl.u32 %v4936_v55, 16 }
  0xe6   : > { %v2075_v27 = vsel %vm374_vm0, %v2049_v50, 0  ;;  %v2037_v15 = vunpack.c.l.b16 %v1912_v58  ;;  %v2368_v1 = vunpack.c.l.b16 %v2276_v0  ;;  %v2329_v2 = vsel %vm6392_vm6, %v5040_v49, %v2328_v54 }
  0xe7   : > { %2117 = vmatpush.bf16.xpose.msra.mxu0 %v2075_v27  ;;  %v2330_v52 = vrot.slane %v2328_v54, 4  ;;  %v2383_v6 = vunpack.c.l.b16 %v2329_v2  ;;  %v1677_v8 = vshll.u32 %v4936_v55, 16  ;;  %v1683_v11 = vshll.u32 %v4937_v60, 16  ;;  %v5015_v54 = vld [vmem:[%s6248_s14 + $0x98] sm:$0x1] }
  0xe8   : > { %v2057_v9 = vpack.c.b16 %v2037_v15, %v2036_v59  ;;  %v2395_v10 = vpack.c.b16 %v2368_v1, %v2367_v53  ;;  %v1687_v12 = vshrl.u32 %v4937_v60, 16  ;;  %v1676_v14 = vrot.slane %v1674_v7, 4 }
  0xe9   : > { %v2332_v13 = vsel %vm6392_vm6, %v2330_v52, %v2331_v48  ;;  %v1679_v4 = vrot.slane %v1677_v8, 5  ;;  %v1693_v28 = vshll.u32 %v4938_v5, 16  ;;  %v1685_v45 = vrot.slane %v1683_v11, 5  ;;  %v4933_v5 = vld [vmem:[%s6248_s14 + $0x18] sm:$0xf] }
  0xea   : > { %v2099_v61 = vsel %vm374_vm0, %v2057_v9, 0  ;;  %v2423_v17 = vsel %vm374_vm0, %v2395_v10, 0  ;;  %v2384_v19 = vunpack.c.l.b16 %v2332_v13  ;;  %v1689_v24 = vrot.slane %v1687_v12, 4  ;;  %v4934_v9 = vld [vmem:[%s6248_s14 + $0x1c] sm:$0xf] }
  0xeb   : > { %2130 = vmatpush.bf16.xpose.msra.mxu1 %v2099_v61  ;;  %2461 = vmatpush.bf16.xpose.msra.mxu2 %v2423_v17  ;;  %v1680_v23 = vor.u32 %v1679_v4, %v1676_v14  ;;  %v1695_v25 = vrot.slane %v1693_v28, 5  ;;  %v1866_v26 = vshrl.u32 %v4960_v56, 16  ;;  %v1869_v29 = vshll.u32 %v4960_v56, 16  ;;  %v4935_v13 = vld [vmem:[%s6248_s14 + $0x20] sm:$0x1] }
  0xec   : > { %v2403_v21 = vpack.c.b16 %v2384_v19, %v2383_v6  ;;  %v1875_v30 = vshll.u32 %v4961_v16, 16  ;;  %v1879_v31 = vshrl.u32 %v4961_v16, 16  ;;  %v1690_v34 = vor.u32 %v1689_v24, %v1685_v45 }
  0xed   : > { %v1681_v3 = vrot.slane %v1680_v23, 4  ;;  %v1868_v22 = vrot.slane %v1866_v26, 4  ;;  %v1885_v35 = vshll.u32 %v4962_v20, 16  ;;  %v1871_v37 = vrot.slane %v1869_v29, 5  ;;  %v4957_v20 = vld [vmem:[%s6248_s14 + $0x78] sm:$0xf] }
  0xee   : > { %v2447_v36 = vsel %vm374_vm0, %v2403_v21, 0  ;;  %v1877_v38 = vrot.slane %v1875_v30, 5  ;;  %v1881_v57 = vrot.slane %v1879_v31, 4  ;;  %v1691_v41 = vrot.slane %v1690_v34, 4  ;;  %v4958_v23 = vld [vmem:[%s6248_s14 + $0x7c] sm:$0xf] }
  0xef   : > { %2474 = vmatpush.bf16.xpose.msra.mxu3 %v2447_v36  ;;  %v1686_v40 = vsel %vm6278_vm3, %v1681_v3, %v1685_v45  ;;  %v1887_v43 = vrot.slane %v1885_v35, 5  ;;  %v5031_v44 = vrot.slane %v4989_v32, 9  ;;  %v1872_v47 = vor.u32 %v1871_v37, %v1868_v22  ;;  %v4959_v21 = vld [vmem:[%s6248_s14 + $0x80] sm:$0x1] }
  0xf0   : > { %v2018_v46 = vunpack.c.l.b16 %v1686_v40  ;;  %v1882_v49 = vor.u32 %v1881_v57, %v1877_v38  ;;  %v2265_v50 = vrot.slane %v4990_v18, 5  ;;  %v1696_v51 = vsel %vm6278_vm3, %v1691_v41, %v1695_v25 }
  0xf1   : > { %v2268_v53 = vrot.slane %v4991_v62, 5  ;;  %v5039_v55 = vrot.slane %v5013_v39, 9  ;;  %v2321_v58 = vrot.slane %v5014_v33, 5  ;;  %v2019_v59 = vunpack.c.l.b16 %v1696_v51  ;;  %v4987_v33 = vld [vmem:[%s6248_s14 + $0x28] sm:$0xf] }
  0xf2   : > { %v1873_v0 = vrot.slane %v1872_v47, 4  ;;  %v1883_v48 = vrot.slane %v1882_v49, 4  ;;  %v2266_v60 = vsel %vm6392_vm6, %v5031_v44, %v2265_v50  ;;  %v2267_v27 = vrot.slane %v2265_v50, 4  ;;  %v4986_v62 = vld [vmem:[%s6248_s14 + $0x24] sm:$0xe] }
  0xf3   : > { %v2365_v15 = vunpack.c.l.b16 %v2266_v60  ;;  %v2322_v1 = vsel %vm6392_vm6, %v5039_v55, %v2321_v58  ;;  %v2323_v2 = vrot.slane %v2321_v58, 4  ;;  %v2048_v52 = vpack.c.b16 %v2019_v59, %v2018_v46  ;;  %v4988_v39 = vld [vmem:[%s6248_s14 + $0x2c] sm:$0x1]  ;;  %v5010_v46 = vld [vmem:[%s6248_s14 + $0x84] sm:$0xe] }
  0xf4   : > { %v1878_v6 = vsel %vm6278_vm3, %v1873_v0, %v1877_v38  ;;  %v1888_v7 = vsel %vm6278_vm3, %v1883_v48, %v1887_v43  ;;  %v2324_v8 = vrot.slane %v5015_v54, 5  ;;  %v2269_v12 = vsel %vm6392_vm6, %v2267_v27, %v2268_v53  ;;  %v5011_v59 = vld [vmem:[%s6248_s14 + $0x88] sm:$0xf]  ;;  %v5012_v27 = vld [vmem:[%s6248_s14 + $0x8c] sm:$0x1] }
  0xf5   : > { %v2034_v10 = vunpack.c.l.b16 %v1878_v6  ;;  %v2035_v11 = vunpack.c.l.b16 %v1888_v7  ;;  %v2381_v56 = vunpack.c.l.b16 %v2322_v1  ;;  %v2072_v14 = vsel %vm374_vm0, %v2048_v52, 0  ;;  %v4930_v1 = vld [vmem:[%s6248_s14 + $0xc] sm:$0xf] }
  0xf6   : > { %v2366_v4 = vunpack.c.l.b16 %v2269_v12  ;;  %v2325_v28 = vsel %vm6392_vm6, %v2323_v2, %v2324_v8  ;;  %v1650_v16 = vshrl.u32 %v4933_v5, 16  ;;  %2118 = vmatpush.bf16.xpose.msra.mxu0 %v2072_v14  ;;  %v1653_v19 = vshll.u32 %v4933_v5, 16 }
  0xf7   : > { %v2056_v61 = vpack.c.b16 %v2035_v11, %v2034_v10  ;;  %v2382_v17 = vunpack.c.l.b16 %v2325_v28  ;;  %v1659_v45 = vshll.u32 %v4934_v9, 16  ;;  %v1663_v26 = vshrl.u32 %v4934_v9, 16 }
  0xf8   : > { %v2394_v24 = vpack.c.b16 %v2366_v4, %v2365_v15  ;;  %v1652_v25 = vrot.slane %v1650_v16, 4  ;;  %v1669_v18 = vshll.u32 %v4935_v13, 16  ;;  %v1655_v31 = vrot.slane %v1653_v19, 5  ;;  %v4931_v16 = vld [vmem:[%s6248_s14 + $0x10] sm:$0xf] }
  0xf9   : > { %v2096_v29 = vsel %vm374_vm0, %v2056_v61, 0  ;;  %v2402_v30 = vpack.c.b16 %v2382_v17, %v2381_v56  ;;  %v1661_v32 = vrot.slane %v1659_v45, 5  ;;  %v1665_v34 = vrot.slane %v1663_v26, 4 }
  0xfa   : > { %2131 = vmatpush.bf16.xpose.msra.mxu1 %v2096_v29  ;;  %v2420_v3 = vsel %vm374_vm0, %v2394_v24, 0  ;;  %v1671_v22 = vrot.slane %v1669_v18, 5  ;;  %v1842_v35 = vshrl.u32 %v4957_v20, 16  ;;  %v1656_v37 = vor.u32 %v1655_v31, %v1652_v25 }
  0xfb   : > { %2462 = vmatpush.bf16.xpose.msra.mxu2 %v2420_v3  ;;  %v2444_v36 = vsel %vm374_vm0, %v2402_v30, 0  ;;  %v1845_v38 = vshll.u32 %v4957_v20, 16  ;;  %v1851_v57 = vshll.u32 %v4958_v23, 16  ;;  %v1666_v40 = vor.u32 %v1665_v34, %v1661_v32 }
  0xfc   : > { %2475 = vmatpush.bf16.xpose.msra.mxu3 %v2444_v36  ;;  %v1844_v41 = vrot.slane %v1842_v35, 4  ;;  %v1855_v43 = vshrl.u32 %v4958_v23, 16  ;;  %v1861_v44 = vshll.u32 %v4959_v21, 16  ;;  %v1657_v47 = vrot.slane %v1656_v37, 4  ;;  %v4932_v23 = vld [vmem:[%s6248_s14 + $0x14] sm:$0x1] }
  0xfd   : > { %v1847_v49 = vrot.slane %v1845_v38, 5  ;;  %v1853_v50 = vrot.slane %v1851_v57, 5  ;;  %v5030_v51 = vrot.slane %v4986_v62, 9  ;;  %v1667_v53 = vrot.slane %v1666_v40, 4  ;;  %v4955_v35 = vld [vmem:[%s6248_s14 + $0x70] sm:$0xf] }
  0xfe   : > { %v1857_v54 = vrot.slane %v1855_v43, 4  ;;  %v1863_v55 = vrot.slane %v1861_v44, 5  ;;  %v2258_v58 = vrot.slane %v4987_v33, 5  ;;  %v1662_v0 = vsel %vm6278_vm3, %v1657_v47, %v1661_v32  ;;  %v4954_v32 = vld [vmem:[%s6248_s14 + $0x6c] sm:$0xf] }
  0xff   : > { %v1848_v48 = vor.u32 %v1847_v49, %v1844_v41  ;;  %v2261_v60 = vrot.slane %v4988_v39, 5  ;;  %v5038_v15 = vrot.slane %v5010_v46, 9  ;;  %v1672_v2 = vsel %vm6278_vm3, %v1667_v53, %v1671_v22  ;;  %v4956_v57 = vld [vmem:[%s6248_s14 + $0x74] sm:$0x1]  ;;  %v4984_v53 = vld [vmem:[%s6248_s14 + $0x1c] sm:$0xf] }
 0x100   : > { %v2016_v5 = vunpack.c.l.b16 %v1662_v0  ;;  %v1858_v52 = vor.u32 %v1857_v54, %v1853_v50  ;;  %v2259_v6 = vsel %vm6392_vm6, %v5030_v51, %v2258_v58  ;;  %v2017_v7 = vunpack.c.l.b16 %v1672_v2  ;;  %v5824_v51 = vld [vmem:[%s6248_s14 + $0xcc] sm:$0xff]  ;;  %v4983_v0 = vld [vmem:[%s6248_s14 + $0x18] sm:$0xe]  ;;  %v4985_v2 = vld [vmem:[%s6248_s14 + $0x20] sm:$0x1] }
 0x101   : > { %v1849_v8 = vrot.slane %v1848_v48, 4  ;;  %v2260_v9 = vrot.slane %v2258_v58, 4  ;;  %v2363_v10 = vunpack.c.l.b16 %v2259_v6  ;;  %v2314_v12 = vrot.slane %v5011_v59, 5  ;;  %v5008_v48 = vld [vmem:[%s6248_s14 + $0x7c] sm:$0xf] }
 0x102   : > { %v1859_v11 = vrot.slane %v1858_v52, 4  ;;  %v2317_v56 = vrot.slane %v5012_v27, 5  ;;  %v1626_v13 = vshrl.u32 %v4930_v1, 16  ;;  %v2047_v14 = vpack.c.b16 %v2017_v7, %v2016_v5 }
 0x103   : > { %v1854_v4 = vsel %vm6278_vm3, %v1849_v8, %v1853_v50  ;;  %v2262_v28 = vsel %vm6392_vm6, %v2260_v9, %v2261_v60  ;;  %v1629_v61 = vshll.u32 %v4930_v1, 16  ;;  %v2315_v20 = vsel %vm6392_vm6, %v5038_v15, %v2314_v12  ;;  %v5816_v50 = vld [vmem:[%s6248_s14 + $0x6c] sm:$0xff]  ;;  %v5007_v8 = vld [vmem:[%s6248_s14 + $0x78] sm:$0xe] }
 0x104   : > { %v1864_v17 = vsel %vm6278_vm3, %v1859_v11, %v1863_v55  ;;  %v2032_v19 = vunpack.c.l.b16 %v1854_v4  ;;  %v2364_v45 = vunpack.c.l.b16 %v2262_v28  ;;  %v2069_v24 = vsel %vm374_vm0, %v2047_v14, 0 }
 0x105   : > { %v2033_v25 = vunpack.c.l.b16 %v1864_v17  ;;  %v2316_v26 = vrot.slane %v2314_v12, 4  ;;  %v2379_v18 = vunpack.c.l.b16 %v2315_v20  ;;  %2119 = vmatpush.bf16.xpose.msra.mxu0 %v2069_v24  ;;  %v1628_v29 = vrot.slane %v1626_v13, 4 }
 0x106   : > { %v2393_v21 = vpack.c.b16 %v2364_v45, %v2363_v10  ;;  %v1631_v30 = vrot.slane %v1629_v61, 5  ;;  %v1635_v31 = vshll.u32 %v4931_v16, 16  ;;  %v1639_v34 = vshrl.u32 %v4931_v16, 16 }
 0x107   : > { %v2055_v33 = vpack.c.b16 %v2033_v25, %v2032_v19  ;;  %v2318_v3 = vsel %vm6392_vm6, %v2316_v26, %v2317_v56  ;;  %v1645_v22 = vshll.u32 %v4932_v23, 16  ;;  %v1818_v43 = vshrl.u32 %v4954_v32, 16  ;;  %v5009_v56 = vld [vmem:[%s6248_s14 + $0x80] sm:$0x1] }
 0x108   : > { %v2417_v62 = vsel %vm374_vm0, %v2393_v21, 0  ;;  %v2380_v36 = vunpack.c.l.b16 %v2318_v3  ;;  %v1632_v37 = vor.u32 %v1631_v30, %v1628_v29  ;;  %v1637_v38 = vrot.slane %v1635_v31, 5  ;;  %v5815_v25 = vld [vmem:[%s6248_s14 + $0x60] sm:$0xff] }
 0x109   : > { %v2093_v39 = vsel %vm374_vm0, %v2055_v33, 0  ;;  %2463 = vmatpush.bf16.xpose.msra.mxu2 %v2417_v62  ;;  %v1641_v40 = vrot.slane %v1639_v34, 4  ;;  %v1647_v41 = vrot.slane %v1645_v22, 5  ;;  %v1821_v47 = vshll.u32 %v4954_v32, 16  ;;  %v5823_v26 = vld [vmem:[%s6248_s14 + $0xc0] sm:$0xff] }
 0x10a   : > { %2132 = vmatpush.bf16.xpose.msra.mxu1 %v2093_v39  ;;  %v2401_v44 = vpack.c.b16 %v2380_v36, %v2379_v18  ;;  %v1633_v46 = vrot.slane %v1632_v37, 4  ;;  %v1827_v49 = vshll.u32 %v4955_v35, 16  ;;  %v1820_v55 = vrot.slane %v1818_v43, 4  ;;  %v3261_v31 = vld [vmem:[%s7332_s1] sm:$0xf] }
 0x10b   : > { %v1642_v54 = vor.u32 %v1641_v40, %v1637_v38  ;;  %v1831_v58 = vshrl.u32 %v4955_v35, 16  ;;  %v1837_v59 = vshll.u32 %v4956_v57, 16  ;;  %v1823_v15 = vrot.slane %v1821_v47, 5  ;;  %v4980_v22 = vld [vmem:[%s6248_s14 + $0xc] sm:$0xe] }
 0x10c   : > { %v2441_v60 = vsel %vm374_vm0, %v2401_v44, 0  ;;  %v1638_v27 = vsel %vm6278_vm3, %v1633_v46, %v1637_v38  ;;  %v1829_v1 = vrot.slane %v1827_v49, 5  ;;  %v2634_v10 = vsel %vm374_vm0, %v5816_v50, 0  ;;  %v4981_v35 = vld [vmem:[%s6248_s14 + $0x10] sm:$0xf] }
 0x10d   : > { %2476 = vmatpush.bf16.xpose.msra.mxu3 %v2441_v60  ;;  %v1643_v5 = vrot.slane %v1642_v54, 4  ;;  %v2014_v52 = vunpack.c.l.b16 %v1638_v27  ;;  %v1833_v6 = vrot.slane %v1831_v58, 4  ;;  %v1839_v7 = vrot.slane %v1837_v59, 5  ;;  %v4982_v57 = vld [vmem:[%s6248_s14 + $0x14] sm:$0x1] }
 0x10e   : > { %v1824_v9 = vor.u32 %v1823_v15, %v1820_v55  ;;  %v2658_v11 = vsel %vm374_vm0, %v5824_v51, 0  ;;  %v5029_v12 = vrot.slane %v4983_v0, 9  ;;  %v2251_v4 = vrot.slane %v4984_v53, 5  ;;  %v5004_v39 = vld [vmem:[%s6248_s14 + $0x6c] sm:$0xe] }
 0x10f   : > { %v1648_v13 = vsel %vm6278_vm3, %v1643_v5, %v1647_v41  ;;  %v1834_v14 = vor.u32 %v1833_v6, %v1829_v1  ;;  %v2254_v28 = vrot.slane %v4985_v2, 5  ;;  %v5037_v17 = vrot.slane %v5007_v8, 9  ;;  %v5005_v46 = vld [vmem:[%s6248_s14 + $0x70] sm:$0xf]  ;;  %v5006_v53 = vld [vmem:[%s6248_s14 + $0x74] sm:$0x1] }
 0x110   : > { %v2015_v16 = vunpack.c.l.b16 %v1648_v13  ;;  %v1825_v61 = vrot.slane %v1824_v9, 4  ;;  %v2307_v19 = vrot.slane %v5008_v48, 5  ;;  %v2252_v20 = vsel %vm6392_vm6, %v5029_v12, %v2251_v4  ;;  %v5165_v54 = vld [vmem:[%s6248_s14 + $0x6c] sm:$0xf]  ;;  %v5166_v6 = vld [vmem:[%s6248_s14 + $0x70] sm:$0xf] }
 0x111   : > { %v1835_v45 = vrot.slane %v1834_v14, 4  ;;  %v2253_v23 = vrot.slane %v2251_v4, 4  ;;  %v2310_v24 = vrot.slane %v5009_v56, 5  ;;  %v2361_v29 = vunpack.c.l.b16 %v2252_v20  ;;  %v5167_v56 = vld [vmem:[%s6248_s14 + $0x74] sm:$0x1] }
 0x112   : > { %v2046_v18 = vpack.c.b16 %v2015_v16, %v2014_v52  ;;  %v1830_v21 = vsel %vm6278_vm3, %v1825_v61, %v1829_v1  ;;  %v2308_v30 = vsel %vm6392_vm6, %v5037_v17, %v2307_v19  ;;  %v2309_v34 = vrot.slane %v2307_v19, 4  ;;  %v2013_v1 = vpop.permute.xlu1 %2012  ;;  %v5189_v13 = vld [vmem:[%s6248_s14 + $0xcc] sm:$0xf] }
 0x113   : > { %v1840_v32 = vsel %vm6278_vm3, %v1835_v45, %v1839_v7  ;;  %v2030_v33 = vunpack.c.l.b16 %v1830_v21  ;;  %v2255_v3 = vsel %vm6392_vm6, %v2253_v23, %v2254_v28  ;;  %v2377_v38 = vunpack.c.l.b16 %v2308_v30 }
 0x114   : > { %v2066_v62 = vsel %vm374_vm0, %v2046_v18, 0  ;;  %v2031_v36 = vunpack.c.l.b16 %v1840_v32  ;;  %v2362_v37 = vunpack.c.l.b16 %v2255_v3  ;;  %v2311_v40 = vsel %vm6392_vm6, %v2309_v34, %v2310_v24  ;;  %v5190_v24 = vld [vmem:[%s6248_s14 + $0xd0] sm:$0xf] }
 0x115   : > { %2120 = vmatpush.bf16.xpose.msra.mxu0 %v2066_v62  ;;  %v3471_v41 = vunpack.c.l.b16 %v3261_v31  ;;  %v2631_v43 = vsel %vm374_vm0, %v5815_v25, 0  ;;  %v6906_v44 = vsel %vm374_vm0, %v5823_v26, 0  ;;  %v2378_v50 = vunpack.c.l.b16 %v2311_v40  ;;  %v5814_v31 = vld [vmem:[%s6248_s14 + $0x54] sm:$0xff] }
 0x116   : > { %v2054_v47 = vpack.c.b16 %v2031_v36, %v2030_v33  ;;  %v2392_v49 = vpack.c.b16 %v2362_v37, %v2361_v29  ;;  %v5028_v51 = vrot.slane %v4980_v22, 9  ;;  %v2244_v58 = vrot.slane %v4981_v35, 5  ;;  %v5191_v29 = vld [vmem:[%s6248_s14 + $0xd4] sm:$0x1] }
 0x117   : > { %v3472_v55 = vpack.c.b16 %v3471_v41, %v3471_v41  ;;  %v2247_v59 = vrot.slane %v4982_v57, 5  ;;  %v5036_v0 = vrot.slane %v5004_v39, 9  ;;  %v2400_v27 = vpack.c.b16 %v2378_v50, %v2377_v38  ;;  %v5822_v22 = vld [vmem:[%s6248_s14 + $0xb4] sm:$0xff]  ;;  %v5162_v41 = vld [vmem:[%s6248_s14 + $0x60] sm:$0xf] }
 0x118   : > { %v2090_v48 = vsel %vm374_vm0, %v2054_v47, 0  ;;  %v2414_v60 = vsel %vm374_vm0, %v2392_v49, 0  ;;  %v2300_v15 = vrot.slane %v5005_v46, 5  ;;  %v2245_v2 = vsel %vm6392_vm6, %v5028_v51, %v2244_v58  ;;  %v5163_v50 = vld [vmem:[%s6248_s14 + $0x64] sm:$0xf] }
 0x119   : > { %2133 = vmatpush.bf16.xpose.msra.mxu1 %v2090_v48  ;;  %2464 = vmatpush.bf16.xpose.msra.mxu2 %v2414_v60  ;;  %v2246_v5 = vrot.slane %v2244_v58, 4  ;;  %v2303_v52 = vrot.slane %v5006_v53, 5  ;;  %v2910_v7 = vshrl.u32 %v5165_v54, 16  ;;  %v2438_v8 = vsel %vm374_vm0, %v2400_v27, 0  ;;  %v5164_v58 = vld [vmem:[%s6248_s14 + $0x68] sm:$0x1] }
 0x11a   : > { %3473 = vrot.lane.b32.xlu1 %v3472_v55, %s6158_s9  ;;  %v2359_v9 = vunpack.c.l.b16 %v2245_v2  ;;  %v2302_v12 = vrot.slane %v2300_v15, 4  ;;  %2477 = vmatpush.bf16.xpose.msra.mxu3 %v2438_v8  ;;  %v2919_v17 = vshll.u32 %v5166_v6, 16  ;;  %v2923_v19 = vshrl.u32 %v5166_v6, 16  ;;  %s6084_s9 = scalar_lea.hbm %s7335_s4, 128 }
 0x11b   : > { %v2248_v14 = vsel %vm6392_vm6, %v2246_v5, %v2247_v59  ;;  %v2912_v28 = vrot.slane %v2910_v7, 4  ;;  %v2929_v23 = vshll.u32 %v5167_v56, 16  ;;  %v3102_v25 = vshrl.u32 %v5189_v13, 16  ;;  %v5186_v5 = vld [vmem:[%s6248_s14 + $0xc0] sm:$0xf]  ;;  %p6086_p6 = scmp.lt.s32.totalorder %s6084_s9, %s6080_s7 }
 0x11c   : > { %4978 = vmatmul.msk.bf16.vlgmr.msra.gmra.mxu0 %vm374_vm0, %v2013_v1  ;;  %v2360_v16 = vunpack.c.l.b16 %v2248_v14  ;;  %v2304_v61 = vsel %vm6392_vm6, %v2302_v12, %v2303_v52  ;;  %v2921_v18 = vrot.slane %v2919_v17, 5  ;;  %v2925_v21 = vrot.slane %v2923_v19, 4  ;;  %v5188_v14 = vld [vmem:[%s6248_s14 + $0xc8] sm:$0x1] }
 0x11d   : > { %2660 = vmatpush.bf16.xpose.msrb.mxu0 %v2634_v10  ;;  %v2301_v10 = vsel %vm6392_vm6, %v5036_v0, %v2300_v15  ;;  %v2376_v45 = vunpack.c.l.b16 %v2304_v61  ;;  %v3105_v30 = vshll.u32 %v5189_v13, 16  ;;  %v2931_v3 = vrot.slane %v2929_v23, 5  ;;  %v2358_v15 = vpop.permute.xlu2 %2357  ;;  %v5187_v13 = vld [vmem:[%s6248_s14 + $0xc4] sm:$0xf]  ;;  %v5813_v61 = vld [vmem:[%s6248_s14 + $0x48] sm:$0xff]  ;;  %p6087_p7 = por %p6086_p6, %p6085_p5 }
 0x11e   : > { %v2375_v4 = vunpack.c.l.b16 %v2301_v10  ;;  %v2391_v26 = vpack.c.b16 %v2360_v16, %v2359_v9  ;;  %v3104_v34 = vrot.slane %v3102_v25, 4  ;;  %v2926_v62 = vor.u32 %v2925_v21, %v2921_v18 }
 0x11f   : > { %v3107_v36 = vrot.slane %v3105_v30, 5  ;;  %v3111_v37 = vshll.u32 %v5190_v24, 16  ;;  %v3115_v39 = vshrl.u32 %v5190_v24, 16  ;;  %v3121_v40 = vshll.u32 %v5191_v29, 16  ;;  %p6088_p9 = pnand %p6087_p7, %p6083_p3 }
 0x120   : > { %v2399_v32 = vpack.c.b16 %v2376_v45, %v2375_v4  ;;  %4979 = vmatmul.msk.bf16.vlgmr.msra.gmra.mxu1 %vm374_vm0, %v2013_v1  ;;  %v2411_v35 = vsel %vm374_vm0, %v2391_v26, 0  ;;  %v2628_v49 = vsel %vm374_vm0, %v5814_v31, 0  ;;  %v2652_v55 = vsel %vm374_vm0, %v5822_v22, 0  ;;  %v5159_v22 = vld [vmem:[%s6248_s14 + $0x54] sm:$0xf] }
 0x121   : > { %2673 = vmatpush.bf16.xpose.msrb.mxu1 %v2658_v11  ;;  %v2913_v11 = vshll.u32 %v5165_v54, 16  ;;  %2465 = vmatpush.bf16.xpose.msra.mxu2 %v2411_v35  ;;  %v3108_v46 = vor.u32 %v3107_v36, %v3104_v34  ;;  %v3113_v47 = vrot.slane %v3111_v37, 5  ;;  %v3117_v53 = vrot.slane %v3115_v39, 4 }
 0x122   : > { %v2435_v38 = vsel %vm374_vm0, %v2399_v32, 0  ;;  %v3123_v54 = vrot.slane %v3121_v40, 5  ;;  %v2886_v48 = vshrl.u32 %v5162_v41, 16  ;;  %v2889_v1 = vshll.u32 %v5162_v41, 16 }
 0x123   : > { %v2915_v20 = vrot.slane %v2913_v11, 5  ;;  %2478 = vmatpush.bf16.xpose.msra.mxu3 %v2435_v38  ;;  %v3109_v0 = vrot.slane %v3108_v46, 4  ;;  %v3118_v27 = vor.u32 %v3117_v53, %v3113_v47  ;;  %v2895_v2 = vshll.u32 %v5163_v50, 16  ;;  %v5160_v38 = vld [vmem:[%s6248_s14 + $0x58] sm:$0xf] }
 0x124   : > { %v2888_v6 = vrot.slane %v2886_v48, 4  ;;  %v2899_v7 = vshrl.u32 %v5163_v50, 16  ;;  %v2905_v8 = vshll.u32 %v5164_v58, 16  ;;  %v2891_v56 = vrot.slane %v2889_v1, 5  ;;  %v5183_v58 = vld [vmem:[%s6248_s14 + $0xb4] sm:$0xf] }
 0x125   : > { %2661 = vmatpush.bf16.xpose.msrb.mxu0 %v2631_v43  ;;  %v2916_v33 = vor.u32 %v2915_v20, %v2912_v28  ;;  %v2927_v43 = vrot.slane %v2926_v62, 4  ;;  %v3114_v52 = vsel %vm6278_vm3, %v3109_v0, %v3113_v47  ;;  %v3119_v10 = vrot.slane %v3118_v27, 4 }
 0x126   : > { %v3160_v12 = vunpack.c.l.b16 %v3114_v52  ;;  %v2897_v4 = vrot.slane %v2895_v2, 5  ;;  %v2901_v28 = vrot.slane %v2899_v7, 4  ;;  %v2907_v11 = vrot.slane %v2905_v8, 5 }
 0x127   : > { %v2917_v57 = vrot.slane %v2916_v33, 4  ;;  %v2932_v59 = vsel %vm6278_vm3, %v2927_v43, %v2931_v3  ;;  %v3078_v16 = vshrl.u32 %v5186_v5, 16  ;;  %v3124_v19 = vsel %vm6278_vm3, %v3119_v10, %v3123_v54 }
 0x128   : > { %v3145_v60 = vunpack.c.l.b16 %v2932_v59  ;;  %5044 = vmatmul.msk.bf16.vlgmr.msra.gmra.mxu2 %vm374_vm0, %v2358_v15  ;;  %v2892_v45 = vor.u32 %v2891_v56, %v2888_v6  ;;  %v3081_v20 = vshll.u32 %v5186_v5, 16  ;;  %v3161_v23 = vunpack.c.l.b16 %v3124_v19  ;;  %v5185_v5 = vld [vmem:[%s6248_s14 + $0xbc] sm:$0x1] }
 0x129   : > { %2674 = vmatpush.bf16.xpose.msrb.mxu1 %v6906_v44  ;;  %v2922_v51 = vsel %vm6278_vm3, %v2917_v57, %v2921_v18  ;;  %v2902_v24 = vor.u32 %v2901_v28, %v2897_v4  ;;  %v3080_v25 = vrot.slane %v3078_v16, 4  ;;  %v3087_v26 = vshll.u32 %v5187_v13, 16  ;;  %v5821_v18 = vld [vmem:[%s6248_s14 + $0xa8] sm:$0xff]  ;;  %v5161_v57 = vld [vmem:[%s6248_s14 + $0x5c] sm:$0x1] }
 0x12a   : > { %v3144_v44 = vunpack.c.l.b16 %v2922_v51  ;;  %5045 = vmatmul.msk.bf16.vlgmr.msra.gmra.mxu3 %vm374_vm0, %v2358_v15  ;;  %v2893_v21 = vrot.slane %v2892_v45, 4  ;;  %v3083_v29 = vrot.slane %v3081_v20, 5  ;;  %v3091_v30 = vshrl.u32 %v5187_v13, 16  ;;  %v5820_v16 = vld [vmem:[%s6248_s14 + $0x9c] sm:$0xff]  ;;  %v5156_v20 = vld [vmem:[%s6248_s14 + $0x48] sm:$0xf] }
 0x12b   : > { %v3097_v31 = vshll.u32 %v5188_v14, 16  ;;  %v3177_v32 = vpack.c.b16 %v3161_v23, %v3160_v12  ;;  %v2903_v33 = vrot.slane %v2902_v24, 4  ;;  %v3089_v3 = vrot.slane %v3087_v26, 5 }
 0x12c   : > { %v3169_v9 = vpack.c.b16 %v3145_v60, %v3144_v44  ;;  %v2625_v34 = vsel %vm374_vm0, %v5813_v61, 0  ;;  %v2898_v35 = vsel %vm6278_vm3, %v2893_v21, %v2897_v4  ;;  %v3084_v62 = vor.u32 %v3083_v29, %v3080_v25  ;;  %v5184_v60 = vld [vmem:[%s6248_s14 + $0xb8] sm:$0xf] }
 0x12d   : > { %2662 = vmatpush.bf16.xpose.msrb.mxu0 %v2628_v49  ;;  %v3093_v36 = vrot.slane %v3091_v30, 4  ;;  %v3099_v37 = vrot.slane %v3097_v31, 5  ;;  %v3227_v39 = vsel %vm374_vm0, %v3177_v32, 0  ;;  %v2908_v40 = vsel %vm6278_vm3, %v2903_v33, %v2907_v11  ;;  %v5158_v32 = vld [vmem:[%s6248_s14 + $0x50] sm:$0x1] }
 0x12e   : > { %v3203_v17 = vsel %vm374_vm0, %v3169_v9, 0  ;;  %v3142_v41 = vunpack.c.l.b16 %v2898_v35  ;;  %v2649_v43 = vsel %vm374_vm0, %v5821_v18, 0  ;;  %3242 = vmatpush.bf16.xpose.msrb.mxu3 %v3227_v39  ;;  %v3143_v46 = vunpack.c.l.b16 %v2908_v40  ;;  %v5812_v9 = vld [vmem:[%s6248_s14 + $0x3c] sm:$0xff]  ;;  %v5157_v18 = vld [vmem:[%s6248_s14 + $0x4c] sm:$0xf] }
 0x12f   : > { %3229 = vmatpush.bf16.xpose.msrb.mxu2 %v3203_v17  ;;  %v3085_v47 = vrot.slane %v3084_v62, 4  ;;  %v3094_v49 = vor.u32 %v3093_v36, %v3089_v3  ;;  %v2862_v50 = vshrl.u32 %v5159_v22, 16  ;;  %v2865_v51 = vshll.u32 %v5159_v22, 16 }
 0x130   : > { %v2871_v53 = vshll.u32 %v5160_v38, 16  ;;  %v2875_v54 = vshrl.u32 %v5160_v38, 16  ;;  %v3168_v59 = vpack.c.b16 %v3143_v46, %v3142_v41  ;;  %v3054_v8 = vshrl.u32 %v5183_v58, 16  ;;  %v5180_v41 = vld [vmem:[%s6248_s14 + $0xa8] sm:$0xf] }
 0x131   : > { %2675 = vmatpush.bf16.xpose.msrb.mxu1 %v2652_v55  ;;  %v2881_v55 = vshll.u32 %v5161_v57, 16  ;;  %v3090_v44 = vsel %vm6278_vm3, %v3085_v47, %v3089_v3  ;;  %v3095_v0 = vrot.slane %v3094_v49, 4  ;;  %v2864_v48 = vrot.slane %v2862_v50, 4  ;;  %v5181_v50 = vld [vmem:[%s6248_s14 + $0xac] sm:$0xf] }
 0x132   : > { %v3158_v27 = vunpack.c.l.b16 %v3090_v44  ;;  %v2867_v15 = vrot.slane %v2865_v51, 5  ;;  %v2873_v1 = vrot.slane %v2871_v53, 5  ;;  %v2877_v2 = vrot.slane %v2875_v54, 4 }
 0x133   : > { %v3200_v52 = vsel %vm374_vm0, %v3168_v59, 0  ;;  %v3100_v6 = vsel %vm6278_vm3, %v3095_v0, %v3099_v37  ;;  %v2883_v7 = vrot.slane %v2881_v55, 5  ;;  %v3057_v13 = vshll.u32 %v5183_v58, 16  ;;  %v5182_v58 = vld [vmem:[%s6248_s14 + $0xb0] sm:$0x1] }
 0x134   : > { %v3159_v10 = vunpack.c.l.b16 %v3100_v6  ;;  %v2868_v12 = vor.u32 %v2867_v15, %v2864_v48  ;;  %v2878_v56 = vor.u32 %v2877_v2, %v2873_v1  ;;  %v3056_v14 = vrot.slane %v3054_v8, 4  ;;  %v5819_v8 = vld [vmem:[%s6248_s14 + $0x90] sm:$0xff] }
 0x135   : > { %2663 = vmatpush.bf16.xpose.msrb.mxu0 %v2625_v34  ;;  %v3063_v4 = vshll.u32 %v5184_v60, 16  ;;  %v3067_v28 = vshrl.u32 %v5184_v60, 16  ;;  %v3073_v11 = vshll.u32 %v5185_v5, 16  ;;  %v3059_v45 = vrot.slane %v3057_v13, 5  ;;  %v5811_v60 = vld [vmem:[%s6248_s14 + $0x30] sm:$0xff] }
 0x136   : > { %v3176_v61 = vpack.c.b16 %v3159_v10, %v3158_v27  ;;  %v2869_v17 = vrot.slane %v2868_v12, 4  ;;  %v2879_v19 = vrot.slane %v2878_v56, 4  ;;  %v2622_v26 = vsel %vm374_vm0, %v5812_v9, 0  ;;  %v5153_v13 = vld [vmem:[%s6248_s14 + $0x3c] sm:$0xf] }
 0x137   : > { %3230 = vmatpush.bf16.xpose.msrb.mxu2 %v3200_v52  ;;  %v3065_v23 = vrot.slane %v3063_v4, 5  ;;  %v3069_v24 = vrot.slane %v3067_v28, 4  ;;  %v3075_v25 = vrot.slane %v3073_v11, 5  ;;  %v3060_v31 = vor.u32 %v3059_v45, %v3056_v14 }
 0x138   : > { %v3224_v21 = vsel %vm374_vm0, %v3176_v61, 0  ;;  %v2874_v29 = vsel %vm6278_vm3, %v2869_v17, %v2873_v1  ;;  %v2884_v30 = vsel %vm6278_vm3, %v2879_v19, %v2883_v7  ;;  %v2646_v22 = vsel %vm374_vm0, %v5820_v16, 0  ;;  %v5154_v16 = vld [vmem:[%s6248_s14 + $0x40] sm:$0xf] }
 0x139   : > { %2676 = vmatpush.bf16.xpose.msrb.mxu1 %v2649_v43  ;;  %3243 = vmatpush.bf16.xpose.msrb.mxu3 %v3224_v21  ;;  %v3140_v33 = vunpack.c.l.b16 %v2874_v29  ;;  %v3141_v3 = vunpack.c.l.b16 %v2884_v30  ;;  %v3070_v34 = vor.u32 %v3069_v24, %v3065_v23  ;;  %v3061_v35 = vrot.slane %v3060_v31, 4 }
 0x13a   : > { %v2838_v62 = vshrl.u32 %v5156_v20, 16  ;;  %v2841_v36 = vshll.u32 %v5156_v20, 16  ;;  %v2847_v37 = vshll.u32 %v5157_v18, 16  ;;  %v2851_v39 = vshrl.u32 %v5157_v18, 16  ;;  %v5155_v20 = vld [vmem:[%s6248_s14 + $0x44] sm:$0x1] }
 0x13b   : > { %v3167_v38 = vpack.c.b16 %v3141_v3, %v3140_v33  ;;  %v3071_v57 = vrot.slane %v3070_v34, 4  ;;  %v2857_v40 = vshll.u32 %v5158_v32, 16  ;;  %v3066_v43 = vsel %vm6278_vm3, %v3061_v35, %v3065_v23  ;;  %v5177_v34 = vld [vmem:[%s6248_s14 + $0x9c] sm:$0xf] }
 0x13c   : > { %v2840_v46 = vrot.slane %v2838_v62, 4  ;;  %v2843_v47 = vrot.slane %v2841_v36, 5  ;;  %v2849_v49 = vrot.slane %v2847_v37, 5  ;;  %v3156_v54 = vunpack.c.l.b16 %v3066_v43  ;;  %v5178_v37 = vld [vmem:[%s6248_s14 + $0xa0] sm:$0xf] }
 0x13d   : > { %2664 = vmatpush.bf16.xpose.msrb.mxu0 %v2622_v26  ;;  %v3197_v51 = vsel %vm374_vm0, %v3167_v38, 0  ;;  %v3076_v53 = vsel %vm6278_vm3, %v3071_v57, %v3075_v25  ;;  %v2853_v55 = vrot.slane %v2851_v39, 4  ;;  %v2859_v0 = vrot.slane %v2857_v40, 5 }
 0x13e   : > { %v3157_v59 = vunpack.c.l.b16 %v3076_v53  ;;  %v2844_v44 = vor.u32 %v2843_v47, %v2840_v46  ;;  %v3030_v48 = vshrl.u32 %v5180_v41, 16  ;;  %v3033_v15 = vshll.u32 %v5180_v41, 16  ;;  %v5179_v41 = vld [vmem:[%s6248_s14 + $0xa4] sm:$0x1] }
 0x13f   : > { %3231 = vmatpush.bf16.xpose.msrb.mxu2 %v3197_v51  ;;  %v2854_v27 = vor.u32 %v2853_v55, %v2849_v49  ;;  %v3039_v1 = vshll.u32 %v5181_v50, 16  ;;  %v3043_v2 = vshrl.u32 %v5181_v50, 16  ;;  %v3049_v7 = vshll.u32 %v5182_v58, 16  ;;  %v5810_v55 = vld [vmem:[%s6248_s14 + $0x24] sm:$0xff] }
 0x140   : > { %v3175_v5 = vpack.c.b16 %v3157_v59, %v3156_v54  ;;  %v2845_v52 = vrot.slane %v2844_v44, 4  ;;  %v3032_v6 = vrot.slane %v3030_v48, 4  ;;  %v3035_v10 = vrot.slane %v3033_v15, 5  ;;  %v5818_v58 = vld [vmem:[%s6248_s14 + $0x84] sm:$0xff] }
 0x141   : > { %2677 = vmatpush.bf16.xpose.msrb.mxu1 %v2646_v22  ;;  %v2855_v9 = vrot.slane %v2854_v27, 4  ;;  %v3041_v12 = vrot.slane %v3039_v1, 5  ;;  %v3045_v56 = vrot.slane %v3043_v2, 4  ;;  %v3051_v28 = vrot.slane %v3049_v7, 5 }
 0x142   : > { %v3221_v14 = vsel %vm374_vm0, %v3175_v5, 0  ;;  %v2850_v4 = vsel %vm6278_vm3, %v2845_v52, %v2849_v49  ;;  %v2619_v11 = vsel %vm374_vm0, %v5811_v60, 0  ;;  %v3036_v19 = vor.u32 %v3035_v10, %v3032_v6  ;;  %v5150_v60 = vld [vmem:[%s6248_s14 + $0x30] sm:$0xf]  ;;  %v5151_v5 = vld [vmem:[%s6248_s14 + $0x34] sm:$0xf] }
 0x143   : > { %3244 = vmatpush.bf16.xpose.msrb.mxu3 %v3221_v14  ;;  %v2860_v61 = vsel %vm6278_vm3, %v2855_v9, %v2859_v0  ;;  %v3138_v17 = vunpack.c.l.b16 %v2850_v4  ;;  %v3046_v45 = vor.u32 %v3045_v56, %v3041_v12  ;;  %v2643_v24 = vsel %vm374_vm0, %v5819_v8, 0  ;;  %v5152_v9 = vld [vmem:[%s6248_s14 + $0x38] sm:$0x1] }
 0x144   : > { %v3139_v23 = vunpack.c.l.b16 %v2860_v61  ;;  %v2814_v25 = vshrl.u32 %v5153_v13, 16  ;;  %v2817_v26 = vshll.u32 %v5153_v13, 16  ;;  %v3037_v18 = vrot.slane %v3036_v19, 4 }
 0x145   : > { %2665 = vmatpush.bf16.xpose.msrb.mxu0 %v2619_v11  ;;  %v3047_v21 = vrot.slane %v3046_v45, 4  ;;  %v2823_v29 = vshll.u32 %v5154_v16, 16  ;;  %v2827_v30 = vshrl.u32 %v5154_v16, 16  ;;  %v2833_v3 = vshll.u32 %v5155_v20, 16  ;;  %v5174_v45 = vld [vmem:[%s6248_s14 + $0x90] sm:$0xf] }
 0x146   : > { %v3166_v31 = vpack.c.b16 %v3139_v23, %v3138_v17  ;;  %v2816_v32 = vrot.slane %v2814_v25, 4  ;;  %v2819_v33 = vrot.slane %v2817_v26, 5  ;;  %v3042_v22 = vsel %vm6278_vm3, %v3037_v18, %v3041_v12  ;;  %v5175_v26 = vld [vmem:[%s6248_s14 + $0x94] sm:$0xf] }
 0x147   : > { %v3052_v35 = vsel %vm6278_vm3, %v3047_v21, %v3051_v28  ;;  %v2825_v62 = vrot.slane %v2823_v29, 5  ;;  %v2829_v36 = vrot.slane %v2827_v30, 4  ;;  %v3154_v57 = vunpack.c.l.b16 %v3042_v22 }
 0x148   : > { %v3194_v38 = vsel %vm374_vm0, %v3166_v31, 0  ;;  %v3155_v39 = vunpack.c.l.b16 %v3052_v35  ;;  %v2820_v40 = vor.u32 %v2819_v33, %v2816_v32  ;;  %v2835_v46 = vrot.slane %v2833_v3, 5  ;;  %v5176_v31 = vld [vmem:[%s6248_s14 + $0x98] sm:$0x1]  ;;  %v7033_v32 = vpop.f32.mrf.mxu0  ;;  %v7035_v33 = vpop.f32.mrf.mxu1 }
 0x149   : > { %2678 = vmatpush.bf16.xpose.msrb.mxu1 %v2643_v24  ;;  %3232 = vmatpush.bf16.xpose.msrb.mxu2 %v3194_v38  ;;  %v2830_v43 = vor.u32 %v2829_v36, %v2825_v62  ;;  %v3006_v47 = vshrl.u32 %v5177_v34, 16  ;;  %v3009_v49 = vshll.u32 %v5177_v34, 16  ;;  %v3015_v53 = vshll.u32 %v5178_v37, 16 }
 0x14a   : > { %v3174_v50 = vpack.c.b16 %v3155_v39, %v3154_v57  ;;  %v2821_v51 = vrot.slane %v2820_v40, 4  ;;  %v3019_v54 = vshrl.u32 %v5178_v37, 16  ;;  %v3025_v48 = vshll.u32 %v5179_v41, 16  ;;  %v5216_v39 = vld [vmem:[%s6248_s14 + $0x70] sm:$0xf] }
 0x14b   : > { %v2831_v59 = vrot.slane %v2830_v43, 4  ;;  %v3008_v44 = vrot.slane %v3006_v47, 4  ;;  %v3011_v0 = vrot.slane %v3009_v49, 5  ;;  %v3017_v1 = vrot.slane %v3015_v53, 5  ;;  %v5817_v47 = vld [vmem:[%s6248_s14 + $0x78] sm:$0xff] }
 0x14c   : > { %v3218_v27 = vsel %vm374_vm0, %v3174_v50, 0  ;;  %v2826_v15 = vsel %vm6278_vm3, %v2821_v51, %v2825_v62  ;;  %v3021_v2 = vrot.slane %v3019_v54, 4  ;;  %v3027_v8 = vrot.slane %v3025_v48, 5  ;;  %v5809_v62 = vld [vmem:[%s6248_s14 + $0x18] sm:$0xff]  ;;  %v5215_v49 = vld [vmem:[%s6248_s14 + $0x6c] sm:$0xe] }
 0x14d   : > { %3245 = vmatpush.bf16.xpose.msrb.mxu3 %v3218_v27  ;;  %v2836_v52 = vsel %vm6278_vm3, %v2831_v59, %v2835_v46  ;;  %v3136_v6 = vunpack.c.l.b16 %v2826_v15  ;;  %v3012_v7 = vor.u32 %v3011_v0, %v3008_v44  ;;  %v2616_v56 = vsel %vm374_vm0, %v5810_v55, 0  ;;  %v5217_v55 = vld [vmem:[%s6248_s14 + $0x74] sm:$0x1]  ;;  %v5239_v48 = vld [vmem:[%s6248_s14 + $0xcc] sm:$0xe] }
 0x14e   : > { %v3137_v10 = vunpack.c.l.b16 %v2836_v52  ;;  %v3022_v12 = vor.u32 %v3021_v2, %v3017_v1  ;;  %v2640_v13 = vsel %vm374_vm0, %v5818_v58, 0  ;;  %2666 = vmatpush.bf16.xpose.msrb.mxu0 %v2616_v56  ;;  %v2790_v4 = vshrl.u32 %v5150_v60, 16  ;;  %v5240_v2 = vld [vmem:[%s6248_s14 + $0xd0] sm:$0xf] }
 0x14f   : > { %v3013_v14 = vrot.slane %v3012_v7, 4  ;;  %v2793_v28 = vshll.u32 %v5150_v60, 16  ;;  %v2799_v11 = vshll.u32 %v5151_v5, 16  ;;  %v2803_v17 = vshrl.u32 %v5151_v5, 16 }
 0x150   : > { %v3165_v16 = vpack.c.b16 %v3137_v10, %v3136_v6  ;;  %v3023_v61 = vrot.slane %v3022_v12, 4  ;;  %v2809_v19 = vshll.u32 %v5152_v9, 16  ;;  %v2792_v23 = vrot.slane %v2790_v4, 4 }
 0x151   : > { %2679 = vmatpush.bf16.xpose.msrb.mxu1 %v2640_v13  ;;  %v3018_v20 = vsel %vm6278_vm3, %v3013_v14, %v3017_v1  ;;  %v2795_v24 = vrot.slane %v2793_v28, 5  ;;  %v2801_v25 = vrot.slane %v2799_v11, 5  ;;  %v2805_v30 = vrot.slane %v2803_v17, 4  ;;  %v437_v13 = vpop.f32.mrf.mxu0  ;;  %v450_v14 = vpop.f32.mrf.mxu1 }
 0x152   : > { %v3191_v18 = vsel %vm374_vm0, %v3165_v16, 0  ;;  %v3028_v21 = vsel %vm6278_vm3, %v3023_v61, %v3027_v8  ;;  %v3152_v29 = vunpack.c.l.b16 %v3018_v20  ;;  %v2811_v22 = vrot.slane %v2809_v19, 5  ;;  %v5241_v8 = vld [vmem:[%s6248_s14 + $0xd4] sm:$0x1]  ;;  %v5147_v61 = vld [vmem:[%s6248_s14 + $0x24] sm:$0xf] }
 0x153   : > { %3233 = vmatpush.bf16.xpose.msrb.mxu2 %v3191_v18  ;;  %v3153_v3 = vunpack.c.l.b16 %v3028_v21  ;;  %v2796_v34 = vor.u32 %v2795_v24, %v2792_v23  ;;  %v2982_v35 = vshrl.u32 %v5174_v45, 16  ;;  %v2806_v36 = vor.u32 %v2805_v30, %v2801_v25  ;;  %v5148_v23 = vld [vmem:[%s6248_s14 + $0x28] sm:$0xf]  ;;  %v2528_v24 = vpop.permute.xlu2 %2527 }
 0x154   : > { %v2985_v37 = vshll.u32 %v5174_v45, 16  ;;  %v2991_v38 = vshll.u32 %v5175_v26, 16  ;;  %v2995_v57 = vshrl.u32 %v5175_v26, 16  ;;  %v3001_v46 = vshll.u32 %v5176_v31, 16 }
 0x155   : > { %v3173_v40 = vpack.c.b16 %v3153_v3, %v3152_v29  ;;  %v2797_v41 = vrot.slane %v2796_v34, 4  ;;  %v2984_v43 = vrot.slane %v2982_v35, 4  ;;  %v2807_v50 = vrot.slane %v2806_v36, 4  ;;  %v5149_v35 = vld [vmem:[%s6248_s14 + $0x2c] sm:$0x1] }
 0x156   : > { %v2987_v51 = vrot.slane %v2985_v37, 5  ;;  %v2993_v53 = vrot.slane %v2991_v38, 5  ;;  %v2997_v54 = vrot.slane %v2995_v57, 4  ;;  %v3003_v44 = vrot.slane %v3001_v46, 5  ;;  %v5171_v37 = vld [vmem:[%s6248_s14 + $0x84] sm:$0xf] }
 0x157   : > { %v3215_v58 = vsel %vm374_vm0, %v3173_v40, 0  ;;  %v2802_v59 = vsel %vm6278_vm3, %v2797_v41, %v2801_v25  ;;  %v2613_v0 = vsel %vm374_vm0, %v5809_v62, 0  ;;  %v2812_v60 = vsel %vm6278_vm3, %v2807_v50, %v2811_v22  ;;  %v5172_v41 = vld [vmem:[%s6248_s14 + $0x88] sm:$0xf] }
 0x158   : > { %3246 = vmatpush.bf16.xpose.msrb.mxu3 %v3215_v58  ;;  %v3134_v27 = vunpack.c.l.b16 %v2802_v59  ;;  %v2988_v15 = vor.u32 %v2987_v51, %v2984_v43  ;;  %v2998_v1 = vor.u32 %v2997_v54, %v2993_v53  ;;  %2667 = vmatpush.bf16.xpose.msrb.mxu0 %v2613_v0  ;;  %v3135_v5 = vunpack.c.l.b16 %v2812_v60  ;;  %v5173_v54 = vld [vmem:[%s6248_s14 + $0x8c] sm:$0x1]  ;;  %v5213_v60 = vld [vmem:[%s6248_s14 + $0x64] sm:$0xf] }
 0x159   : > { %v2637_v52 = vsel %vm374_vm0, %v5817_v47, 0  ;;  %v5249_v6 = vrot.slane %v5215_v49, 9  ;;  %v3409_v7 = vrot.slane %v5216_v39, 5  ;;  %v3412_v12 = vrot.slane %v5217_v55, 5 }
 0x15a   : > { %v2989_v9 = vrot.slane %v2988_v15, 4  ;;  %v2999_v10 = vrot.slane %v2998_v1, 4  ;;  %2680 = vmatpush.bf16.xpose.msrb.mxu1 %v2637_v52  ;;  %v5257_v56 = vrot.slane %v5239_v48, 9  ;;  %v3164_v4 = vpack.c.b16 %v3135_v5, %v3134_v27  ;;  %v5212_v48 = vld [vmem:[%s6248_s14 + $0x60] sm:$0xe] }
 0x15b   : > { %v3410_v28 = vsel %vm6392_vm6, %v5249_v6, %v3409_v7  ;;  %v3411_v11 = vrot.slane %v3409_v7, 4  ;;  %v3465_v16 = vrot.slane %v5240_v2, 5  ;;  %v3468_v20 = vrot.slane %v5241_v8, 5  ;;  %v5214_v5 = vld [vmem:[%s6248_s14 + $0x68] sm:$0x1] }
 0x15c   : > { %v2994_v17 = vsel %vm6278_vm3, %v2989_v9, %v2993_v53  ;;  %v3004_v19 = vsel %vm6278_vm3, %v2999_v10, %v3003_v44  ;;  %v3489_v45 = vunpack.c.l.b16 %v3410_v28  ;;  %v3188_v25 = vsel %vm374_vm0, %v3164_v4, 0 }
 0x15d   : > { %v3150_v26 = vunpack.c.l.b16 %v2994_v17  ;;  %v3151_v18 = vunpack.c.l.b16 %v3004_v19  ;;  %v3413_v21 = vsel %vm6392_vm6, %v3411_v11, %v3412_v12  ;;  %3234 = vmatpush.bf16.xpose.msrb.mxu2 %v3188_v25  ;;  %v3466_v30 = vsel %vm6392_vm6, %v5257_v56, %v3465_v16  ;;  %v5236_v11 = vld [vmem:[%s6248_s14 + $0xc0] sm:$0xe] }
 0x15e   : > { %v3490_v29 = vunpack.c.l.b16 %v3413_v21  ;;  %v3467_v31 = vrot.slane %v3465_v16, 4  ;;  %v2766_v3 = vshrl.u32 %v5147_v61, 16  ;;  %v3505_v22 = vunpack.c.l.b16 %v3466_v30  ;;  %v5237_v16 = vld [vmem:[%s6248_s14 + $0xc4] sm:$0xf]  ;;  %v7094_v30 = vpop.f32.mrf.mxu1 }
 0x15f   : > { %v3172_v34 = vpack.c.b16 %v3151_v18, %v3150_v26  ;;  %v2769_v62 = vshll.u32 %v5147_v61, 16  ;;  %v2775_v36 = vshll.u32 %v5148_v23, 16  ;;  %5142 = vmatmul.msk.bf16.vlgmr.msrb.gmra.mxu0 %vm374_vm0, %v2528_v24  ;;  %v2779_v40 = vshrl.u32 %v5148_v23, 16  ;;  %v7086_v23 = vpop.f32.mrf.mxu2 }
 0x160   : > { %v3514_v38 = vpack.c.b16 %v3490_v29, %v3489_v45  ;;  %v3469_v57 = vsel %vm6392_vm6, %v3467_v31, %v3468_v20  ;;  %v2768_v39 = vrot.slane %v2766_v3, 4  ;;  %v2785_v53 = vshll.u32 %v5149_v35, 16  ;;  %v5238_v20 = vld [vmem:[%s6248_s14 + $0xc8] sm:$0x1]  ;;  %v7092_v29 = vpop.f32.mrf.mxu0 }
 0x161   : > { %v3212_v43 = vsel %vm374_vm0, %v3172_v34, 0  ;;  %v3506_v46 = vunpack.c.l.b16 %v3469_v57  ;;  %v2771_v47 = vrot.slane %v2769_v62, 5  ;;  %v2777_v49 = vrot.slane %v2775_v36, 5  ;;  %5143 = vmatmul.msk.bf16.vlgmr.msrb.gmra.mxu1 %vm374_vm0, %v2528_v24  ;;  %v7088_v24 = vpop.f32.mrf.mxu3  ;;  %v5145_v57 = vld [vmem:[%s6248_s14 + $0x1c] sm:$0xf] }
 0x162   : > { %3247 = vmatpush.bf16.xpose.msrb.mxu3 %v3212_v43  ;;  %v3548_v50 = vsel %vm374_vm0, %v3514_v38, 0  ;;  %v2781_v51 = vrot.slane %v2779_v40, 4  ;;  %v2958_v55 = vshrl.u32 %v5171_v37, 16  ;;  %v2961_v44 = vshll.u32 %v5171_v37, 16  ;;  %v5144_v38 = vld [vmem:[%s6248_s14 + $0x18] sm:$0xf] }
 0x163   : > { %3574 = vmatpush.bf16.xpose.msra.mxu0 %v3548_v50  ;;  %v3522_v58 = vpack.c.b16 %v3506_v46, %v3505_v22  ;;  %v2772_v59 = vor.u32 %v2771_v47, %v2768_v39  ;;  %v2967_v0 = vshll.u32 %v5172_v41, 16  ;;  %v2787_v15 = vrot.slane %v2785_v53, 5  ;;  %v5146_v46 = vld [vmem:[%s6248_s14 + $0x20] sm:$0x1] }
 0x164   : > { %v2782_v27 = vor.u32 %v2781_v51, %v2777_v49  ;;  %v2960_v1 = vrot.slane %v2958_v55, 4  ;;  %v2971_v2 = vshrl.u32 %v5172_v41, 16  ;;  %v2963_v7 = vrot.slane %v2961_v44, 5 }
 0x165   : > { %v3572_v52 = vsel %vm374_vm0, %v3522_v58, 0  ;;  %v2773_v6 = vrot.slane %v2772_v59, 4  ;;  %v2969_v8 = vrot.slane %v2967_v0, 5  ;;  %v2977_v12 = vshll.u32 %v5173_v54, 16 }
 0x166   : > { %3587 = vmatpush.bf16.xpose.msra.mxu1 %v3572_v52  ;;  %v2783_v9 = vrot.slane %v2782_v27, 4  ;;  %v2973_v10 = vrot.slane %v2971_v2, 4  ;;  %v5248_v56 = vrot.slane %v5212_v48, 9  ;;  %v2964_v14 = vor.u32 %v2963_v7, %v2960_v1  ;;  %v5169_v27 = vld [vmem:[%s6248_s14 + $0x7c] sm:$0xf] }
 0x167   : > { %v2778_v13 = vsel %vm6278_vm3, %v2773_v6, %v2777_v49  ;;  %v3402_v4 = vrot.slane %v5213_v60, 5  ;;  %v3405_v28 = vrot.slane %v5214_v5, 5  ;;  %v2979_v45 = vrot.slane %v2977_v12, 5  ;;  %v5168_v60 = vld [vmem:[%s6248_s14 + $0x78] sm:$0xf]  ;;  %v1005_v6 = vpop.f32.mrf.mxu2 }
 0x168   : > { %v2788_v61 = vsel %vm6278_vm3, %v2783_v9, %v2787_v15  ;;  %v3132_v17 = vunpack.c.l.b16 %v2778_v13  ;;  %v2974_v19 = vor.u32 %v2973_v10, %v2969_v8  ;;  %v2965_v26 = vrot.slane %v2964_v14, 4  ;;  %v5170_v52 = vld [vmem:[%s6248_s14 + $0x80] sm:$0x1]  ;;  %v1366_v13 = vpop.f32.mrf.mxu1 }
 0x169   : > { %v3133_v25 = vunpack.c.l.b16 %v2788_v61  ;;  %v3403_v18 = vsel %vm6392_vm6, %v5248_v56, %v3402_v4  ;;  %v3404_v21 = vrot.slane %v3402_v4, 4  ;;  %v5256_v34 = vrot.slane %v5236_v11, 9  ;;  %v1018_v7 = vpop.f32.mrf.mxu3  ;;  %v1353_v56 = vpop.f32.mrf.mxu0 }
 0x16a   : > { %v2975_v31 = vrot.slane %v2974_v19, 4  ;;  %v3487_v3 = vunpack.c.l.b16 %v3403_v18  ;;  %v3458_v22 = vrot.slane %v5237_v16, 5  ;;  %v2970_v62 = vsel %vm6278_vm3, %v2965_v26, %v2969_v8  ;;  %v5210_v16 = vld [vmem:[%s6248_s14 + $0x58] sm:$0xf]  ;;  %v5207_v7 = vld [vmem:[%s6248_s14 + $0x4c] sm:$0xf] }
 0x16b   : > { %v3163_v35 = vpack.c.b16 %v3133_v25, %v3132_v17  ;;  %v3406_v36 = vsel %vm6392_vm6, %v3404_v21, %v3405_v28  ;;  %v3461_v37 = vrot.slane %v5238_v20, 5  ;;  %v3148_v40 = vunpack.c.l.b16 %v2970_v62  ;;  %v5209_v20 = vld [vmem:[%s6248_s14 + $0x54] sm:$0xe] }
 0x16c   : > { %v2980_v39 = vsel %vm6278_vm3, %v2975_v31, %v2979_v45  ;;  %v3488_v41 = vunpack.c.l.b16 %v3406_v36  ;;  %v3459_v43 = vsel %vm6392_vm6, %v5256_v34, %v3458_v22  ;;  %v3460_v50 = vrot.slane %v3458_v22, 4  ;;  %v5211_v31 = vld [vmem:[%s6248_s14 + $0x5c] sm:$0x1] }
 0x16d   : > { %v3185_v47 = vsel %vm374_vm0, %v3163_v35, 0  ;;  %v3149_v49 = vunpack.c.l.b16 %v2980_v39  ;;  %v3503_v51 = vunpack.c.l.b16 %v3459_v43  ;;  %v2742_v54 = vshrl.u32 %v5144_v38, 16  ;;  %v5234_v39 = vld [vmem:[%s6248_s14 + $0xb8] sm:$0xf] }
 0x16e   : > { %3235 = vmatpush.bf16.xpose.msrb.mxu2 %v3185_v47  ;;  %v3513_v53 = vpack.c.b16 %v3488_v41, %v3487_v3  ;;  %v2745_v55 = vshll.u32 %v5144_v38, 16  ;;  %v2751_v58 = vshll.u32 %v5145_v57, 16  ;;  %v3462_v44 = vsel %vm6392_vm6, %v3460_v50, %v3461_v37  ;;  %v5235_v47 = vld [vmem:[%s6248_s14 + $0xbc] sm:$0x1] }
 0x16f   : > { %v3171_v59 = vpack.c.b16 %v3149_v49, %v3148_v40  ;;  %v2755_v0 = vshrl.u32 %v5145_v57, 16  ;;  %v2761_v48 = vshll.u32 %v5146_v46, 16  ;;  %v3504_v1 = vunpack.c.l.b16 %v3462_v44  ;;  %v5233_v57 = vld [vmem:[%s6248_s14 + $0xb4] sm:$0xe] }
 0x170   : > { %v3545_v15 = vsel %vm374_vm0, %v3513_v53, 0  ;;  %v2744_v2 = vrot.slane %v2742_v54, 4  ;;  %v2747_v5 = vrot.slane %v2745_v55, 5  ;;  %v2753_v9 = vrot.slane %v2751_v58, 5  ;;  %v7128_v54 = vpop.f32.mrf.mxu2 }
 0x171   : > { %v3209_v8 = vsel %vm374_vm0, %v3171_v59, 0  ;;  %3575 = vmatpush.bf16.xpose.msra.mxu0 %v3545_v15  ;;  %v2757_v10 = vrot.slane %v2755_v0, 4  ;;  %v2763_v12 = vrot.slane %v2761_v48, 5  ;;  %v3521_v14 = vpack.c.b16 %v3504_v1, %v3503_v51  ;;  %v7130_v55 = vpop.f32.mrf.mxu3  ;;  %v5206_v1 = vld [vmem:[%s6248_s14 + $0x48] sm:$0xe] }
 0x172   : > { %3248 = vmatpush.bf16.xpose.msrb.mxu3 %v3209_v8  ;;  %v2748_v4 = vor.u32 %v2747_v5, %v2744_v2  ;;  %v2934_v28 = vshrl.u32 %v5168_v60, 16  ;;  %v2937_v11 = vshll.u32 %v5168_v60, 16  ;;  %v2943_v17 = vshll.u32 %v5169_v27, 16  ;;  %v5208_v8 = vld [vmem:[%s6248_s14 + $0x50] sm:$0x1] }
 0x173   : > { %v2758_v61 = vor.u32 %v2757_v10, %v2753_v9  ;;  %v2947_v19 = vshrl.u32 %v5169_v27, 16  ;;  %v2953_v45 = vshll.u32 %v5170_v52, 16  ;;  %v3569_v25 = vsel %vm374_vm0, %v3521_v14, 0 }
 0x174   : > { %v2749_v26 = vrot.slane %v2748_v4, 4  ;;  %v2936_v18 = vrot.slane %v2934_v28, 4  ;;  %v2939_v21 = vrot.slane %v2937_v11, 5  ;;  %3588 = vmatpush.bf16.xpose.msra.mxu1 %v3569_v25  ;;  %v2945_v34 = vrot.slane %v2943_v17, 5  ;;  %v5230_v28 = vld [vmem:[%s6248_s14 + $0xa8] sm:$0xe] }
 0x175   : > { %v2759_v3 = vrot.slane %v2758_v61, 4  ;;  %v2949_v22 = vrot.slane %v2947_v19, 4  ;;  %v2955_v35 = vrot.slane %v2953_v45, 5  ;;  %v5247_v37 = vrot.slane %v5209_v20, 9  ;;  %v5231_v11 = vld [vmem:[%s6248_s14 + $0xac] sm:$0xf] }
 0x176   : > { %v2754_v62 = vsel %vm6278_vm3, %v2749_v26, %v2753_v9  ;;  %v2940_v36 = vor.u32 %v2939_v21, %v2936_v18  ;;  %v3395_v38 = vrot.slane %v5210_v16, 5  ;;  %v3398_v46 = vrot.slane %v5211_v31, 5  ;;  %v5232_v45 = vld [vmem:[%s6248_s14 + $0xb0] sm:$0x1]  ;;  %v5204_v20 = vld [vmem:[%s6248_s14 + $0x40] sm:$0xf] }
 0x177   : > { %v2764_v40 = vsel %vm6278_vm3, %v2759_v3, %v2763_v12  ;;  %v3130_v41 = vunpack.c.l.b16 %v2754_v62  ;;  %v2950_v43 = vor.u32 %v2949_v22, %v2945_v34  ;;  %v5255_v44 = vrot.slane %v5233_v57, 9 }
 0x178   : > { %v3131_v49 = vunpack.c.l.b16 %v2764_v40  ;;  %v2941_v50 = vrot.slane %v2940_v36, 4  ;;  %v3396_v51 = vsel %vm6392_vm6, %v5247_v37, %v3395_v38  ;;  %v3397_v53 = vrot.slane %v3395_v38, 4  ;;  %v5227_v37 = vld [vmem:[%s6248_s14 + $0x9c] sm:$0xe] }
 0x179   : > { %v2951_v58 = vrot.slane %v2950_v43, 4  ;;  %v3485_v59 = vunpack.c.l.b16 %v3396_v51  ;;  %v3451_v0 = vrot.slane %v5234_v39, 5  ;;  %v3454_v15 = vrot.slane %v5235_v47, 5  ;;  %v1568_v22 = vpop.f32.mrf.mxu3 }
 0x17a   : > { %v3162_v48 = vpack.c.b16 %v3131_v49, %v3130_v41  ;;  %v2946_v60 = vsel %vm6278_vm3, %v2941_v50, %v2945_v34  ;;  %v3399_v27 = vsel %vm6392_vm6, %v3397_v53, %v3398_v46  ;;  %v1022_v42 = vadd.f32 %v7086_v23, %v7033_v32  ;;  %v1555_v34 = vpop.f32.mrf.mxu2  ;;  %v5228_v41 = vld [vmem:[%s6248_s14 + $0xa0] sm:$0xf]  ;;  %v5229_v50 = vld [vmem:[%s6248_s14 + $0xa4] sm:$0x1] }
 0x17b   : > { %v2956_v2 = vsel %vm6278_vm3, %v2951_v58, %v2955_v35  ;;  %v3146_v5 = vunpack.c.l.b16 %v2946_v60  ;;  %v3486_v52 = vunpack.c.l.b16 %v3399_v27  ;;  %v3452_v6 = vsel %vm6392_vm6, %v5255_v44, %v3451_v0  ;;  %v3129_v35 = vpop.permute.xlu0 %3128  ;;  %v5200_v27 = vld [vmem:[%s6248_s14 + $0x30] sm:$0xe] }
 0x17c   : > { %v3182_v9 = vsel %vm374_vm0, %v3162_v48, 0  ;;  %v3147_v10 = vunpack.c.l.b16 %v2956_v2  ;;  %v3453_v12 = vrot.slane %v3451_v0, 4  ;;  %v3501_v56 = vunpack.c.l.b16 %v3452_v6  ;;  %v5202_v6 = vld [vmem:[%s6248_s14 + $0x38] sm:$0x1] }
 0x17d   : > { %3236 = vmatpush.bf16.xpose.msrb.mxu2 %v3182_v9  ;;  %v3512_v13 = vpack.c.b16 %v3486_v52, %v3485_v59  ;;  %v1023_v14 = vadd.f32 %v7088_v24, %v7035_v33  ;;  %v5246_v4 = vrot.slane %v5206_v1, 9  ;;  %v3388_v17 = vrot.slane %v5207_v7, 5  ;;  %v5203_v33 = vld [vmem:[%s6248_s14 + $0x3c] sm:$0xe]  ;;  %v5205_v24 = vld [vmem:[%s6248_s14 + $0x44] sm:$0x1] }
 0x17e   : > { %v3170_v16 = vpack.c.b16 %v3147_v10, %v3146_v5  ;;  %v3455_v61 = vsel %vm6392_vm6, %v3453_v12, %v3454_v15  ;;  %v3391_v19 = vrot.slane %v5208_v8, 5  ;;  %v1370_v32 = vadd.f32 %v7092_v29, %v1022_v42  ;;  %v5201_v52 = vld [vmem:[%s6248_s14 + $0x34] sm:$0xf]  ;;  %v5224_v12 = vld [vmem:[%s6248_s14 + $0x90] sm:$0xe] }
 0x17f   : > { %v3542_v25 = vsel %vm374_vm0, %v3512_v13, 0  ;;  %v3502_v26 = vunpack.c.l.b16 %v3455_v61  ;;  %v1371_v23 = vadd.f32 %v7094_v30, %v1023_v14  ;;  %v3389_v21 = vsel %vm6392_vm6, %v5246_v4, %v3388_v17  ;;  %v5226_v4 = vld [vmem:[%s6248_s14 + $0x98] sm:$0x1] }
 0x180   : > { %v3206_v18 = vsel %vm374_vm0, %v3170_v16, 0  ;;  %3576 = vmatpush.bf16.xpose.msra.mxu0 %v3542_v25  ;;  %v3390_v31 = vrot.slane %v3388_v17, 4  ;;  %v5254_v3 = vrot.slane %v5230_v28, 9  ;;  %v3483_v62 = vunpack.c.l.b16 %v3389_v21  ;;  %v5198_v17 = vld [vmem:[%s6248_s14 + $0x28] sm:$0xf] }
 0x181   : > { %3249 = vmatpush.bf16.xpose.msrb.mxu3 %v3206_v18  ;;  %v3520_v29 = vpack.c.b16 %v3502_v26, %v3501_v56  ;;  %v3444_v30 = vrot.slane %v5231_v11, 5  ;;  %v3447_v36 = vrot.slane %v5232_v45, 5  ;;  %v5245_v57 = vrot.slane %v5203_v33, 9  ;;  %v5225_v56 = vld [vmem:[%s6248_s14 + $0x94] sm:$0xf] }
 0x182   : > { %v3392_v38 = vsel %vm6392_vm6, %v3390_v31, %v3391_v19  ;;  %v3381_v39 = vrot.slane %v5204_v20, 5  ;;  %v3384_v40 = vrot.slane %v5205_v24, 5  ;;  %v5253_v59 = vrot.slane %v5227_v37, 9  ;;  %v5197_v26 = vld [vmem:[%s6248_s14 + $0x24] sm:$0xe] }
 0x183   : > { %v3566_v43 = vsel %vm374_vm0, %v3520_v29, 0  ;;  %v3484_v46 = vunpack.c.l.b16 %v3392_v38  ;;  %v3445_v47 = vsel %vm6392_vm6, %v5254_v3, %v3444_v30  ;;  %v3446_v49 = vrot.slane %v3444_v30, 4  ;;  %v5199_v33 = vld [vmem:[%s6248_s14 + $0x2c] sm:$0x1]  ;;  %v5222_v29 = vld [vmem:[%s6248_s14 + $0x88] sm:$0xf] }
 0x184   : > { %3589 = vmatpush.bf16.xpose.msra.mxu1 %v3566_v43  ;;  %5192 = vmatmul.msk.bf16.vlgmr.msrb.gmra.mxu2 %vm374_vm0, %v3129_v35  ;;  %v3499_v51 = vunpack.c.l.b16 %v3445_v47  ;;  %v3382_v53 = vsel %vm6392_vm6, %v5245_v57, %v3381_v39  ;;  %v3383_v58 = vrot.slane %v3381_v39, 4  ;;  %v3437_v60 = vrot.slane %v5228_v41, 5  ;;  %v5221_v37 = vld [vmem:[%s6248_s14 + $0x84] sm:$0xe]  ;;  %v5195_v38 = vld [vmem:[%s6248_s14 + $0x1c] sm:$0xf] }
 0x185   : > { %v3511_v44 = vpack.c.b16 %v3484_v46, %v3483_v62  ;;  %v3448_v0 = vsel %vm6392_vm6, %v3446_v49, %v3447_v36  ;;  %v3481_v48 = vunpack.c.l.b16 %v3382_v53  ;;  %v3440_v2 = vrot.slane %v5229_v50, 5  ;;  %v5223_v39 = vld [vmem:[%s6248_s14 + $0x8c] sm:$0x1] }
 0x186   : > { %v3500_v15 = vunpack.c.l.b16 %v3448_v0  ;;  %v3385_v1 = vsel %vm6392_vm6, %v3383_v58, %v3384_v40  ;;  %v7179_v5 = vadd.f32 %v7128_v54, %v1370_v32  ;;  %v3438_v9 = vsel %vm6392_vm6, %v5253_v59, %v3437_v60  ;;  %v5196_v0 = vld [vmem:[%s6248_s14 + $0x20] sm:$0x1] }
 0x187   : > { %v3539_v7 = vsel %vm374_vm0, %v3511_v44, 0  ;;  %v3482_v8 = vunpack.c.l.b16 %v3385_v1  ;;  %v3439_v10 = vrot.slane %v3437_v60, 4  ;;  %v3497_v42 = vunpack.c.l.b16 %v3438_v9 }
 0x188   : > { %5193 = vmatmul.msk.bf16.vlgmr.msrb.gmra.mxu3 %vm374_vm0, %v3129_v35  ;;  %3577 = vmatpush.bf16.xpose.msra.mxu0 %v3539_v7  ;;  %v3519_v13 = vpack.c.b16 %v3500_v15, %v3499_v51  ;;  %v7190_v54 = vadd.f32 %v7130_v55, %v1371_v23  ;;  %v5244_v14 = vrot.slane %v5200_v27, 9  ;;  %v3374_v16 = vrot.slane %v5201_v52, 5  ;;  %v5194_v51 = vld [vmem:[%s6248_s14 + $0x18] sm:$0xe]  ;;  %v3608_v7 = vld [vmem:[%s7333_s2] sm:$0xff] }
 0x189   : > { %v3510_v28 = vpack.c.b16 %v3482_v8, %v3481_v48  ;;  %v3441_v11 = vsel %vm6392_vm6, %v3439_v10, %v3440_v2  ;;  %v3377_v61 = vrot.slane %v5202_v6, 5  ;;  %v5252_v20 = vrot.slane %v5224_v12, 9  ;;  %v5219_v48 = vld [vmem:[%s6248_s14 + $0x7c] sm:$0xf]  ;;  %v5218_v10 = vld [vmem:[%s6248_s14 + $0x78] sm:$0xe] }
 0x18a   : > { %v3563_v19 = vsel %vm374_vm0, %v3519_v13, 0  ;;  %v3498_v45 = vunpack.c.l.b16 %v3441_v11  ;;  %v3430_v25 = vrot.slane %v5225_v56, 5  ;;  %v3375_v55 = vsel %vm6392_vm6, %v5244_v14, %v3374_v16  ;;  %v5220_v56 = vld [vmem:[%s6248_s14 + $0x80] sm:$0x1]  ;;  %s245_s14 = sand.u32 1, %s6130_s16  }
 0x18b   : > { %v3376_v32 = vrot.slane %v3374_v16, 4  ;;  %v3433_v23 = vrot.slane %v5226_v4, 5  ;;  %v3536_v24 = vsel %vm374_vm0, %v3510_v28, 0  ;;  %v3479_v21 = vunpack.c.l.b16 %v3375_v55  ;;  %s4744_s12 = sshll.u32 %s245_s14, 6  ;;  %s4605_s5 = scalar_lea.sflag [#allocation5], %s245_s14 }
 0x18c   : > { %3590 = vmatpush.bf16.xpose.msra.mxu1 %v3563_v19  ;;  %v3518_v18 = vpack.c.b16 %v3498_v45, %v3497_v42  ;;  %v3432_v31 = vrot.slane %v3430_v25, 4  ;;  %v3431_v34 = vsel %vm6392_vm6, %v5252_v20, %v3430_v25  ;;  %v5243_v22 = vrot.slane %v5197_v26, 9  ;;  %v3474_v63 = vpop.permute.xlu1 %3473  ;;  %s7282_s13 = scalar_lea.vmem [#allocation6], %s4744_s12 }
 0x18d   : > { %v3378_v3 = vsel %vm6392_vm6, %v3376_v32, %v3377_v61  ;;  %v3367_v35 = vrot.slane %v5198_v17, 5  ;;  %v3370_v36 = vrot.slane %v5199_v33, 5  ;;  %v3495_v41 = vunpack.c.l.b16 %v3431_v34  ;;  %s4620_s29 = sshll.u32 %s7282_s13, 4  ;;  %s4621_s29 = int_to_ptr.vmem [resolvable:$true] %s4620_s29 }
 0x18e   : > { %v3480_v62 = vunpack.c.l.b16 %v3378_v3  ;;  %v3434_v30 = vsel %vm6392_vm6, %v3432_v31, %v3433_v23  ;;  %v3560_v40 = vsel %vm374_vm0, %v3518_v18, 0  ;;  %v3423_v46 = vrot.slane %v5222_v29, 5 }
 0x18f   : > { %v3369_v57 = vrot.slane %v3367_v35, 4  ;;  %v3496_v43 = vunpack.c.l.b16 %v3434_v30  ;;  %v3368_v49 = vsel %vm6392_vm6, %v5243_v22, %v3367_v35  ;;  %v5251_v50 = vrot.slane %v5221_v37, 9 }
 0x190   : > { %3578 = vmatpush.bf16.xpose.msra.mxu0 %v3536_v24  ;;  %v3509_v47 = vpack.c.b16 %v3480_v62, %v3479_v21  ;;  %v3360_v53 = vrot.slane %v5195_v38, 5  ;;  %v3425_v59 = vrot.slane %v3423_v46, 4  ;;  %v3426_v44 = vrot.slane %v5223_v39, 5  ;;  %v5486_v39 = vld [vmem:[#allocation3 + $0x1c0] sm:$0xf] }
 0x191   : > { %v3371_v58 = vsel %vm6392_vm6, %v3369_v57, %v3370_v36  ;;  %v3517_v60 = vpack.c.b16 %v3496_v43, %v3495_v41  ;;  %v3477_v27 = vunpack.c.l.b16 %v3368_v49  ;;  %v5242_v15 = vrot.slane %v5194_v51, 9  ;;  %v5742_v41 = vld [vmem:[#allocation3 + $0x3c0] sm:$0xf]  ;;  %v5886_v49 = vld [vmem:[#allocation3 + $0x1e4] sm:$0xf0] }
 0x192   : > { %v3533_v1 = vsel %vm374_vm0, %v3509_v47, 0  ;;  %v3478_v2 = vunpack.c.l.b16 %v3371_v58  ;;  %v3424_v52 = vsel %vm6392_vm6, %v5251_v50, %v3423_v46  ;;  %v3362_v6 = vrot.slane %v3360_v53, 4  ;;  %v5949_v46 = vld [vmem:[#allocation3 + $0x3dc] sm:$0xf0]  ;;  %v5494_v47 = vld [vmem:[#allocation3 + $0x1c8] sm:$0xf] }
 0x193   : > { %v3427_v8 = vsel %vm6392_vm6, %v3425_v59, %v3426_v44  ;;  %v3363_v9 = vrot.slane %v5196_v0, 5  ;;  %v3416_v12 = vrot.slane %v5219_v48, 5  ;;  %v6159_v13 = vmov 0   ;;  %v5950_v58 = vld [vmem:[#allocation3 + $0x3e4] sm:$0xf0] }
 0x194   : > { %3591 = vmatpush.bf16.xpose.msra.mxu1 %v3560_v40  ;;  %6032 = vset.pattern.permute.xlu2 %v6159_v13  ;;  %v3557_v42 = vsel %vm374_vm0, %v3517_v60, 0  ;;  %v3493_v14 = vunpack.c.l.b16 %v3424_v52  ;;  %v3508_v4 = vpack.c.b16 %v3478_v2, %v3477_v27  ;;  %v3494_v28 = vunpack.c.l.b16 %v3427_v8  ;;  %v5885_v40 = vld [vmem:[#allocation3 + $0x1dc] sm:$0xf0]  ;;  %v5878_v2 = vld [vmem:[#allocation3 + $0x1a4] sm:$0xf0] }
 0x195   : > { %6033 = vset.pattern.permute.xlu0 %v6159_v13  ;;  %3611 = vperm.xlu2 %6032, %v3608_v7   ;;  %v3361_v11 = vsel %vm6392_vm6, %v5242_v15, %v3360_v53  ;;  %v5250_v16 = vrot.slane %v5218_v10, 9  ;;  %v3364_v17 = vsel %vm6392_vm6, %v3362_v6, %v3363_v9  ;;  %v3418_v19 = vrot.slane %v3416_v12, 4  ;;  %v5750_v53 = vld [vmem:[#allocation3 + $0x3c8] sm:$0xf]  ;;  %v5454_v59 = vld [vmem:[#allocation3 + $0x180] sm:$0xf] }
 0x196   : > { %v3419_v45 = vrot.slane %v5220_v56, 5  ;;  %v3530_v25 = vsel %vm374_vm0, %v3508_v4, 0  ;;  %v3516_v26 = vpack.c.b16 %v3494_v28, %v3493_v14  ;;  %v3475_v55 = vunpack.c.l.b16 %v3361_v11  ;;  %v5877_v0 = vld [vmem:[#allocation3 + $0x19c] sm:$0xf0]  ;;  %v5718_v52 = vld [vmem:[#allocation3 + $0x388] sm:$0xf] }
 0x197   : > { %v3476_v32 = vunpack.c.l.b16 %v3364_v17  ;;  %v3417_v33 = vsel %vm6392_vm6, %v5250_v16, %v3416_v12  ;;  %v5487_v43 = vor.u32 %v5885_v40, %v5486_v39  ;;  %v5743_v50 = vor.u32 %v5949_v46, %v5742_v41  ;;  %v5710_v48 = vld [vmem:[#allocation3 + $0x380] sm:$0xf]  ;;  %v5942_v7 = vld [vmem:[#allocation3 + $0x3a4] sm:$0xf0] }
 0x198   : > { %3579 = vmatpush.bf16.xpose.msra.mxu0 %v3533_v1  ;;  %v3420_v24 = vsel %vm6392_vm6, %v3418_v19, %v3419_v45  ;;  %v3554_v21 = vsel %vm374_vm0, %v3516_v26, 0  ;;  %v5495_v51 = vor.u32 %v5886_v49, %v5494_v47  ;;  %v5751_v44 = vor.u32 %v5950_v58, %v5750_v53  ;;  %v5941_v60 = vld [vmem:[#allocation3 + $0x39c] sm:$0xf0]  ;;  %v5462_v1 = vld [vmem:[#allocation3 + $0x188] sm:$0xf] }
 0x199   : > { %v2122_v61 = vpop.f32.mrf.mxu0  ;;  %v3507_v31 = vpack.c.b16 %v3476_v32, %v3475_v55  ;;  %v3492_v3 = vunpack.c.l.b16 %v3420_v24  ;;  %4388 = vmatpush.bf16.msra.mxu2 %v5487_v43  ;;  %4401 = vmatpush.bf16.msra.mxu3 %v5743_v50  ;;  %v5455_v27 = vor.u32 %v5877_v0, %v5454_v59  ;;  %v5711_v15 = vor.u32 %v5941_v60, %v5710_v48  ;;  %v5422_v8 = vld [vmem:[#allocation3 + $0x140] sm:$0xf]  ;;  %v5430_v17 = vld [vmem:[#allocation3 + $0x148] sm:$0xf] }
 0x19a   : > { %v2141_v20 = vadd.f32 %v2122_v61, %v7179_v5  ;;  %v3491_v5 = vunpack.c.l.b16 %v3417_v33  ;;  %v5463_v6 = vor.u32 %v5878_v2, %v5462_v1  ;;  %v5869_v9 = vld [vmem:[#allocation3 + $0x15c] sm:$0xf0]  ;;  %v5719_v10 = vor.u32 %v5942_v7, %v5718_v52  ;;  %v5870_v19 = vld [vmem:[#allocation3 + $0x164] sm:$0xf0] }
 0x19b   : > { %v3527_v22 = vsel %vm374_vm0, %v3507_v31, 0  ;;  %v5678_v12 = vld [vmem:[#allocation3 + $0x340] sm:$0xf]  ;;  %v5423_v13 = vor.u32 %v5869_v9, %v5422_v8  ;;  %v5686_v45 = vld [vmem:[#allocation3 + $0x348] sm:$0xf] }
 0x19c   : > { %3592 = vmatpush.bf16.xpose.msra.mxu1 %v3557_v42  ;;  %v3515_v35 = vpack.c.b16 %v3492_v3, %v3491_v5  ;;  %v5933_v56 = vld [vmem:[#allocation3 + $0x35c] sm:$0xf0]  ;;  %v5654_v3 = vld [vmem:[#allocation3 + $0x308] sm:$0xf] }
 0x19d   : > { %v2135_v23 = vpop.f32.mrf.mxu1  ;;  %4389 = vmatpush.bf16.msra.mxu2 %v5455_v27  ;;  %4402 = vmatpush.bf16.msra.mxu3 %v5711_v15  ;;  %v5679_v42 = vor.u32 %v5933_v56, %v5678_v12  ;;  %v5390_v55 = vld [vmem:[#allocation3 + $0x100] sm:$0xf]  ;;  %v5918_v39 = vld [vmem:[#allocation3 + $0x2e4] sm:$0xf0] }
 0x19e   : > { %v2142_v18 = vadd.f32 %v2135_v23, %v7190_v54  ;;  %v3551_v62 = vsel %vm374_vm0, %v3515_v35, 0  ;;  %v5861_v32 = vld [vmem:[#allocation3 + $0x11c] sm:$0xf0]  ;;  %v5334_v49 = vld [vmem:[#allocation3 + $0x88] sm:$0xf] }
 0x19f   : > { %v5646_v23 = vld [vmem:[#allocation3 + $0x300] sm:$0xf]  ;;  %v5391_v33 = vor.u32 %v5861_v32, %v5390_v55  ;;  %v5590_v53 = vld [vmem:[#allocation3 + $0x288] sm:$0xf]  ;;  %v5887_v55 = vld [vmem:[#allocation3 + $0x1ec] sm:$0xf0] }
 0x1a0   : > { %3580 = vmatpush.bf16.xpose.msra.mxu0 %v3530_v25  ;;  %v5934_v25 = vld [vmem:[#allocation3 + $0x364] sm:$0xf0]  ;;  %v5925_v24 = vld [vmem:[#allocation3 + $0x31c] sm:$0xf0] }
 0x1a1   : > { %v2124_v34 = vpop.f32.mrf.mxu0  ;;  %4390 = vmatpush.bf16.msra.mxu2 %v5423_v13  ;;  %4403 = vmatpush.bf16.msra.mxu3 %v5679_v42  ;;  %v5687_v26 = vor.u32 %v5934_v25, %v5686_v45  ;;  %v5647_v31 = vor.u32 %v5925_v24, %v5646_v23  ;;  %v5326_v40 = vld [vmem:[#allocation3 + $0x80] sm:$0xf]  ;;  %v5910_v58 = vld [vmem:[#allocation3 + $0x2a4] sm:$0xf0]  ;;  %v5881_v42 = vld [vmem:[#allocation3 + $0x1c4] sm:$0xf] }
 0x1a2   : > { %v5926_v34 = vld [vmem:[#allocation3 + $0x324] sm:$0xf0]  ;;  %v5845_v41 = vld [vmem:[#allocation3 + $0x9c] sm:$0xf0]  ;;  %v5591_v27 = vor.u32 %v5910_v58, %v5590_v53  ;;  %v5951_v24 = vld [vmem:[#allocation3 + $0x3ec] sm:$0xf0] }
 0x1a3   : > { %v5655_v35 = vor.u32 %v5926_v34, %v5654_v3  ;;  %v5582_v46 = vld [vmem:[#allocation3 + $0x280] sm:$0xf]  ;;  %v5327_v50 = vor.u32 %v5845_v41, %v5326_v40  ;;  %v5302_v1 = vld [vmem:[#allocation3 + $0x48] sm:$0xf]  ;;  %v5929_v40 = vld [vmem:[#allocation3 + $0x344] sm:$0xf] }
 0x1a4   : > { %3593 = vmatpush.bf16.xpose.msra.mxu1 %v3554_v21  ;;  %v5862_v21 = vld [vmem:[#allocation3 + $0x124] sm:$0xf0]  ;;  %v5909_v47 = vld [vmem:[#allocation3 + $0x29c] sm:$0xf0]  ;;  %v5680_v41 = vld [vmem:[#allocation3 + $0x360] sm:$0xf0] }
 0x1a5   : > { %v2137_v29 = vpop.f32.mrf.mxu1  ;;  %4391 = vmatpush.bf16.msra.mxu2 %v5391_v33  ;;  %4404 = vmatpush.bf16.msra.mxu3 %v5647_v31  ;;  %v5583_v59 = vor.u32 %v5909_v47, %v5582_v46  ;;  %v5294_v0 = vld [vmem:[#allocation3 + $0x40] sm:$0xf]  ;;  %v5838_v2 = vld [vmem:[#allocation3 + $0x64] sm:$0xf0]  ;;  %v5758_v33 = vld [vmem:[#allocation3 + $0x3d0] sm:$0xf]  ;;  %v5683_v53 = vor.u32 %v5929_v40, %v5680_v41 }
 0x1a6   : > { %v5853_v29 = vld [vmem:[#allocation3 + $0xdc] sm:$0xf0]  ;;  %v5558_v52 = vld [vmem:[#allocation3 + $0x248] sm:$0xf]  ;;  %v5303_v12 = vor.u32 %v5838_v2, %v5302_v1  ;;  %v5873_v31 = vld [vmem:[#allocation3 + $0x184] sm:$0xf] }
 0x1a7   : > { %v5837_v48 = vld [vmem:[#allocation3 + $0x5c] sm:$0xf0]  ;;  %v5526_v45 = vld [vmem:[#allocation3 + $0x208] sm:$0xf]  ;;  %v5438_v46 = vld [vmem:[#allocation3 + $0x150] sm:$0xf] }
 0x1a8   : > { %3581 = vmatpush.bf16.xpose.msra.mxu0 %v3527_v22  ;;  %v5358_v22 = vld [vmem:[#allocation3 + $0xc0] sm:$0xf]  ;;  %v5295_v7 = vor.u32 %v5837_v48, %v5294_v0  ;;  %v5894_v25 = vld [vmem:[#allocation3 + $0x224] sm:$0xf0]  ;;  %v5871_v47 = vld [vmem:[#allocation3 + $0x16c] sm:$0xf0] }
 0x1a9   : > { %v5550_v60 = vld [vmem:[#allocation3 + $0x240] sm:$0xf]  ;;  %v5527_v3 = vor.u32 %v5894_v25, %v5526_v45  ;;  %v5857_v58 = vld [vmem:[#allocation3 + $0x104] sm:$0xf]  ;;  %v5662_v2 = vld [vmem:[#allocation3 + $0x310] sm:$0xf] }
 0x1aa   : > { %v5901_v15 = vld [vmem:[#allocation3 + $0x25c] sm:$0xf0]  ;;  %v5921_v0 = vld [vmem:[#allocation3 + $0x304] sm:$0xf] }
 0x1ab   : > { %v2467_v30 = vpop.f32.mrf.mxu2  ;;  %v5262_v8 = vld [vmem:[#allocation3] sm:$0xf]  ;;  %v5648_v48 = vld [vmem:[#allocation3 + $0x320] sm:$0xf0] }
 0x1ac   : > { %3594 = vmatpush.bf16.xpose.msra.mxu1 %v3551_v62  ;;  %v2486_v36 = vadd.f32 %v2467_v30, %v2141_v20  ;;  %v5431_v20 = vor.u32 %v5870_v19, %v5430_v17  ;;  %v5614_v62 = vld [vmem:[#allocation3 + $0x2c0] sm:$0xf]  ;;  %v5270_v17 = vld [vmem:[#allocation3 + $0x8] sm:$0xf]  ;;  %v5825_v41 = vld [vmem:[#allocation3 + $0x4] sm:$0xf] }
 0x1ad   : > { %v2480_v54 = vpop.f32.mrf.mxu3  ;;  %v5917_v30 = vld [vmem:[#allocation3 + $0x2dc] sm:$0xf0]  ;;  %v5830_v19 = vld [vmem:[#allocation3 + $0x24] sm:$0xf0] }
 0x1ae   : > { %v2487_v37 = vadd.f32 %v2480_v54, %v2142_v18  ;;  %v5398_v18 = vld [vmem:[#allocation3 + $0x108] sm:$0xf]  ;;  %v5829_v9 = vld [vmem:[#allocation3 + $0x1c] sm:$0xf0] }
 0x1af   : > { %5258 = vmatmul.msk.bf16.vlgmr.msra.gmra.mxu0 %vm374_vm0, %v3474_v63  ;;  %v5399_v5 = vor.u32 %v5862_v21, %v5398_v18  ;;  %v5366_v54 = vld [vmem:[#allocation3 + $0xc8] sm:$0xf]  ;;  %v5518_v56 = vld [vmem:[#allocation3 + $0x200] sm:$0xf]  ;;  %v5271_v21 = vor.u32 %v5830_v19, %v5270_v17 }
 0x1b0   : > { %4440 = vmatpush.bf16.msrb.mxu0 %v5495_v51  ;;  %v5846_v51 = vld [vmem:[#allocation3 + $0xa4] sm:$0xf0]  ;;  %v5893_v13 = vld [vmem:[#allocation3 + $0x21c] sm:$0xf0] }
 0x1b1   : > { %v5519_v32 = vor.u32 %v5893_v13, %v5518_v56  ;;  %v5616_v56 = vld [vmem:[#allocation3 + $0x2e0] sm:$0xf0] }
 0x1b3   : > { %5259 = vmatmul.msk.bf16.vlgmr.msra.gmra.mxu1 %vm374_vm0, %v3474_v63  ;;  %v2469_v38 = vpop.f32.mrf.mxu2  ;;  %v5359_v63 = vor.u32 %v5853_v29, %v5358_v22  ;;  %v5937_v22 = vld [vmem:[#allocation3 + $0x384] sm:$0xf]  ;;  %v5759_v29 = vor.u32 %v5951_v24, %v5758_v33  ;;  %v5342_v24 = vld [vmem:[#allocation3 + $0x90] sm:$0xf] }
 0x1b4   : > { %4453 = vmatpush.bf16.msrb.mxu1 %v5751_v44  ;;  %4441 = vmatpush.bf16.msrb.mxu0 %v5463_v6  ;;  %v5622_v38 = vld [vmem:[#allocation3 + $0x2c8] sm:$0xf]  ;;  %v5335_v44 = vor.u32 %v5846_v51, %v5334_v49  ;;  %v5935_v51 = vld [vmem:[#allocation3 + $0x36c] sm:$0xf0]  ;;  %v5584_v33 = vld [vmem:[#allocation3 + $0x2a0] sm:$0xf0] }
 0x1b5   : > { %v2482_v57 = vpop.f32.mrf.mxu3  ;;  %v5623_v43 = vor.u32 %v5918_v39, %v5622_v38  ;;  %4392 = vmatpush.bf16.msra.mxu2 %v5359_v63  ;;  %v5902_v6 = vld [vmem:[#allocation3 + $0x264] sm:$0xf0]  ;;  %v5865_v38 = vld [vmem:[#allocation3 + $0x144] sm:$0xf] }
 0x1b8   : > { %4454 = vmatpush.bf16.msrb.mxu1 %v5719_v10  ;;  %4442 = vmatpush.bf16.msrb.mxu0 %v5431_v20  ;;  %v5551_v10 = vor.u32 %v5901_v15, %v5550_v60  ;;  %v5263_v20 = vor.u32 %v5829_v9, %v5262_v8  ;;  %v5863_v15 = vld [vmem:[#allocation3 + $0x12c] sm:$0xf0]  ;;  %v5849_v8 = vld [vmem:[#allocation3 + $0xc4] sm:$0xf] }
 0x1b9   : > { %4393 = vmatpush.bf16.msra.mxu2 %v5327_v50  ;;  %v5694_v50 = vld [vmem:[#allocation3 + $0x350] sm:$0xf]  ;;  %v5360_v9 = vld [vmem:[#allocation3 + $0xe0] sm:$0xf0] }
 0x1ba   : > { %v5695_v60 = vor.u32 %v5935_v51, %v5694_v50  ;;  %v5278_v51 = vld [vmem:[#allocation3 + $0x10] sm:$0xf] }
 0x1bc   : > { %4455 = vmatpush.bf16.msrb.mxu1 %v5687_v26  ;;  %4443 = vmatpush.bf16.msrb.mxu0 %v5399_v5  ;;  %v5502_v26 = vld [vmem:[#allocation3 + $0x1d0] sm:$0xf]  ;;  %v5456_v5 = vld [vmem:[#allocation3 + $0x1a0] sm:$0xf0] }
 0x1bd   : > { %4394 = vmatpush.bf16.msra.mxu2 %v5295_v7  ;;  %v5503_v34 = vor.u32 %v5887_v55, %v5502_v26  ;;  %v5459_v63 = vor.u32 %v5873_v31, %v5456_v5  ;;  %v5651_v7 = vor.u32 %v5921_v0, %v5648_v48  ;;  %v5841_v26 = vld [vmem:[#allocation3 + $0x84] sm:$0xf]  ;;  %v5598_v5 = vld [vmem:[#allocation3 + $0x290] sm:$0xf] }
 0x1be   : > { %v5328_v55 = vld [vmem:[#allocation3 + $0xa0] sm:$0xf0] }
 0x1c0   : > { %4456 = vmatpush.bf16.msrb.mxu1 %v5655_v35  ;;  %v5712_v35 = vld [vmem:[#allocation3 + $0x3a0] sm:$0xf0] }
 0x1c1   : > { %4395 = vmatpush.bf16.msra.mxu2 %v5263_v20 }
 0x1c4   : > { %4457 = vmatpush.bf16.msrb.mxu1 %v5623_v43 }
 0x1c8   : > { %4458 = vmatpush.bf16.msrb.mxu1 %v5591_v27  ;;  %v5406_v27 = vld [vmem:[#allocation3 + $0x110] sm:$0xf] }
 0x1dc   : > { %v2669_v14 = vpop.f32.mrf.mxu0 }
 0x1dd   : > { %v7247_v4 = vadd.f32 %v2669_v14, %v2486_v36  ;;  %v5615_v36 = vor.u32 %v5917_v30, %v5614_v62  ;;  %v5559_v14 = vor.u32 %v5902_v6, %v5558_v52  ;;  %v5470_v62 = vld [vmem:[#allocation3 + $0x190] sm:$0xf] }
 0x1de   : > { %v2682_v28 = vpop.f32.mrf.mxu1  ;;  %v5879_v30 = vld [vmem:[#allocation3 + $0x1ac] sm:$0xf0] }
 0x1df   : > { %v7249_v11 = vadd.f32 %v2682_v28, %v2487_v37  ;;  %v5854_v37 = vld [vmem:[#allocation3 + $0xe4] sm:$0xf0]  ;;  %4405 = vmatpush.bf16.msra.mxu3 %v5615_v36  ;;  %v5488_v28 = vld [vmem:[#allocation3 + $0x1e0] sm:$0xf0]  ;;  %4459 = vmatpush.bf16.msrb.mxu1 %v5559_v14  ;;  %v5726_v36 = vld [vmem:[#allocation3 + $0x390] sm:$0xf]  ;;  %v5471_v39 = vor.u32 %v5879_v30, %v5470_v62 }
 0x1e0   : > { %v5367_v57 = vor.u32 %v5854_v37, %v5366_v54  ;;  %v5491_v23 = vor.u32 %v5881_v42, %v5488_v28  ;;  %v5943_v54 = vld [vmem:[#allocation3 + $0x3ac] sm:$0xf0]  ;;  %v5715_v37 = vor.u32 %v5937_v22, %v5712_v35  ;;  %v5363_v28 = vor.u32 %v5849_v8, %v5360_v9  ;;  %v5833_v35 = vld [vmem:[#allocation3 + $0x44] sm:$0xf]  ;;  %v5510_v8 = vld [vmem:[#allocation3 + $0x1d8] sm:$0xf] }
 0x1e1   : > { %v5727_v43 = vor.u32 %v5943_v54, %v5726_v36  ;;  %v5927_v52 = vld [vmem:[#allocation3 + $0x32c] sm:$0xf0]  ;;  %v5897_v62 = vld [vmem:[#allocation3 + $0x244] sm:$0xf]  ;;  %v5888_v9 = vld [vmem:[#allocation3 + $0x1f4] sm:$0xf0] }
 0x1e2   : > { %4444 = vmatpush.bf16.msrb.mxu0 %v5367_v57  ;;  %4414 = vmatpush.bf16.msrb.mxu2 %v5491_v23  ;;  %v5424_v57 = vld [vmem:[#allocation3 + $0x160] sm:$0xf0]  ;;  %v5663_v13 = vor.u32 %v5927_v52, %v5662_v2  ;;  %v5374_v42 = vld [vmem:[#allocation3 + $0xd0] sm:$0xf]  ;;  %v5331_v23 = vor.u32 %v5841_v26, %v5328_v55 }
 0x1e3   : > { %4406 = vmatpush.bf16.msra.mxu3 %v5583_v59  ;;  %4460 = vmatpush.bf16.msrb.mxu1 %v5527_v3  ;;  %v5427_v49 = vor.u32 %v5865_v38, %v5424_v57  ;;  %v5392_v59 = vld [vmem:[#allocation3 + $0x120] sm:$0xf0]  ;;  %v5855_v14 = vld [vmem:[#allocation3 + $0xec] sm:$0xf0] }
 0x1e4   : > { %v2671_v16 = vpop.f32.mrf.mxu0  ;;  %v5395_v1 = vor.u32 %v5857_v58, %v5392_v59  ;;  %v5375_v45 = vor.u32 %v5855_v14, %v5374_v42  ;;  %v5911_v3 = vld [vmem:[#allocation3 + $0x2ac] sm:$0xf0]  ;;  %v5946_v42 = vld [vmem:[#allocation3 + $0x3cc] sm:$0xf] }
 0x1e5   : > { %v5945_v16 = vld [vmem:[#allocation3 + $0x3c4] sm:$0xf]  ;;  %v5310_v36 = vld [vmem:[#allocation3 + $0x50] sm:$0xf]  ;;  %v5752_v14 = vld [vmem:[#allocation3 + $0x3e8] sm:$0xf0] }
 0x1e6   : > { %v2684_v61 = vpop.f32.mrf.mxu1  ;;  %4445 = vmatpush.bf16.msrb.mxu0 %v5335_v44  ;;  %4415 = vmatpush.bf16.msrb.mxu2 %v5459_v63  ;;  %v5439_v44 = vor.u32 %v5871_v47, %v5438_v46  ;;  %v5552_v63 = vld [vmem:[#allocation3 + $0x260] sm:$0xf0]  ;;  %v5839_v54 = vld [vmem:[#allocation3 + $0x6c] sm:$0xf0]  ;;  %v5755_v26 = vor.u32 %v5946_v42, %v5752_v14  ;;  %v5906_v14 = vld [vmem:[#allocation3 + $0x28c] sm:$0xf] }
 0x1e7   : > { %v5744_v61 = vld [vmem:[#allocation3 + $0x3e0] sm:$0xf0]  ;;  %4407 = vmatpush.bf16.msra.mxu3 %v5551_v10  ;;  %4505 = vmatpush.bf16.msra.mxu1 %v5759_v29  ;;  %v5407_v10 = vor.u32 %v5863_v15, %v5406_v27  ;;  %v5311_v38 = vor.u32 %v5839_v54, %v5310_v36  ;;  %v5566_v57 = vld [vmem:[#allocation3 + $0x250] sm:$0xf] }
 0x1e8   : > { %v5747_v18 = vor.u32 %v5945_v16, %v5744_v61  ;;  %v5630_v16 = vld [vmem:[#allocation3 + $0x2d0] sm:$0xf]  ;;  %v5296_v29 = vld [vmem:[#allocation3 + $0x60] sm:$0xf0] }
 0x1e9   : > { %v5919_v61 = vld [vmem:[#allocation3 + $0x2ec] sm:$0xf0]  ;;  %v5299_v30 = vor.u32 %v5833_v35, %v5296_v29  ;;  %v5889_v46 = vld [vmem:[#allocation3 + $0x204] sm:$0xf]  ;;  %v5872_v35 = vld [vmem:[#allocation3 + $0x174] sm:$0xf0] }
 0x1ea   : > { %4446 = vmatpush.bf16.msrb.mxu0 %v5303_v12  ;;  %4416 = vmatpush.bf16.msrb.mxu2 %v5427_v49  ;;  %v5913_v12 = vld [vmem:[#allocation3 + $0x2c4] sm:$0xf]  ;;  %v5631_v20 = vor.u32 %v5919_v61, %v5630_v16  ;;  %v5534_v58 = vld [vmem:[#allocation3 + $0x210] sm:$0xf]  ;;  %v5952_v61 = vld [vmem:[#allocation3 + $0x3f4] sm:$0xf0] }
 0x1eb   : > { %4408 = vmatpush.bf16.msra.mxu3 %v5519_v32  ;;  %4506 = vmatpush.bf16.msra.mxu1 %v5727_v43  ;;  %v5619_v19 = vor.u32 %v5913_v12, %v5616_v56  ;;  %v5905_v32 = vld [vmem:[#allocation3 + $0x284] sm:$0xf]  ;;  %v5895_v59 = vld [vmem:[#allocation3 + $0x22c] sm:$0xf0] }
 0x1ec   : > { %v5264_v43 = vld [vmem:[#allocation3 + $0x20] sm:$0xf0]  ;;  %v5535_v0 = vor.u32 %v5895_v59, %v5534_v58  ;;  %v5928_v58 = vld [vmem:[#allocation3 + $0x334] sm:$0xf0]  ;;  %v5850_v59 = vld [vmem:[#allocation3 + $0xcc] sm:$0xf] }
 0x1ed   : > { %v5267_v47 = vor.u32 %v5825_v41, %v5264_v43  ;;  %v5520_v49 = vld [vmem:[#allocation3 + $0x220] sm:$0xf0]  ;;  %v5864_v41 = vld [vmem:[#allocation3 + $0x134] sm:$0xf0] }
 0x1ee   : > { %4447 = vmatpush.bf16.msrb.mxu0 %v5271_v21  ;;  %4417 = vmatpush.bf16.msrb.mxu2 %v5395_v1  ;;  %v5587_v21 = vor.u32 %v5905_v32, %v5584_v33  ;;  %v5523_v50 = vor.u32 %v5889_v46, %v5520_v49  ;;  %v5882_v1 = vld [vmem:[#allocation3 + $0x1cc] sm:$0xf] }
 0x1ef   : > { %4427 = vmatpush.bf16.msrb.mxu3 %v5747_v18  ;;  %4507 = vmatpush.bf16.msra.mxu1 %v5695_v60  ;;  %v5847_v18 = vld [vmem:[#allocation3 + $0xac] sm:$0xf0]  ;;  %v3612_v27 = vpop.permute.xlu2 %3611  ;;  %v5938_v32 = vld [vmem:[#allocation3 + $0x38c] sm:$0xf] }
 0x1f0   : > { %v5343_v31 = vor.u32 %v5847_v18, %v5342_v24  ;;  %v5656_v49 = vld [vmem:[#allocation3 + $0x328] sm:$0xf0] }
 0x1f2   : > { %4492 = vmatpush.bf16.msra.mxu0 %v5503_v34  ;;  %4418 = vmatpush.bf16.msrb.mxu2 %v5363_v28  ;;  %v5599_v34 = vor.u32 %v5911_v3, %v5598_v5  ;;  %v5511_v28 = vor.u32 %v5888_v9, %v5510_v8  ;;  %v5866_v5 = vld [vmem:[#allocation3 + $0x14c] sm:$0xf]  ;;  %v5920_v8 = vld [vmem:[#allocation3 + $0x2f4] sm:$0xf0] }
 0x1f3   : > { %4428 = vmatpush.bf16.msrb.mxu3 %v5715_v37  ;;  %4508 = vmatpush.bf16.msra.mxu1 %v5663_v13  ;;  %v5555_v37 = vor.u32 %v5897_v62, %v5552_v63  ;;  %v5688_v63 = vld [vmem:[#allocation3 + $0x368] sm:$0xf0] }
 0x1f4   : > { %v5842_v9 = vld [vmem:[#allocation3 + $0x8c] sm:$0xf] }
 0x1f6   : > { %4493 = vmatpush.bf16.msra.mxu0 %v5471_v39  ;;  %4419 = vmatpush.bf16.msrb.mxu2 %v5331_v23  ;;  %v5903_v39 = vld [vmem:[#allocation3 + $0x26c] sm:$0xf0]  ;;  %v5720_v23 = vld [vmem:[#allocation3 + $0x3a8] sm:$0xf0] }
 0x1f7   : > { %4429 = vmatpush.bf16.msrb.mxu3 %v5683_v53  ;;  %4509 = vmatpush.bf16.msra.mxu1 %v5631_v20  ;;  %v5567_v40 = vor.u32 %v5903_v39, %v5566_v57  ;;  %v5831_v53 = vld [vmem:[#allocation3 + $0x2c] sm:$0xf0]  ;;  %v5464_v20 = vld [vmem:[#allocation3 + $0x1a8] sm:$0xf0]  ;;  %v5723_v29 = vor.u32 %v5938_v32, %v5720_v23 }
 0x1f8   : > { %v5858_v57 = vld [vmem:[#allocation3 + $0x10c] sm:$0xf] }
 0x1f9   : > { %v5400_v39 = vld [vmem:[#allocation3 + $0x128] sm:$0xf0] }
 0x1fa   : > { %4494 = vmatpush.bf16.msra.mxu0 %v5439_v44  ;;  %4420 = vmatpush.bf16.msrb.mxu2 %v5299_v30  ;;  %v5279_v44 = vor.u32 %v5831_v53, %v5278_v51  ;;  %v5930_v30 = vld [vmem:[#allocation3 + $0x34c] sm:$0xf]  ;;  %v5670_v53 = vld [vmem:[#allocation3 + $0x318] sm:$0xf] }
 0x1fb   : > { %4430 = vmatpush.bf16.msrb.mxu3 %v5651_v7  ;;  %4510 = vmatpush.bf16.msra.mxu1 %v5599_v34  ;;  %v5496_v7 = vld [vmem:[#allocation3 + $0x1e8] sm:$0xf0]  ;;  %v5691_v43 = vor.u32 %v5930_v30, %v5688_v63 }
 0x1fc   : > { %v5499_v13 = vor.u32 %v5882_v1, %v5496_v7  ;;  %v5432_v34 = vld [vmem:[#allocation3 + $0x168] sm:$0xf0]  ;;  %v5638_v7 = vld [vmem:[#allocation3 + $0x2d8] sm:$0xf] }
 0x1fd   : > { %v5435_v36 = vor.u32 %v5866_v5, %v5432_v34  ;;  %v5624_v1 = vld [vmem:[#allocation3 + $0x2e8] sm:$0xf0]  ;;  %v5639_v42 = vor.u32 %v5920_v8, %v5638_v7  ;;  %v5832_v34 = vld [vmem:[#allocation3 + $0x34] sm:$0xf0]  ;;  %v5664_v7 = vld [vmem:[#allocation3 + $0x330] sm:$0xf0] }
 0x1fe   : > { %4495 = vmatpush.bf16.msra.mxu0 %v5407_v10  ;;  %4421 = vmatpush.bf16.msrb.mxu2 %v5267_v47  ;;  %v5922_v47 = vld [vmem:[#allocation3 + $0x30c] sm:$0xf]  ;;  %v5851_v8 = vld [vmem:[#allocation3 + $0xd4] sm:$0xf] }
 0x1ff   : > { %4431 = vmatpush.bf16.msrb.mxu3 %v5619_v19  ;;  %4511 = vmatpush.bf16.msra.mxu1 %v5567_v40  ;;  %v5874_v19 = vld [vmem:[#allocation3 + $0x18c] sm:$0xf]  ;;  %v5414_v40 = vld [vmem:[#allocation3 + $0x118] sm:$0xf] }
 0x200   : > { %v5467_v24 = vor.u32 %v5874_v19, %v5464_v20  ;;  %v5415_v51 = vor.u32 %v5864_v41, %v5414_v40  ;;  %v5912_v19 = vld [vmem:[#allocation3 + $0x2b4] sm:$0xf0]  ;;  %v5304_v20 = vld [vmem:[#allocation3 + $0x68] sm:$0xf0]  ;;  %v5760_v40 = vld [vmem:[#allocation3 + $0x3f0] sm:$0xf0] }
 0x201   : > { %v5560_v32 = vld [vmem:[#allocation3 + $0x268] sm:$0xf0]  ;;  %v5875_v41 = vld [vmem:[#allocation3 + $0x194] sm:$0xf] }
 0x202   : > { %4496 = vmatpush.bf16.msra.mxu0 %v5375_v45  ;;  %v5272_v5 = vld [vmem:[#allocation3 + $0x28] sm:$0xf0] }
 0x203   : > { %4432 = vmatpush.bf16.msrb.mxu3 %v5587_v21  ;;  %4512 = vmatpush.bf16.msra.mxu1 %v5535_v0  ;;  %v5734_v21 = vld [vmem:[#allocation3 + $0x398] sm:$0xf]  ;;  %v5890_v30 = vld [vmem:[#allocation3 + $0x20c] sm:$0xf] }
 0x204   : > { %v5382_v0 = vld [vmem:[#allocation3 + $0xd8] sm:$0xf] }
 0x206   : > { %4497 = vmatpush.bf16.msra.mxu0 %v5343_v31  ;;  %v5944_v31 = vld [vmem:[#allocation3 + $0x3b4] sm:$0xf0] }
 0x207   : > { %v7251_v6 = vpop.f32.mrf.mxu2  ;;  %4433 = vmatpush.bf16.msrb.mxu3 %v5555_v37  ;;  %v5735_v62 = vor.u32 %v5944_v31, %v5734_v21  ;;  %v5702_v37 = vld [vmem:[#allocation3 + $0x358] sm:$0xf]  ;;  %v5826_v31 = vld [vmem:[#allocation3 + $0xc] sm:$0xf] }
 0x208   : > { %v3257_v48 = vadd.f32 %v7251_v6, %v7247_v4  ;;  %v5766_v6 = vld [vmem:[#allocation3 + $0x3d8] sm:$0xf]  ;;  %v5275_v63 = vor.u32 %v5826_v31, %v5272_v5  ;;  %v5536_v31 = vld [vmem:[#allocation3 + $0x230] sm:$0xf0] }
 0x209   : > { %v5767_v55 = vor.u32 %v5952_v61, %v5766_v6  ;;  %v5606_v61 = vld [vmem:[#allocation3 + $0x298] sm:$0xf] }
 0x20a   : > { %4498 = vmatpush.bf16.msra.mxu0 %v5311_v38  ;;  %v5936_v38 = vld [vmem:[#allocation3 + $0x374] sm:$0xf0] }
 0x20b   : > { %v7253_v17 = vpop.f32.mrf.mxu3  ;;  %4434 = vmatpush.bf16.msrb.mxu3 %v5523_v50  ;;  %v5703_v46 = vor.u32 %v5936_v38, %v5702_v37  ;;  %v5403_v50 = vor.u32 %v5858_v57, %v5400_v39  ;;  %v5904_v21 = vld [vmem:[#allocation3 + $0x274] sm:$0xf0]  ;;  %v5947_v39 = vld [vmem:[#allocation3 + $0x3d4] sm:$0xf] }
 0x20c   : > { %v3258_v2 = vadd.f32 %v7253_v17, %v7249_v11  ;;  %v5478_v11 = vld [vmem:[#allocation3 + $0x198] sm:$0xf] }
 0x20d   : > { %v5880_v17 = vld [vmem:[#allocation3 + $0x1b4] sm:$0xf0] }
 0x20e   : > { %4499 = vmatpush.bf16.msra.mxu0 %v5279_v44  ;;  %v5479_v18 = vor.u32 %v5880_v17, %v5478_v11  ;;  %v5368_v44 = vld [vmem:[#allocation3 + $0xe8] sm:$0xf0]  ;;  %v5318_v11 = vld [vmem:[#allocation3 + $0x58] sm:$0xf] }
 0x20f   : > { %v3240_v25 = vpop.f32.mrf.mxu2  ;;  %v5840_v17 = vld [vmem:[#allocation3 + $0x74] sm:$0xf0] }
 0x210   : > { %v5542_v37 = vld [vmem:[#allocation3 + $0x218] sm:$0xf] }
 0x211   : > { %v5896_v38 = vld [vmem:[#allocation3 + $0x234] sm:$0xf0] }
 0x213   : > { %v3253_v22 = vpop.f32.mrf.mxu3 }
 0x214   : > { %v5446_v22 = vld [vmem:[#allocation3 + $0x158] sm:$0xf] }
 0x215   : > { %v5447_v54 = vor.u32 %v5872_v35, %v5446_v22  ;;  %v5883_v22 = vld [vmem:[#allocation3 + $0x1d4] sm:$0xf] }
 0x216   : > { %v5504_v35 = vld [vmem:[#allocation3 + $0x1f0] sm:$0xf0] }
 0x217   : > { %v5507_v57 = vor.u32 %v5883_v22, %v5504_v35  ;;  %v5876_v22 = vld [vmem:[#allocation3 + $0x19c] sm:$0xf] }
 0x218   : > { %v5480_v35 = vld [vmem:[#allocation3 + $0x1b8] sm:$0xf0] }
 0x22c   : > { %v3583_v60 = vpop.f32.mrf.mxu0 }
 0x22d   : > { %v3602_v15 = vadd.f32 %v3583_v60, %v3257_v48  ;;  %v5856_v48 = vld [vmem:[#allocation3 + $0xf4] sm:$0xf0]  ;;  %v5659_v60 = vor.u32 %v5922_v47, %v5656_v49  ;;  %v5543_v47 = vor.u32 %v5896_v38, %v5542_v37  ;;  %v5763_v49 = vor.u32 %v5947_v39, %v5760_v40  ;;  %v5448_v37 = vld [vmem:[#allocation3 + $0x178] sm:$0xf0] }
 0x22e   : > { %v5932_v39 = vld [vmem:[#allocation3 + $0x35c] sm:$0xf] }
 0x22f   : > { %v3614_v52 = vadd.f32 %v3612_v27, %v3602_v15  ;;  %v5914_v15 = vld [vmem:[#allocation3 + $0x2cc] sm:$0xf]  ;;  %v5704_v40 = vld [vmem:[#allocation3 + $0x378] sm:$0xf0] }
 0x230   : > { %v3596_v10 = vpop.f32.mrf.mxu1 }
 0x231   : > { %v3603_v12 = vadd.f32 %v3596_v10, %v3258_v2  ;;  %v3616_v56 = vmax.f32 %v3614_v52, 0.0  ;;  %v5371_v2 = vor.u32 %v5850_v59, %v5368_v44  ;;  %v5383_v52 = vor.u32 %v5856_v48, %v5382_v0  ;;  %v5336_v10 = vld [vmem:[#allocation3 + $0xa8] sm:$0xf0]  ;;  %v5440_v59 = vld [vmem:[#allocation3 + $0x170] sm:$0xf0] }
 0x232   : > { %v5931_v48 = vld [vmem:[#allocation3 + $0x354] sm:$0xf] }
 0x233   : > { %v3615_v16 = vadd.f32 %v3612_v27, %v3603_v12  ;;  %v7259_v4 = vpack.c.bf16 %v3616_v56, %v3616_v56  ;;  %v5671_v27 = vor.u32 %v5928_v58, %v5670_v53  ;;  %v5350_v12 = vld [vmem:[#allocation3 + $0x98] sm:$0xf]  ;;  %v5728_v53 = vld [vmem:[#allocation3 + $0x3b0] sm:$0xf0] }
 0x234   : > { %v3585_v45 = vpop.f32.mrf.mxu0  ;;  %v5848_v56 = vld [vmem:[#allocation3 + $0xb4] sm:$0xf0]  ;;  %v5867_v58 = vld [vmem:[#allocation3 + $0x154] sm:$0xf] }
 0x235   : > { %v3617_v25 = vmax.f32 %v3615_v16, 0.0  ;;  %4396 = vmatmul.bf16.vlgmr.msra.gmra.mxu2 %v7259_v4  ;;  %4448 = vmatmul.bf16.vlgmr.msrb.gmra.mxu0 %v7259_v4  ;;  %v5339_v16 = vor.u32 %v5842_v9, %v5336_v10  ;;  %v5351_v6 = vor.u32 %v5848_v56, %v5350_v12  ;;  %v5834_v45 = vld [vmem:[#allocation3 + $0x4c] sm:$0xf]  ;;  %v5443_v0 = vor.u32 %v5867_v58, %v5440_v59  ;;  %v5376_v9 = vld [vmem:[#allocation3 + $0xf0] sm:$0xf0] }
 0x236   : > { %4466 = vmatpush.bf16.msra.mxu2 %v5499_v13  ;;  %4544 = vmatpush.bf16.msrb.mxu0 %v5511_v28  ;;  %v5627_v13 = vor.u32 %v5914_v15, %v5624_v1  ;;  %v5592_v28 = vld [vmem:[#allocation3 + $0x2a8] sm:$0xf0]  ;;  %v5307_v23 = vor.u32 %v5834_v45, %v5304_v20  ;;  %v5408_v15 = vld [vmem:[#allocation3 + $0x130] sm:$0xf0]  ;;  %v5379_v12 = vor.u32 %v5851_v8, %v5376_v9 }
 0x237   : > { %v7263_v33 = vpack.c.bf16 %v3617_v25, %v3617_v25  ;;  %v5595_v25 = vor.u32 %v5906_v14, %v5592_v28  ;;  %v5915_v56 = vld [vmem:[#allocation3 + $0x2d4] sm:$0xf] }
 0x238   : > { %v3598_v3 = vpop.f32.mrf.mxu1  ;;  %v5344_v14 = vld [vmem:[#allocation3 + $0xb0] sm:$0xf0] }
 0x239   : > { %4409 = vmatmul.bf16.vlgmr.msra.gmra.mxu3 %v7263_v33  ;;  %4461 = vmatmul.bf16.vlgmr.msrb.gmra.mxu1 %v7263_v33  ;;  %v5286_v3 = vld [vmem:[#allocation3 + $0x18] sm:$0xf]  ;;  %v5312_v45 = vld [vmem:[#allocation3 + $0x70] sm:$0xf0] }
 0x23a   : > { %4479 = vmatpush.bf16.msra.mxu3 %v5755_v26  ;;  %4557 = vmatpush.bf16.msrb.mxu1 %v5767_v55  ;;  %v5607_v26 = vor.u32 %v5912_v19, %v5606_v61  ;;  %v5898_v55 = vld [vmem:[#allocation3 + $0x24c] sm:$0xf]  ;;  %v5600_v61 = vld [vmem:[#allocation3 + $0x2b0] sm:$0xf0] }
 0x23b   : > { %4467 = vmatpush.bf16.msra.mxu2 %v5467_v24  ;;  %4545 = vmatpush.bf16.msrb.mxu0 %v5479_v18  ;;  %v5319_v24 = vor.u32 %v5840_v17, %v5318_v11  ;;  %v5574_v18 = vld [vmem:[#allocation3 + $0x258] sm:$0xf]  ;;  %v5835_v19 = vld [vmem:[#allocation3 + $0x54] sm:$0xf] }
 0x23c   : > { %v5315_v11 = vor.u32 %v5835_v19, %v5312_v45  ;;  %v5899_v17 = vld [vmem:[#allocation3 + $0x254] sm:$0xf] }
 0x23e   : > { %4480 = vmatpush.bf16.msra.mxu3 %v5723_v29  ;;  %4558 = vmatpush.bf16.msrb.mxu1 %v5735_v62  ;;  %v5563_v29 = vor.u32 %v5898_v55, %v5560_v32  ;;  %v5575_v62 = vor.u32 %v5904_v21, %v5574_v18  ;;  %v5280_v55 = vld [vmem:[#allocation3 + $0x30] sm:$0xf0]  ;;  %v5884_v32 = vld [vmem:[#allocation3 + $0x1dc] sm:$0xf] }
 0x23f   : > { %4468 = vmatpush.bf16.msra.mxu2 %v5435_v36  ;;  %4546 = vmatpush.bf16.msrb.mxu0 %v5447_v54  ;;  %v5528_v36 = vld [vmem:[#allocation3 + $0x228] sm:$0xf0]  ;;  %v5287_v54 = vor.u32 %v5832_v34, %v5286_v3  ;;  %v5891_v21 = vld [vmem:[#allocation3 + $0x214] sm:$0xf]  ;;  %v5948_v3 = vld [vmem:[#allocation3 + $0x3dc] sm:$0xf] }
 0x240   : > { %v5768_v34 = vld [vmem:[#allocation3 + $0x3f8] sm:$0xf0] }
 0x242   : > { %4481 = vmatpush.bf16.msra.mxu3 %v5691_v43  ;;  %4559 = vmatpush.bf16.msrb.mxu1 %v5703_v46  ;;  %v5472_v43 = vld [vmem:[#allocation3 + $0x1b0] sm:$0xf0]  ;;  %v5531_v46 = vor.u32 %v5890_v30, %v5528_v36  ;;  %v5483_v30 = vor.u32 %v5876_v22, %v5480_v35  ;;  %v5736_v36 = vld [vmem:[#allocation3 + $0x3b8] sm:$0xf0] }
 0x243   : > { %4469 = vmatpush.bf16.msra.mxu2 %v5403_v50  ;;  %4547 = vmatpush.bf16.msrb.mxu0 %v5415_v51  ;;  %v5475_v50 = vor.u32 %v5875_v41, %v5472_v43  ;;  %v5939_v51 = vld [vmem:[#allocation3 + $0x394] sm:$0xf]  ;;  %v5860_v41 = vld [vmem:[#allocation3 + $0x11c] sm:$0xf] }
 0x244   : > { %v5731_v44 = vor.u32 %v5939_v51, %v5728_v53  ;;  %v5416_v43 = vld [vmem:[#allocation3 + $0x138] sm:$0xf0] }
 0x245   : > { %4422 = vmatmul.bf16.vlgmr.msrb.gmra.mxu2 %v7259_v4  ;;  %4500 = vmatmul.bf16.vlgmr.msra.gmra.mxu0 %v7259_v4  ;;  %v5852_v51 = vld [vmem:[#allocation3 + $0xdc] sm:$0xf] }
 0x246   : > { %4482 = vmatpush.bf16.msra.mxu3 %v5659_v60  ;;  %4560 = vmatpush.bf16.msrb.mxu1 %v5671_v27  ;;  %v5696_v60 = vld [vmem:[#allocation3 + $0x370] sm:$0xf0]  ;;  %v5384_v53 = vld [vmem:[#allocation3 + $0xf8] sm:$0xf0] }
 0x247   : > { %4470 = vmatpush.bf16.msra.mxu2 %v5371_v2  ;;  %4548 = vmatpush.bf16.msrb.mxu0 %v5383_v52  ;;  %v5859_v27 = vld [vmem:[#allocation3 + $0x114] sm:$0xf]  ;;  %v5699_v1 = vor.u32 %v5931_v48, %v5696_v60  ;;  %v5387_v59 = vor.u32 %v5852_v51, %v5384_v53  ;;  %v5844_v48 = vld [vmem:[#allocation3 + $0x9c] sm:$0xf] }
 0x248   : > { %v5411_v2 = vor.u32 %v5859_v27, %v5408_v15  ;;  %v5923_v52 = vld [vmem:[#allocation3 + $0x314] sm:$0xf]  ;;  %v5352_v60 = vld [vmem:[#allocation3 + $0xb8] sm:$0xf0] }
 0x249   : > { %4435 = vmatmul.bf16.vlgmr.msrb.gmra.mxu3 %v7263_v33  ;;  %4513 = vmatmul.bf16.vlgmr.msra.gmra.mxu1 %v7263_v33  ;;  %v5667_v10 = vor.u32 %v5923_v52, %v5664_v7  ;;  %v5355_v15 = vor.u32 %v5844_v48, %v5352_v60  ;;  %v5836_v52 = vld [vmem:[#allocation3 + $0x5c] sm:$0xf] }
 0x24a   : > { %4483 = vmatpush.bf16.msra.mxu3 %v5627_v13  ;;  %4561 = vmatpush.bf16.msrb.mxu1 %v5639_v42  ;;  %v5632_v13 = vld [vmem:[#allocation3 + $0x2f0] sm:$0xf0]  ;;  %v5320_v7 = vld [vmem:[#allocation3 + $0x78] sm:$0xf0] }
 0x24b   : > { %4471 = vmatpush.bf16.msra.mxu2 %v5339_v16  ;;  %4549 = vmatpush.bf16.msrb.mxu0 %v5351_v6  ;;  %v5843_v42 = vld [vmem:[#allocation3 + $0x94] sm:$0xf]  ;;  %v5635_v28 = vor.u32 %v5915_v56, %v5632_v13  ;;  %v5323_v9 = vor.u32 %v5836_v52, %v5320_v7  ;;  %v5828_v56 = vld [vmem:[#allocation3 + $0x1c] sm:$0xf] }
 0x24c   : > { %v5347_v16 = vor.u32 %v5843_v42, %v5344_v14  ;;  %v5907_v6 = vld [vmem:[#allocation3 + $0x294] sm:$0xf]  ;;  %v5288_v13 = vld [vmem:[#allocation3 + $0x38] sm:$0xf0] }
 0x24d   : > { %v5603_v20 = vor.u32 %v5907_v6, %v5600_v61  ;;  %v5291_v14 = vor.u32 %v5828_v56, %v5288_v13 }
 0x24e   : > { %4484 = vmatpush.bf16.msra.mxu3 %v5595_v25  ;;  %4562 = vmatpush.bf16.msrb.mxu1 %v5607_v26  ;;  %v5568_v25 = vld [vmem:[#allocation3 + $0x270] sm:$0xf0] }
 0x24f   : > { %4472 = vmatpush.bf16.msra.mxu2 %v5307_v23  ;;  %4550 = vmatpush.bf16.msrb.mxu0 %v5319_v24  ;;  %v5827_v26 = vld [vmem:[#allocation3 + $0x14] sm:$0xf]  ;;  %v5512_v23 = vld [vmem:[#allocation3 + $0x1f8] sm:$0xf0]  ;;  %v5571_v24 = vor.u32 %v5899_v17, %v5568_v25 }
 0x250   : > { %v5283_v18 = vor.u32 %v5827_v26, %v5280_v55  ;;  %v5515_v5 = vor.u32 %v5884_v32, %v5512_v23 }
 0x252   : > { %4485 = vmatpush.bf16.msra.mxu3 %v5563_v29  ;;  %4563 = vmatpush.bf16.msrb.mxu1 %v5575_v62  ;;  %v5539_v29 = vor.u32 %v5891_v21, %v5536_v31  ;;  %v5771_v62 = vor.u32 %v5948_v3, %v5768_v34 }
 0x253   : > { %4473 = vmatpush.bf16.msra.mxu2 %v5275_v63  ;;  %4551 = vmatpush.bf16.msrb.mxu0 %v5287_v54  ;;  %v5940_v63 = vld [vmem:[#allocation3 + $0x39c] sm:$0xf] }
 0x254   : > { %v5868_v54 = vld [vmem:[#allocation3 + $0x15c] sm:$0xf]  ;;  %v5739_v38 = vor.u32 %v5940_v63, %v5736_v36 }
 0x256   : > { %4486 = vmatpush.bf16.msra.mxu3 %v5531_v46  ;;  %4564 = vmatpush.bf16.msrb.mxu1 %v5543_v47  ;;  %v5707_v46 = vor.u32 %v5932_v39, %v5704_v40  ;;  %v5419_v47 = vor.u32 %v5860_v41, %v5416_v43 }
 0x257   : > { %4518 = vmatpush.bf16.msrb.mxu2 %v5507_v57  ;;  %4552 = vmatmul.bf16.vlgmr.msrb.gmra.mxu0 %v7259_v4  ;;  %v5451_v57 = vor.u32 %v5868_v54, %v5448_v37 }
 0x258   : > { %4474 = vmatmul.bf16.vlgmr.msra.gmra.mxu2 %v7259_v4 }
 0x259   : > { %4487 = vmatmul.bf16.vlgmr.msra.gmra.mxu3 %v7263_v33  ;;  %4565 = vmatmul.bf16.vlgmr.msrb.gmra.mxu1 %v7263_v33 }
 0x25a   : > { %4531 = vmatpush.bf16.msrb.mxu3 %v5763_v49  ;;  %v5924_v49 = vld [vmem:[#allocation3 + $0x31c] sm:$0xf] }
 0x25b   : > { %4519 = vmatpush.bf16.msrb.mxu2 %v5475_v50  ;;  %v5672_v50 = vld [vmem:[#allocation3 + $0x338] sm:$0xf0] }
 0x25c   : > { %v5675_v58 = vor.u32 %v5924_v49, %v5672_v50 }
 0x25e   : > { %4532 = vmatpush.bf16.msrb.mxu3 %v5731_v44  ;;  %v5916_v44 = vld [vmem:[#allocation3 + $0x2dc] sm:$0xf] }
 0x25f   : > { %4520 = vmatpush.bf16.msrb.mxu2 %v5443_v0  ;;  %v5640_v0 = vld [vmem:[#allocation3 + $0x2f8] sm:$0xf0] }
 0x260   : > { %v5643_v27 = vor.u32 %v5916_v44, %v5640_v0 }
 0x262   : > { %4533 = vmatpush.bf16.msrb.mxu3 %v5699_v1  ;;  %v5908_v1 = vld [vmem:[#allocation3 + $0x29c] sm:$0xf] }
 0x263   : > { %4521 = vmatpush.bf16.msrb.mxu2 %v5411_v2  ;;  %v5608_v2 = vld [vmem:[#allocation3 + $0x2b8] sm:$0xf0] }
 0x264   : > { %v5611_v8 = vor.u32 %v5908_v1, %v5608_v2 }
 0x266   : > { %4534 = vmatpush.bf16.msrb.mxu3 %v5667_v10  ;;  %v5900_v10 = vld [vmem:[#allocation3 + $0x25c] sm:$0xf] }
 0x267   : > { %4522 = vmatpush.bf16.msrb.mxu2 %v5379_v12  ;;  %v5576_v12 = vld [vmem:[#allocation3 + $0x278] sm:$0xf0] }
 0x268   : > { %v5579_v42 = vor.u32 %v5900_v10, %v5576_v12 }
 0x26a   : > { %4535 = vmatpush.bf16.msrb.mxu3 %v5635_v28  ;;  %v5892_v28 = vld [vmem:[#allocation3 + $0x21c] sm:$0xf] }
 0x26b   : > { %4523 = vmatpush.bf16.msrb.mxu2 %v5347_v16  ;;  %v5544_v16 = vld [vmem:[#allocation3 + $0x238] sm:$0xf0] }
 0x26c   : > { %v5547_v6 = vor.u32 %v5892_v28, %v5544_v16 }
 0x26e   : > { %4536 = vmatpush.bf16.msrb.mxu3 %v5603_v20 }
 0x26f   : > { %4524 = vmatpush.bf16.msrb.mxu2 %v5315_v11 }
 0x272   : > { %4537 = vmatpush.bf16.msrb.mxu3 %v5571_v24 }
 0x273   : > { %4525 = vmatpush.bf16.msrb.mxu2 %v5283_v18 }
 0x276   : > { %4538 = vmatpush.bf16.msrb.mxu3 %v5539_v29  ;;  %4526 = vmatmul.bf16.vlgmr.msrb.gmra.mxu2 %v7259_v4 }
 0x277   : > { %4570 = vmatpush.bf16.msra.mxu2 %v5515_v5 }
 0x279   : > { %4539 = vmatmul.bf16.vlgmr.msrb.gmra.mxu3 %v7263_v33 }
 0x27a   : > { %4583 = vmatpush.bf16.msra.mxu3 %v5771_v62 }
 0x27b   : > { %4571 = vmatpush.bf16.msra.mxu2 %v5483_v30 }
 0x27e   : > { %4584 = vmatpush.bf16.msra.mxu3 %v5739_v38 }
 0x27f   : > { %4572 = vmatpush.bf16.msra.mxu2 %v5451_v57 }
 0x282   : > { %4585 = vmatpush.bf16.msra.mxu3 %v5707_v46 }
 0x283   : > { %4573 = vmatpush.bf16.msra.mxu2 %v5419_v47 }
 0x286   : > { %4586 = vmatpush.bf16.msra.mxu3 %v5675_v58 }
 0x287   : > { %4574 = vmatpush.bf16.msra.mxu2 %v5387_v59 }
 0x28a   : > { %4587 = vmatpush.bf16.msra.mxu3 %v5643_v27 }
 0x28b   : > { %4575 = vmatpush.bf16.msra.mxu2 %v5355_v15 }
 0x28e   : > { %4588 = vmatpush.bf16.msra.mxu3 %v5611_v8 }
 0x28f   : > { %4576 = vmatpush.bf16.msra.mxu2 %v5323_v9 }
 0x292   : > { %4589 = vmatpush.bf16.msra.mxu3 %v5579_v42 }
 0x293   : > { %4577 = vmatpush.bf16.msra.mxu2 %v5291_v14 }
 0x296   : > { %4590 = vmatpush.bf16.msra.mxu3 %v5547_v6  ;;  %4578 = vmatmul.bf16.vlgmr.msra.gmra.mxu2 %v7259_v4 }
 0x299   : > { %4591 = vmatmul.bf16.vlgmr.msra.gmra.mxu3 %v7263_v33 }
 0x2b2   : > { %v4449_v61 = vpop.f32.mrf.mxu0 }
 0x2b6   : > { %v4462_v19 = vpop.f32.mrf.mxu1 }
 0x2b7   : > { %v4463_v45 = vadd.f32 %v4462_v19, %v4449_v61 }
 0x2b8   : > { %v4397_v20 = vpop.f32.mrf.mxu2 }
 0x2b9   : > { %4598 = vst [vmem:[%s7282_s13 + $0x10] sm:$0xff] %v4463_v45 }
 0x2ba   : > { %v4451_v11 = vpop.f32.mrf.mxu0 }
 0x2bc   : > { %v4410_v17 = vpop.f32.mrf.mxu3 }
 0x2bd   : > { %v4411_v25 = vadd.f32 %v4410_v17, %v4397_v20 }
 0x2be   : > { %v4464_v4 = vpop.f32.mrf.mxu1 }
 0x2bf   : > { %4596 = vst [vmem:[%s7282_s13] sm:$0xff] %v4411_v25 }
 0x2c0   : > { %v4399_v33 = vpop.f32.mrf.mxu2 }
 0x2c2   : > { %v4501_v26 = vpop.f32.mrf.mxu0 }
 0x2c4   : > { %v4412_v55 = vpop.f32.mrf.mxu3 }
 0x2c6   : > { %v4514_v32 = vpop.f32.mrf.mxu1 }
 0x2c7   : > { %v4515_v23 = vadd.f32 %v4514_v32, %v4501_v26 }
 0x2c8   : > { %v4423_v24 = vpop.f32.mrf.mxu2 }
 0x2c9   : > { %4600 = vst [vmem:[%s7282_s13 + $0x20] sm:$0xff] %v4515_v23 }
 0x2ca   : > { %v4503_v18 = vpop.f32.mrf.mxu0 }
 0x2cc   : > { %v4436_v21 = vpop.f32.mrf.mxu3 }
 0x2cd   : > { %v4437_v31 = vadd.f32 %v4436_v21, %v4423_v24 }
 0x2ce   : > { %v4516_v5 = vpop.f32.mrf.mxu1 }
 0x2cf   : > { %4597 = vst [vmem:[%s7282_s13 + $0x8] sm:$0xff] %v4437_v31 }
 0x2d0   : > { %v4425_v3 = vpop.f32.mrf.mxu2 }
 0x2d4   : > { %v4438_v34 = vpop.f32.mrf.mxu3  ;;  %v4553_v22 = vpop.f32.mrf.mxu0 }
 0x2d6   : > { %v4566_v35 = vpop.f32.mrf.mxu1 }
 0x2d7   : > { %v4567_v29 = vadd.f32 %v4566_v35, %v4553_v22 }
 0x2d9   : > { %4602 = vst [vmem:[%s7282_s13 + $0x30] sm:$0xff] %v4567_v29 }
 0x2db   : > { %v4475_v62 = vpop.f32.mrf.mxu2 }
 0x2dc   : > { %v4488_v30 = vpop.f32.mrf.mxu3  ;;  %v4555_v36 = vpop.f32.mrf.mxu0 }
 0x2dd   : > { %v4489_v63 = vadd.f32 %v4488_v30, %v4475_v62 }
 0x2de   : > { %v4568_v54 = vpop.f32.mrf.mxu1 }
 0x2df   : > { %4599 = vst [vmem:[%s7282_s13 + $0x18] sm:$0xff] %v4489_v63 }
 0x2e3   : > { %v4477_v37 = vpop.f32.mrf.mxu2 }
 0x2e4   : > { %v4490_v38 = vpop.f32.mrf.mxu3 }
 0x2f9   : > { %v4527_v57 = vpop.f32.mrf.mxu2 }
 0x2fc   : > { %v4540_v39 = vpop.f32.mrf.mxu3 }
 0x2fd   : > { %v4541_v40 = vadd.f32 %v4540_v39, %v4527_v57 }
 0x2ff   : > { %4601 = vst [vmem:[%s7282_s13 + $0x28] sm:$0xff] %v4541_v40 }
 0x301   : > { %v4529_v41 = vpop.f32.mrf.mxu2 }
 0x304   : > { %v4542_v43 = vpop.f32.mrf.mxu3 }
 0x319   : > { %v4579_v46 = vpop.f32.mrf.mxu2 }
 0x31c   : > { %v4592_v47 = vpop.f32.mrf.mxu3 }
 0x31d   : > { %v4593_v49 = vadd.f32 %v4592_v47, %v4579_v46 }
 0x31f   : > { %4603 = vst [vmem:[%s7282_s13 + $0x38] sm:$0xff] %v4593_v49 }
 0x320   : > { %6091 = shalt.err (!%p6088_p9)
}
 0x321   : > { %5959 = dma.vmem_to_hbm [thread:$0]  (%p6225_p4), %s4621_s29, 1024, %s4623_s30, %s4605_s5   ;;  %v4581_v50 = vpop.f32.mrf.mxu2 }
 0x324   : > { %v4594_v51 = vpop.f32.mrf.mxu3 }
 0x325 PF: > { %p5971_p10 = scmp.ge.s32.totalorder %s6146_s20, 2  ;;  %s4634_s14 = sand.u32 1, %s6126_s15  }
 0x326   : > { %s4635_s12 = scalar_lea.sflag [#allocation5], %s4634_s14 }
 0x327   : > { %p5966_p11 = pnand %p5971_p10, %p6232_p8 }
 0x329   : > { %p5967_p12 = pneg %p5966_p11 }
 0x32b   : > { %6121 = dma.done.wait (%p5967_p12), %s4635_s12, 1024  }
 0x32c   : > { %6123 = vsyncadd (%p5967_p12), %s4635_s12, 4294966272  ;;  %s18_s20 = sadd.s32 1, %s6146_s20   ;;  %s7342_s15 = smov %s6130_s16 }
 0x32d   : > { %p15_p13 = scmp.ge.s32.totalorder %s18_s20, 4   ;;  %s7343_s16 = smov %s6134_s17 }
 0x32e   : > { %s7344_s17 = smov %s6238_s28  ;;  %s7345_s18 = smov %s6142_s19 }
 0x32f   : > { %s7346_s19 = smov %s7348_s23  ;;  %17 = sbr.rel (!%p15_p13) target bundleno = 5 (0x5), region = 84 }
 0x334   :  { %4641 = vsyncpa [#allocation4], 1 }
 0x335   :  { %4643 = vsyncpa [#allocation4 + $0x1], 1 }
 0x336   :  { %4644 = vsyncpa [#allocation5], 1 }
 0x337   :  { %4646 = vsyncpa [#allocation5 + $0x1], 1 }

</bundles_post_ra>
